<compile_context>
chip_gen: v7x
topology: tpu7x:2x2x1
jax: 0.10.0
libtpu: 0.0.40
codegen_flags: <defaults>
</compile_context>

<pallas_src>
import functools

import jax
import jax.numpy as jnp
from jax import lax
from jax.experimental import pallas as pl
from jax.experimental.pallas import tpu as pltpu

LEAKY_SLOPE = 0.01   # nn.LeakyReLU() default
BN_EPS = 1e-5        # nn.BatchNorm2d default


@functools.lru_cache(maxsize=None)
def _vmem_limit_bytes():
    # Size the scoped-VMEM limit from the actual chip so the same code stays
    # inside v7x's 64 MiB as well as v5e/v6e's 128 MiB.
    try:
        cap = pltpu.get_tpu_info().vmem_capacity_bytes
    except Exception:
        cap = 64 * 1024 * 1024
    return int(min(cap * 3 // 4, 100 * 1024 * 1024))


def _pick_th(H, Nd):
    """Row-strip height: as large as the image allows (better MXU M-dim fill,
    fewer grid steps) while keeping the f32 accumulator around <=128 KB."""
    cap = max(8, (128 * 1024) // (4 * Nd))
    for th in (256, 128, 64, 32, 16, 8):
        if th <= cap and H % th == 0:
            return th
    return H          # small / odd H: whole plane in one strip


# ----------------------------------------------------------------------------
# Kernels
# ----------------------------------------------------------------------------
def _conv_kernel(x_ref, w_ref, b_ref, o_ref, *, TH, KH, n_strips):
    """One row strip of a same-padded stride-1 conv:
         o[row0+j] = bias + sum_kh win[j+kh] @ band[kh]   (KH bf16 MXU matmuls)."""
    nd = o_ref.shape[-1]
    if n_strips == 1:
        win = x_ref[0]                                       # whole padded plane
    else:
        row0 = pl.multiple_of(pl.program_id(1) * TH, TH)
        win = x_ref[0, pl.ds(row0, TH + KH - 1), :]          # one bf16 window load
    acc = jnp.zeros((TH, nd), jnp.float32)
    for kh in range(KH):                                     # kw, Cin folded into K
        acc = acc + jnp.dot(win[kh:kh + TH], w_ref[kh],
                            preferred_element_type=jnp.float32)
    o_ref[0] = (acc + b_ref[...]).astype(o_ref.dtype)


def _resblock_kernel(x_ref, w1_ref, b1_ref, w2_ref, b2_ref, w11_ref, b11_ref,
                     sum_ref, *out_refs, TH, H, n_strips, last):
    """Whole ResidualBlock + its denseblock_out for one row strip:
         h1 = leaky(conv1(x) + b1)        (BN1 folded; halo kept in vregs only)
         y  = conv2(h1) + b2 + x          (BN2 folded; skip from the same window)
         o1 = y @ kron(I_W, w11) + b11 ;  sum' = sum + o1
       Last block emits y + sum' (the network's final `o + sum_i o1_i`)."""
    nd = w2_ref.shape[-1]
    if n_strips == 1:
        row0 = 0
        win = x_ref[0]                                       # (TH+4, W*C) bf16
    else:
        row0 = pl.multiple_of(pl.program_id(1) * TH, TH)
        win = x_ref[0, pl.ds(row0, TH + 4), :]

    # conv1 -> BN1 -> LeakyReLU for h1 rows [row0-1, row0+TH] (halo rows included)
    acc1 = jnp.zeros((TH + 2, nd), jnp.float32)
    for kh in range(3):
        acc1 = acc1 + jnp.dot(win[kh:kh + TH + 2], w1_ref[kh],
                              preferred_element_type=jnp.float32)
    h1 = acc1 + b1_ref[...]
    h1 = jnp.where(h1 > 0, h1, LEAKY_SLOPE * h1)
    r = row0 - 1 + lax.broadcasted_iota(jnp.int32, (TH + 2, 1), 0)
    h1 = jnp.where((r >= 0) & (r < H), h1, 0.0)              # conv2's zero-pad rows
    h1b = h1.astype(jnp.bfloat16)

    # conv2 -> BN2 -> + skip
    acc2 = jnp.zeros((TH, nd), jnp.float32)
    for kh in range(3):
        acc2 = acc2 + jnp.dot(h1b[kh:kh + TH], w2_ref[kh],
                              preferred_element_type=jnp.float32)
    y = acc2 + b2_ref[...] + win[2:2 + TH].astype(jnp.float32)

    # fused 1x1 denseblock_out + running sum of its outputs
    o1 = jnp.dot(y.astype(jnp.bfloat16), w11_ref[...],
                 preferred_element_type=jnp.float32) + b11_ref[...]
    s = sum_ref[0] + o1
    if last:
        out_refs[0][0] = (y + s).astype(out_refs[0].dtype)   # fused final add
    else:
        out_refs[0][0] = y.astype(out_refs[0].dtype)
        out_refs[1][0] = s


# ----------------------------------------------------------------------------
# Wrapper-side weight / layout transforms (weights are tiny; trace-time only)
# ----------------------------------------------------------------------------
def _band_weight(w, W):
    """(KH, KW, Cin, Cout) HWIO -> block-Toeplitz (KH, W*Cin, W*Cout) so a
    same-padded stride-1 conv over a width-flattened (unpadded) row becomes one
    matmul per kh tap (kw and Cin folded into the contraction)."""
    KH, KW, Cin, Cout = w.shape
    pad = (KW - 1) // 2
    cols = []
    for wo in range(W):
        lo = max(0, pad - wo)                 # taps falling off the left edge
        hi = max(0, wo - pad + KW - W)        # taps falling off the right edge
        wc = w[:, lo:KW - hi]                 # (KH, KW-lo-hi, Cin, Cout)
        start = wo - pad + lo
        cols.append(jnp.pad(wc, ((0, 0), (start, W - start - (KW - lo - hi)),
                                 (0, 0), (0, 0))))
    band = jnp.stack(cols, axis=3)            # (KH, W, Cin, W, Cout)
    return band.reshape(KH, W * Cin, W * Cout)


def _fold_bn(w, b, gamma, beta, mean, var):
    # TODO(synk): BatchNorm folded in inference mode (running stats); training
    # mode batch statistics are not reproduced.
    scale = gamma / jnp.sqrt(var + BN_EPS)
    return w * scale, scale * (b - mean) + beta


def _pad_rows_bf16(x, pad):
    """(N,H,W,C) -> height-padded, lane-dense bf16 (N, H+2*pad, W*C)."""
    N, H, W, C = x.shape
    xb = x.astype(jnp.bfloat16).reshape(N, H, W * C)
    return jnp.pad(xb, ((0, 0), (pad, pad), (0, 0)))


# ----------------------------------------------------------------------------
# Fused single conv (same padding, stride 1), NHWC in / NHWC out
# ----------------------------------------------------------------------------
def conv2d_lane(x, w, b, *, out_dtype=jnp.bfloat16):
    N, H, W, Cin = x.shape
    KH, KW, _, Cout = w.shape
    pad = (KH - 1) // 2
    K, Nd = W * Cin, W * Cout

    xp = _pad_rows_bf16(x, pad)                              # (N, H+2p, W*Cin)
    band = _band_weight(w.astype(jnp.float32), W).astype(jnp.bfloat16)
    bias = jnp.tile(b.astype(jnp.float32), W)[None, :]       # (1, W*Cout)

    TH = _pick_th(H, Nd)
    S = H // TH
    kernel = functools.partial(_conv_kernel, TH=TH, KH=KH, n_strips=S)

    out = pl.pallas_call(
        kernel,
        grid=(N, S),
        in_specs=[pl.BlockSpec((1, H + 2 * pad, K), lambda n, t: (n, 0, 0)),
                  pl.BlockSpec((KH, K, Nd), lambda n, t: (0, 0, 0)),
                  pl.BlockSpec((1, Nd), lambda n, t: (0, 0))],
        out_specs=pl.BlockSpec((1, TH, Nd), lambda n, t: (n, t, 0)),
        out_shape=jax.ShapeDtypeStruct((N, H, Nd), out_dtype),
        compiler_params=pltpu.CompilerParams(
            dimension_semantics=("parallel", "parallel"),
            vmem_limit_bytes=_vmem_limit_bytes()),
    )(xp, band, bias)
    return out.reshape(N, H, W, Cout)


# ----------------------------------------------------------------------------
# Fused ResidualBlock (+ denseblock_out 1x1 + running sum), one pallas_call
# ----------------------------------------------------------------------------
def residual_block_fused(x, p, run_sum, *, last):
    N, H, W, C = x.shape
    Nd = W * C

    w1, b1 = _fold_bn(p["w1"], p["b1"], p["bn1_gamma"], p["bn1_beta"],
                      p["bn1_mean"], p["bn1_var"])
    w2, b2 = _fold_bn(p["w2"], p["b2"], p["bn2_gamma"], p["bn2_beta"],
                      p["bn2_mean"], p["bn2_var"])
    band1 = _band_weight(w1.astype(jnp.float32), W).astype(jnp.bfloat16)
    band2 = _band_weight(w2.astype(jnp.float32), W).astype(jnp.bfloat16)
    b1d = jnp.tile(b1.astype(jnp.float32), W)[None, :]
    b2d = jnp.tile(b2.astype(jnp.float32), W)[None, :]
    w11k = jnp.kron(jnp.eye(W, dtype=jnp.float32),
                    p["w11"][0, 0].astype(jnp.float32)).astype(jnp.bfloat16)
    b11d = jnp.tile(p["b11"].astype(jnp.float32), W)[None, :]

    xp = _pad_rows_bf16(x, 2)                 # pad 2 = conv1 halo + conv2's h1 halo
    sum_in = run_sum.reshape(N, H, Nd).astype(jnp.float32)

    TH = _pick_th(H, Nd)
    S = H // TH
    kernel = functools.partial(_resblock_kernel, TH=TH, H=H, n_strips=S, last=last)

    in_specs = [
        pl.BlockSpec((1, H + 4, Nd), lambda n, t: (n, 0, 0)),   # padded o_pre plane
        pl.BlockSpec((3, Nd, Nd), lambda n, t: (0, 0, 0)),      # band1 (BN folded)
        pl.BlockSpec((1, Nd), lambda n, t: (0, 0)),             # b1
        pl.BlockSpec((3, Nd, Nd), lambda n, t: (0, 0, 0)),      # band2 (BN folded)
        pl.BlockSpec((1, Nd), lambda n, t: (0, 0)),             # b2
        pl.BlockSpec((Nd, Nd), lambda n, t: (0, 0)),            # kron(I_W, w11)
        pl.BlockSpec((1, Nd), lambda n, t: (0, 0)),             # b11
        pl.BlockSpec((1, TH, Nd), lambda n, t: (n, t, 0)),      # running-sum strip
    ]
    args = (xp, band1, b1d, band2, b2d, w11k, b11d, sum_in)
    strip = pl.BlockSpec((1, TH, Nd), lambda n, t: (n, t, 0))

    if last:
        out_specs = strip
        out_shape = jax.ShapeDtypeStruct((N, H, Nd), jnp.bfloat16)
        io_alias = {}
    else:
        out_specs = (strip, strip)
        out_shape = (jax.ShapeDtypeStruct((N, H, Nd), jnp.bfloat16),
                     jax.ShapeDtypeStruct((N, H, Nd), jnp.float32))
        io_alias = {7: 1}                     # update the running sum in place

    outs = pl.pallas_call(
        kernel,
        grid=(N, S),
        in_specs=in_specs,
        out_specs=out_specs,
        out_shape=out_shape,
        input_output_aliases=io_alias,
        compiler_params=pltpu.CompilerParams(
            dimension_semantics=("parallel", "parallel"),
            vmem_limit_bytes=_vmem_limit_bytes()),
    )(*args)

    if last:
        return outs.reshape(N, H, W, C)
    o, s = outs
    return o.reshape(N, H, W, C), s.reshape(N, H, W, C)


# ----------------------------------------------------------------------------
# PixelShuffle(2) — wrapper-side layout glue (matches torch.nn.PixelShuffle)
# ----------------------------------------------------------------------------
def pixel_shuffle_nhwc(x, r):
    N, H, W, C4 = x.shape
    C = C4 // (r * r)
    x = x.reshape(N, H, W, C, r, r)
    x = jnp.transpose(x, (0, 1, 4, 2, 5, 3))          # N, H, r, W, r, C
    return x.reshape(N, H * r, W * r, C)


# ----------------------------------------------------------------------------
# Deterministic synthetic parameters (mirrors the module __init__ shapes)
# ----------------------------------------------------------------------------
def init_params(key, in_dim=3, C=16, block_size=2):
    keys = iter(jax.random.split(key, 8 + 4 * block_size))

    def conv_w(k, kh, kw, cin, cout):
        return jax.random.normal(k, (kh, kw, cin, cout), jnp.float32) * 0.05

    params = {
        "first_w": conv_w(next(keys), 9, 9, in_dim, C),
        "first_b": jnp.zeros((C,), jnp.float32),
        "up1_w": conv_w(next(keys), 3, 3, C, 4 * C),
        "up1_b": jnp.zeros((4 * C,), jnp.float32),
        "up2_w": conv_w(next(keys), 3, 3, C, 4 * C),
        "up2_b": jnp.zeros((4 * C,), jnp.float32),
        "up3_w": conv_w(next(keys), 3, 3, C, 3),
        "up3_b": jnp.zeros((3,), jnp.float32),
    }

    blocks = []
    for _ in range(block_size):
        blocks.append(dict(
            w1=conv_w(next(keys), 3, 3, C, C), b1=jnp.zeros((C,), jnp.float32),
            bn1_gamma=jnp.ones((C,), jnp.float32), bn1_beta=jnp.zeros((C,), jnp.float32),
            bn1_mean=jnp.zeros((C,), jnp.float32), bn1_var=jnp.ones((C,), jnp.float32),
            w2=conv_w(next(keys), 3, 3, C, C), b2=jnp.zeros((C,), jnp.float32),
            bn2_gamma=jnp.ones((C,), jnp.float32), bn2_beta=jnp.zeros((C,), jnp.float32),
            bn2_mean=jnp.zeros((C,), jnp.float32), bn2_var=jnp.ones((C,), jnp.float32),
            w11=conv_w(next(keys), 1, 1, C, C),
            b11=jax.random.normal(next(keys), (C,), jnp.float32) * 0.01,
        ))
    params["blocks"] = blocks
    return params


# ----------------------------------------------------------------------------
# G forward (NCHW in / NCHW out, like the PyTorch module)
# ----------------------------------------------------------------------------
def g_forward(params, x_nchw):
    x = jnp.transpose(x_nchw, (0, 2, 3, 1))           # NCHW -> NHWC
    N, H, W, _ = x.shape
    C = params["first_w"].shape[-1]

    # first_in: Conv2d(in_dim, C, k=9, pad=4), no activation
    o = conv2d_lane(x, params["first_w"], params["first_b"])

    run_sum = jnp.zeros((N, H, W, C), jnp.float32)    # sum of denseblock_out outputs
    nblocks = len(params["blocks"])
    for i, blk in enumerate(params["blocks"]):
        if i == nblocks - 1:
            o = residual_block_fused(o, blk, run_sum, last=True)   # y + sum fused
        else:
            o, run_sum = residual_block_fused(o, blk, run_sum, last=False)

    # upsample head: conv -> PixelShuffle(2) -> conv -> PixelShuffle(2) -> conv
    u = conv2d_lane(o, params["up1_w"], params["up1_b"])
    u = pixel_shuffle_nhwc(u, 2)
    u = conv2d_lane(u, params["up2_w"], params["up2_b"])
    u = pixel_shuffle_nhwc(u, 2)
    # pad Cout 3->4 so the (largest) final output is lane-dense; drop the pad chan
    w3 = jnp.pad(params["up3_w"], ((0, 0), (0, 0), (0, 0), (0, 1)))
    b3 = jnp.pad(params["up3_b"], ((0, 1),))
    out = conv2d_lane(u, w3, b3, out_dtype=jnp.float32)[..., :3]

    return jnp.transpose(out, (0, 3, 1, 2))           # NHWC -> NCHW


if __name__ == "__main__":
    key = jax.random.PRNGKey(0)
    pkey, xkey = jax.random.split(key)

    N, in_dim, H, W = 2, 3, 8, 8
    res_channel, block_size = 16, 2

    params = init_params(pkey, in_dim=in_dim, C=res_channel,
                         block_size=block_size)
    x = jax.random.normal(xkey, (N, in_dim, H, W), jnp.float32)   # NCHW

    out = jax.jit(g_forward)(params, x)
    out = jax.block_until_ready(out)

    assert out.shape == (N, 3, H * 4, W * 4), out.shape
    assert bool(jnp.all(jnp.isfinite(out)))
    print("KERNEL_OK")
</pallas_src>

<mosaic_0001>
module attributes {stable_mosaic.version = 11 : i64} {
  func.func @_conv_kernel(%arg0: i32, %arg1: i32, %arg2: memref<1x16x24xbf16, #tpu.memory_space<vmem>>, %arg3: memref<9x24x128xbf16, #tpu.memory_space<vmem>>, %arg4: memref<1x128xf32, #tpu.memory_space<vmem>>, %arg5: memref<1x8x128xbf16, #tpu.memory_space<vmem>>) attributes {dimension_semantics = [#tpu.dimension_semantics<parallel>, #tpu.dimension_semantics<parallel>], iteration_bounds = array<i64: 2, 1>, scalar_prefetch = 0 : i64, scratch_operands = 0 : i64, tpu.core_type = #tpu.core_type<tc>, window_params = [{transform_indices = @transform_0, window_bounds = array<i64: 1, 16, 24>}, {pipeline_mode = #tpu.pipeline_mode<synchronous>, transform_indices = @transform_1, window_bounds = array<i64: 9, 24, 128>}, {pipeline_mode = #tpu.pipeline_mode<synchronous>, transform_indices = @transform_2, window_bounds = array<i64: 1, 128>}, {transform_indices = @transform_3, window_bounds = array<i64: 1, 8, 128>}]} {
    %c0 = arith.constant 0 : index
    %c0_0 = arith.constant 0 : index
    %c0_1 = arith.constant 0 : index
    %0 = vector.load %arg2[%c0, %c0_0, %c0_1] : memref<1x16x24xbf16, #tpu.memory_space<vmem>>, vector<1x16x24xbf16>
    %1 = vector.shape_cast %0 : vector<1x16x24xbf16> to vector<16x24xbf16>
    %cst = arith.constant 0.000000e+00 : f32
    %2 = vector.broadcast %cst : f32 to vector<8x128xf32>
    %3 = vector.extract_strided_slice %1 {offsets = [0, 0], sizes = [8, 24], strides = [1, 1]} : vector<16x24xbf16> to vector<8x24xbf16>
    %c0_2 = arith.constant 0 : index
    %c0_3 = arith.constant 0 : index
    %c0_4 = arith.constant 0 : index
    %4 = vector.load %arg3[%c0_2, %c0_3, %c0_4] : memref<9x24x128xbf16, #tpu.memory_space<vmem>>, vector<1x24x128xbf16>
    %5 = vector.shape_cast %4 : vector<1x24x128xbf16> to vector<24x128xbf16>
    %cst_5 = arith.constant dense<0.000000e+00> : vector<8x128xf32>
    %6 = tpu.matmul %3, %5, %cst_5 {dimension_numbers = #tpu.dot_dimension_numbers<[1], [0], [0], [1], [0, 0, 1, 1], [], []>} : vector<8x24xbf16>, vector<24x128xbf16>, vector<8x128xf32> -> vector<8x128xf32>
    %7 = arith.addf %2, %6 : vector<8x128xf32>
    %8 = vector.extract_strided_slice %1 {offsets = [1, 0], sizes = [8, 24], strides = [1, 1]} : vector<16x24xbf16> to vector<8x24xbf16>
    %c1 = arith.constant 1 : index
    %c0_6 = arith.constant 0 : index
    %c0_7 = arith.constant 0 : index
    %9 = vector.load %arg3[%c1, %c0_6, %c0_7] : memref<9x24x128xbf16, #tpu.memory_space<vmem>>, vector<1x24x128xbf16>
    %10 = vector.shape_cast %9 : vector<1x24x128xbf16> to vector<24x128xbf16>
    %cst_8 = arith.constant dense<0.000000e+00> : vector<8x128xf32>
    %11 = tpu.matmul %8, %10, %cst_8 {dimension_numbers = #tpu.dot_dimension_numbers<[1], [0], [0], [1], [0, 0, 1, 1], [], []>} : vector<8x24xbf16>, vector<24x128xbf16>, vector<8x128xf32> -> vector<8x128xf32>
    %12 = arith.addf %7, %11 : vector<8x128xf32>
    %13 = vector.extract_strided_slice %1 {offsets = [2, 0], sizes = [8, 24], strides = [1, 1]} : vector<16x24xbf16> to vector<8x24xbf16>
    %c2 = arith.constant 2 : index
    %c0_9 = arith.constant 0 : index
    %c0_10 = arith.constant 0 : index
    %14 = vector.load %arg3[%c2, %c0_9, %c0_10] : memref<9x24x128xbf16, #tpu.memory_space<vmem>>, vector<1x24x128xbf16>
    %15 = vector.shape_cast %14 : vector<1x24x128xbf16> to vector<24x128xbf16>
    %cst_11 = arith.constant dense<0.000000e+00> : vector<8x128xf32>
    %16 = tpu.matmul %13, %15, %cst_11 {dimension_numbers = #tpu.dot_dimension_numbers<[1], [0], [0], [1], [0, 0, 1, 1], [], []>} : vector<8x24xbf16>, vector<24x128xbf16>, vector<8x128xf32> -> vector<8x128xf32>
    %17 = arith.addf %12, %16 : vector<8x128xf32>
    %18 = vector.extract_strided_slice %1 {offsets = [3, 0], sizes = [8, 24], strides = [1, 1]} : vector<16x24xbf16> to vector<8x24xbf16>
    %c3 = arith.constant 3 : index
    %c0_12 = arith.constant 0 : index
    %c0_13 = arith.constant 0 : index
    %19 = vector.load %arg3[%c3, %c0_12, %c0_13] : memref<9x24x128xbf16, #tpu.memory_space<vmem>>, vector<1x24x128xbf16>
    %20 = vector.shape_cast %19 : vector<1x24x128xbf16> to vector<24x128xbf16>
    %cst_14 = arith.constant dense<0.000000e+00> : vector<8x128xf32>
    %21 = tpu.matmul %18, %20, %cst_14 {dimension_numbers = #tpu.dot_dimension_numbers<[1], [0], [0], [1], [0, 0, 1, 1], [], []>} : vector<8x24xbf16>, vector<24x128xbf16>, vector<8x128xf32> -> vector<8x128xf32>
    %22 = arith.addf %17, %21 : vector<8x128xf32>
    %23 = vector.extract_strided_slice %1 {offsets = [4, 0], sizes = [8, 24], strides = [1, 1]} : vector<16x24xbf16> to vector<8x24xbf16>
    %c4 = arith.constant 4 : index
    %c0_15 = arith.constant 0 : index
    %c0_16 = arith.constant 0 : index
    %24 = vector.load %arg3[%c4, %c0_15, %c0_16] : memref<9x24x128xbf16, #tpu.memory_space<vmem>>, vector<1x24x128xbf16>
    %25 = vector.shape_cast %24 : vector<1x24x128xbf16> to vector<24x128xbf16>
    %cst_17 = arith.constant dense<0.000000e+00> : vector<8x128xf32>
    %26 = tpu.matmul %23, %25, %cst_17 {dimension_numbers = #tpu.dot_dimension_numbers<[1], [0], [0], [1], [0, 0, 1, 1], [], []>} : vector<8x24xbf16>, vector<24x128xbf16>, vector<8x128xf32> -> vector<8x128xf32>
    %27 = arith.addf %22, %26 : vector<8x128xf32>
    %28 = vector.extract_strided_slice %1 {offsets = [5, 0], sizes = [8, 24], strides = [1, 1]} : vector<16x24xbf16> to vector<8x24xbf16>
    %c5 = arith.constant 5 : index
    %c0_18 = arith.constant 0 : index
    %c0_19 = arith.constant 0 : index
    %29 = vector.load %arg3[%c5, %c0_18, %c0_19] : memref<9x24x128xbf16, #tpu.memory_space<vmem>>, vector<1x24x128xbf16>
    %30 = vector.shape_cast %29 : vector<1x24x128xbf16> to vector<24x128xbf16>
    %cst_20 = arith.constant dense<0.000000e+00> : vector<8x128xf32>
    %31 = tpu.matmul %28, %30, %cst_20 {dimension_numbers = #tpu.dot_dimension_numbers<[1], [0], [0], [1], [0, 0, 1, 1], [], []>} : vector<8x24xbf16>, vector<24x128xbf16>, vector<8x128xf32> -> vector<8x128xf32>
    %32 = arith.addf %27, %31 : vector<8x128xf32>
    %33 = vector.extract_strided_slice %1 {offsets = [6, 0], sizes = [8, 24], strides = [1, 1]} : vector<16x24xbf16> to vector<8x24xbf16>
    %c6 = arith.constant 6 : index
    %c0_21 = arith.constant 0 : index
    %c0_22 = arith.constant 0 : index
    %34 = vector.load %arg3[%c6, %c0_21, %c0_22] : memref<9x24x128xbf16, #tpu.memory_space<vmem>>, vector<1x24x128xbf16>
    %35 = vector.shape_cast %34 : vector<1x24x128xbf16> to vector<24x128xbf16>
    %cst_23 = arith.constant dense<0.000000e+00> : vector<8x128xf32>
    %36 = tpu.matmul %33, %35, %cst_23 {dimension_numbers = #tpu.dot_dimension_numbers<[1], [0], [0], [1], [0, 0, 1, 1], [], []>} : vector<8x24xbf16>, vector<24x128xbf16>, vector<8x128xf32> -> vector<8x128xf32>
    %37 = arith.addf %32, %36 : vector<8x128xf32>
    %38 = vector.extract_strided_slice %1 {offsets = [7, 0], sizes = [8, 24], strides = [1, 1]} : vector<16x24xbf16> to vector<8x24xbf16>
    %c7 = arith.constant 7 : index
    %c0_24 = arith.constant 0 : index
    %c0_25 = arith.constant 0 : index
    %39 = vector.load %arg3[%c7, %c0_24, %c0_25] : memref<9x24x128xbf16, #tpu.memory_space<vmem>>, vector<1x24x128xbf16>
    %40 = vector.shape_cast %39 : vector<1x24x128xbf16> to vector<24x128xbf16>
    %cst_26 = arith.constant dense<0.000000e+00> : vector<8x128xf32>
    %41 = tpu.matmul %38, %40, %cst_26 {dimension_numbers = #tpu.dot_dimension_numbers<[1], [0], [0], [1], [0, 0, 1, 1], [], []>} : vector<8x24xbf16>, vector<24x128xbf16>, vector<8x128xf32> -> vector<8x128xf32>
    %42 = arith.addf %37, %41 : vector<8x128xf32>
    %43 = vector.extract_strided_slice %1 {offsets = [8, 0], sizes = [8, 24], strides = [1, 1]} : vector<16x24xbf16> to vector<8x24xbf16>
    %c8 = arith.constant 8 : index
    %c0_27 = arith.constant 0 : index
    %c0_28 = arith.constant 0 : index
    %44 = vector.load %arg3[%c8, %c0_27, %c0_28] : memref<9x24x128xbf16, #tpu.memory_space<vmem>>, vector<1x24x128xbf16>
    %45 = vector.shape_cast %44 : vector<1x24x128xbf16> to vector<24x128xbf16>
    %cst_29 = arith.constant dense<0.000000e+00> : vector<8x128xf32>
    %46 = tpu.matmul %43, %45, %cst_29 {dimension_numbers = #tpu.dot_dimension_numbers<[1], [0], [0], [1], [0, 0, 1, 1], [], []>} : vector<8x24xbf16>, vector<24x128xbf16>, vector<8x128xf32> -> vector<8x128xf32>
    %47 = arith.addf %42, %46 : vector<8x128xf32>
    %c0_30 = arith.constant 0 : index
    %c0_31 = arith.constant 0 : index
    %48 = vector.load %arg4[%c0_30, %c0_31] : memref<1x128xf32, #tpu.memory_space<vmem>>, vector<1x128xf32>
    %49 = vector.broadcast %48 : vector<1x128xf32> to vector<8x128xf32>
    %50 = arith.addf %47, %49 : vector<8x128xf32>
    %51 = arith.truncf %50 : vector<8x128xf32> to vector<8x128xbf16>
    %c0_32 = arith.constant 0 : index
    %c0_33 = arith.constant 0 : index
    %c0_34 = arith.constant 0 : index
    %52 = vector.load %arg5[%c0_32, %c0_33, %c0_34] : memref<1x8x128xbf16, #tpu.memory_space<vmem>>, vector<1x8x128xbf16>
    %53 = vector.shape_cast %52 : vector<1x8x128xbf16> to vector<8x128xbf16>
    %54 = vector.shape_cast %51 : vector<8x128xbf16> to vector<1x8x128xbf16>
    tpu.vector_store %arg5[%c0_32, %c0_33, %c0_34], %54 {strides = array<i32>} : memref<1x8x128xbf16, #tpu.memory_space<vmem>>, vector<1x8x128xbf16>,
    return
  }
  func.func @transform_0(%arg0: i32, %arg1: i32) -> (i32, i32, i32) {
    %c0_i32 = arith.constant 0 : i32
    %c0_i32_0 = arith.constant 0 : i32
    %c0_i32_1 = arith.constant 0 : i32
    return %arg0, %c0_i32, %c0_i32_0 : i32, i32, i32
  }
  func.func @transform_1(%arg0: i32, %arg1: i32) -> (i32, i32, i32) {
    %c0_i32 = arith.constant 0 : i32
    %c0_i32_0 = arith.constant 0 : i32
    %c0_i32_1 = arith.constant 0 : i32
    %c0_i32_2 = arith.constant 0 : i32
    return %c0_i32, %c0_i32_0, %c0_i32_1 : i32, i32, i32
  }
  func.func @transform_2(%arg0: i32, %arg1: i32) -> (i32, i32) {
    %c0_i32 = arith.constant 0 : i32
    %c0_i32_0 = arith.constant 0 : i32
    %c0_i32_1 = arith.constant 0 : i32
    return %c0_i32, %c0_i32_0 : i32, i32
  }
  func.func @transform_3(%arg0: i32, %arg1: i32) -> (i32, i32, i32) {
    %c0_i32 = arith.constant 0 : i32
    %c0_i32_0 = arith.constant 0 : i32
    return %arg0, %arg1, %c0_i32 : i32, i32, i32
  }
}

module attributes {stable_mosaic.version = 11 : i64} {
  func.func @_resblock_kernel(%arg0: i32, %arg1: i32, %arg2: memref<1x12x128xbf16, #tpu.memory_space<vmem>>, %arg3: memref<3x128x128xbf16, #tpu.memory_space<vmem>>, %arg4: memref<1x128xf32, #tpu.memory_space<vmem>>, %arg5: memref<3x128x128xbf16, #tpu.memory_space<vmem>>, %arg6: memref<1x128xf32, #tpu.memory_space<vmem>>, %arg7: memref<128x128xbf16, #tpu.memory_space<vmem>>, %arg8: memref<1x128xf32, #tpu.memory_space<vmem>>, %arg9: memref<1x8x128xf32, #tpu.memory_space<vmem>>, %arg10: memref<1x8x128xbf16, #tpu.memory_space<vmem>>, %arg11: memref<1x8x128xf32, #tpu.memory_space<vmem>>) attributes {dimension_semantics = [#tpu.dimension_semantics<parallel>, #tpu.dimension_semantics<parallel>], iteration_bounds = array<i64: 2, 1>, scalar_prefetch = 0 : i64, scratch_operands = 0 : i64, tpu.core_type = #tpu.core_type<tc>, window_params = [{transform_indices = @transform_0, window_bounds = array<i64: 1, 12, 128>}, {pipeline_mode = #tpu.pipeline_mode<synchronous>, transform_indices = @transform_1, window_bounds = array<i64: 3, 128, 128>}, {pipeline_mode = #tpu.pipeline_mode<synchronous>, transform_indices = @transform_2, window_bounds = array<i64: 1, 128>}, {pipeline_mode = #tpu.pipeline_mode<synchronous>, transform_indices = @transform_3, window_bounds = array<i64: 3, 128, 128>}, {pipeline_mode = #tpu.pipeline_mode<synchronous>, transform_indices = @transform_4, window_bounds = array<i64: 1, 128>}, {pipeline_mode = #tpu.pipeline_mode<synchronous>, transform_indices = @transform_5, window_bounds = array<i64: 128, 128>}, {pipeline_mode = #tpu.pipeline_mode<synchronous>, transform_indices = @transform_6, window_bounds = array<i64: 1, 128>}, {transform_indices = @transform_7, window_bounds = array<i64: 1, 8, 128>}, {transform_indices = @transform_8, window_bounds = array<i64: 1, 8, 128>}, {transform_indices = @transform_9, window_bounds = array<i64: 1, 8, 128>}]} {
    %c0 = arith.constant 0 : index
    %c0_0 = arith.constant 0 : index
    %c0_1 = arith.constant 0 : index
    %0 = vector.load %arg2[%c0, %c0_0, %c0_1] : memref<1x12x128xbf16, #tpu.memory_space<vmem>>, vector<1x12x128xbf16>
    %1 = vector.shape_cast %0 : vector<1x12x128xbf16> to vector<12x128xbf16>
    %cst = arith.constant 0.000000e+00 : f32
    %2 = vector.broadcast %cst : f32 to vector<10x128xf32>
    %3 = vector.extract_strided_slice %1 {offsets = [0, 0], sizes = [10, 128], strides = [1, 1]} : vector<12x128xbf16> to vector<10x128xbf16>
    %c0_2 = arith.constant 0 : index
    %c0_3 = arith.constant 0 : index
    %c0_4 = arith.constant 0 : index
    %4 = vector.load %arg3[%c0_2, %c0_3, %c0_4] : memref<3x128x128xbf16, #tpu.memory_space<vmem>>, vector<1x128x128xbf16>
    %5 = vector.shape_cast %4 : vector<1x128x128xbf16> to vector<128x128xbf16>
    %cst_5 = arith.constant dense<0.000000e+00> : vector<10x128xf32>
    %6 = tpu.matmul %3, %5, %cst_5 {dimension_numbers = #tpu.dot_dimension_numbers<[1], [0], [0], [1], [0, 0, 1, 1], [], []>} : vector<10x128xbf16>, vector<128x128xbf16>, vector<10x128xf32> -> vector<10x128xf32>
    %7 = arith.addf %2, %6 : vector<10x128xf32>
    %8 = vector.extract_strided_slice %1 {offsets = [1, 0], sizes = [10, 128], strides = [1, 1]} : vector<12x128xbf16> to vector<10x128xbf16>
    %c1 = arith.constant 1 : index
    %c0_6 = arith.constant 0 : index
    %c0_7 = arith.constant 0 : index
    %9 = vector.load %arg3[%c1, %c0_6, %c0_7] : memref<3x128x128xbf16, #tpu.memory_space<vmem>>, vector<1x128x128xbf16>
    %10 = vector.shape_cast %9 : vector<1x128x128xbf16> to vector<128x128xbf16>
    %cst_8 = arith.constant dense<0.000000e+00> : vector<10x128xf32>
    %11 = tpu.matmul %8, %10, %cst_8 {dimension_numbers = #tpu.dot_dimension_numbers<[1], [0], [0], [1], [0, 0, 1, 1], [], []>} : vector<10x128xbf16>, vector<128x128xbf16>, vector<10x128xf32> -> vector<10x128xf32>
    %12 = arith.addf %7, %11 : vector<10x128xf32>
    %13 = vector.extract_strided_slice %1 {offsets = [2, 0], sizes = [10, 128], strides = [1, 1]} : vector<12x128xbf16> to vector<10x128xbf16>
    %c2 = arith.constant 2 : index
    %c0_9 = arith.constant 0 : index
    %c0_10 = arith.constant 0 : index
    %14 = vector.load %arg3[%c2, %c0_9, %c0_10] : memref<3x128x128xbf16, #tpu.memory_space<vmem>>, vector<1x128x128xbf16>
    %15 = vector.shape_cast %14 : vector<1x128x128xbf16> to vector<128x128xbf16>
    %cst_11 = arith.constant dense<0.000000e+00> : vector<10x128xf32>
    %16 = tpu.matmul %13, %15, %cst_11 {dimension_numbers = #tpu.dot_dimension_numbers<[1], [0], [0], [1], [0, 0, 1, 1], [], []>} : vector<10x128xbf16>, vector<128x128xbf16>, vector<10x128xf32> -> vector<10x128xf32>
    %17 = arith.addf %12, %16 : vector<10x128xf32>
    %c0_12 = arith.constant 0 : index
    %c0_13 = arith.constant 0 : index
    %18 = vector.load %arg4[%c0_12, %c0_13] : memref<1x128xf32, #tpu.memory_space<vmem>>, vector<1x128xf32>
    %19 = vector.broadcast %18 : vector<1x128xf32> to vector<10x128xf32>
    %20 = arith.addf %17, %19 : vector<10x128xf32>
    %cst_14 = arith.constant 0.000000e+00 : f32
    %21 = vector.broadcast %cst_14 : f32 to vector<10x128xf32>
    %22 = arith.cmpf ogt, %20, %21 : vector<10x128xf32>
    %cst_15 = arith.constant 0.00999999977 : f32
    %23 = vector.broadcast %cst_15 : f32 to vector<10x128xf32>
    %24 = arith.mulf %23, %20 : vector<10x128xf32>
    %25 = arith.select %22, %20, %24 : vector<10x128xi1>, vector<10x128xf32>
    %26 = tpu.iota {dimensions = array<i32: 0>} : vector<10x1xi32>
    %c-1_i32 = arith.constant -1 : i32
    %27 = vector.broadcast %c-1_i32 : i32 to vector<10x1xi32>
    %28 = arith.addi %27, %26 : vector<10x1xi32>
    %c0_i32 = arith.constant 0 : i32
    %29 = vector.broadcast %c0_i32 : i32 to vector<10x1xi32>
    %30 = arith.cmpi sge, %28, %29 : vector<10x1xi32>
    %c8_i32 = arith.constant 8 : i32
    %31 = vector.broadcast %c8_i32 : i32 to vector<10x1xi32>
    %32 = arith.cmpi slt, %28, %31 : vector<10x1xi32>
    %33 = arith.andi %30, %32 : vector<10x1xi1>
    %cst_16 = arith.constant 0.000000e+00 : f32
    %34 = vector.shape_cast %33 : vector<10x1xi1> to vector<10x1xi1>
    %35 = vector.broadcast %34 : vector<10x1xi1> to vector<10x128xi1>
    %36 = vector.broadcast %cst_16 : f32 to vector<10x128xf32>
    %37 = arith.select %35, %25, %36 : vector<10x128xi1>, vector<10x128xf32>
    %38 = arith.truncf %37 : vector<10x128xf32> to vector<10x128xbf16>
    %cst_17 = arith.constant 0.000000e+00 : f32
    %39 = vector.broadcast %cst_17 : f32 to vector<8x128xf32>
    %40 = vector.extract_strided_slice %38 {offsets = [0, 0], sizes = [8, 128], strides = [1, 1]} : vector<10x128xbf16> to vector<8x128xbf16>
    %c0_18 = arith.constant 0 : index
    %c0_19 = arith.constant 0 : index
    %c0_20 = arith.constant 0 : index
    %41 = vector.load %arg5[%c0_18, %c0_19, %c0_20] : memref<3x128x128xbf16, #tpu.memory_space<vmem>>, vector<1x128x128xbf16>
    %42 = vector.shape_cast %41 : vector<1x128x128xbf16> to vector<128x128xbf16>
    %cst_21 = arith.constant dense<0.000000e+00> : vector<8x128xf32>
    %43 = tpu.matmul %40, %42, %cst_21 {dimension_numbers = #tpu.dot_dimension_numbers<[1], [0], [0], [1], [0, 0, 1, 1], [], []>} : vector<8x128xbf16>, vector<128x128xbf16>, vector<8x128xf32> -> vector<8x128xf32>
    %44 = arith.addf %39, %43 : vector<8x128xf32>
    %45 = vector.extract_strided_slice %38 {offsets = [1, 0], sizes = [8, 128], strides = [1, 1]} : vector<10x128xbf16> to vector<8x128xbf16>
    %c1_22 = arith.constant 1 : index
    %c0_23 = arith.constant 0 : index
    %c0_24 = arith.constant 0 : index
    %46 = vector.load %arg5[%c1_22, %c0_23, %c0_24] : memref<3x128x128xbf16, #tpu.memory_space<vmem>>, vector<1x128x128xbf16>
    %47 = vector.shape_cast %46 : vector<1x128x128xbf16> to vector<128x128xbf16>
    %cst_25 = arith.constant dense<0.000000e+00> : vector<8x128xf32>
    %48 = tpu.matmul %45, %47, %cst_25 {dimension_numbers = #tpu.dot_dimension_numbers<[1], [0], [0], [1], [0, 0, 1, 1], [], []>} : vector<8x128xbf16>, vector<128x128xbf16>, vector<8x128xf32> -> vector<8x128xf32>
    %49 = arith.addf %44, %48 : vector<8x128xf32>
    %50 = vector.extract_strided_slice %38 {offsets = [2, 0], sizes = [8, 128], strides = [1, 1]} : vector<10x128xbf16> to vector<8x128xbf16>
    %c2_26 = arith.constant 2 : index
    %c0_27 = arith.constant 0 : index
    %c0_28 = arith.constant 0 : index
    %51 = vector.load %arg5[%c2_26, %c0_27, %c0_28] : memref<3x128x128xbf16, #tpu.memory_space<vmem>>, vector<1x128x128xbf16>
    %52 = vector.shape_cast %51 : vector<1x128x128xbf16> to vector<128x128xbf16>
    %cst_29 = arith.constant dense<0.000000e+00> : vector<8x128xf32>
    %53 = tpu.matmul %50, %52, %cst_29 {dimension_numbers = #tpu.dot_dimension_numbers<[1], [0], [0], [1], [0, 0, 1, 1], [], []>} : vector<8x128xbf16>, vector<128x128xbf16>, vector<8x128xf32> -> vector<8x128xf32>
    %54 = arith.addf %49, %53 : vector<8x128xf32>
    %c0_30 = arith.constant 0 : index
    %c0_31 = arith.constant 0 : index
    %55 = vector.load %arg6[%c0_30, %c0_31] : memref<1x128xf32, #tpu.memory_space<vmem>>, vector<1x128xf32>
    %56 = vector.broadcast %55 : vector<1x128xf32> to vector<8x128xf32>
    %57 = arith.addf %54, %56 : vector<8x128xf32>
    %58 = vector.extract_strided_slice %1 {offsets = [2, 0], sizes = [8, 128], strides = [1, 1]} : vector<12x128xbf16> to vector<8x128xbf16>
    %59 = arith.extf %58 : vector<8x128xbf16> to vector<8x128xf32>
    %60 = arith.addf %57, %59 : vector<8x128xf32>
    %61 = arith.truncf %60 : vector<8x128xf32> to vector<8x128xbf16>
    %c0_32 = arith.constant 0 : index
    %c0_33 = arith.constant 0 : index
    %62 = vector.load %arg7[%c0_32, %c0_33] : memref<128x128xbf16, #tpu.memory_space<vmem>>, vector<128x128xbf16>
    %cst_34 = arith.constant dense<0.000000e+00> : vector<8x128xf32>
    %63 = tpu.matmul %61, %62, %cst_34 {dimension_numbers = #tpu.dot_dimension_numbers<[1], [0], [0], [1], [0, 0, 1, 1], [], []>} : vector<8x128xbf16>, vector<128x128xbf16>, vector<8x128xf32> -> vector<8x128xf32>
    %c0_35 = arith.constant 0 : index
    %c0_36 = arith.constant 0 : index
    %64 = vector.load %arg8[%c0_35, %c0_36] : memref<1x128xf32, #tpu.memory_space<vmem>>, vector<1x128xf32>
    %65 = vector.broadcast %64 : vector<1x128xf32> to vector<8x128xf32>
    %66 = arith.addf %63, %65 : vector<8x128xf32>
    %c0_37 = arith.constant 0 : index
    %c0_38 = arith.constant 0 : index
    %c0_39 = arith.constant 0 : index
    %67 = vector.load %arg9[%c0_37, %c0_38, %c0_39] : memref<1x8x128xf32, #tpu.memory_space<vmem>>, vector<1x8x128xf32>
    %68 = vector.shape_cast %67 : vector<1x8x128xf32> to vector<8x128xf32>
    %69 = arith.addf %68, %66 : vector<8x128xf32>
    %70 = arith.truncf %60 : vector<8x128xf32> to vector<8x128xbf16>
    %c0_40 = arith.constant 0 : index
    %c0_41 = arith.constant 0 : index
    %c0_42 = arith.constant 0 : index
    %71 = vector.load %arg10[%c0_40, %c0_41, %c0_42] : memref<1x8x128xbf16, #tpu.memory_space<vmem>>, vector<1x8x128xbf16>
    %72 = vector.shape_cast %71 : vector<1x8x128xbf16> to vector<8x128xbf16>
    %73 = vector.shape_cast %70 : vector<8x128xbf16> to vector<1x8x128xbf16>
    tpu.vector_store %arg10[%c0_40, %c0_41, %c0_42], %73 {strides = array<i32>} : memref<1x8x128xbf16, #tpu.memory_space<vmem>>, vector<1x8x128xbf16>,
    %c0_43 = arith.constant 0 : index
    %c0_44 = arith.constant 0 : index
    %c0_45 = arith.constant 0 : index
    %74 = vector.load %arg11[%c0_43, %c0_44, %c0_45] : memref<1x8x128xf32, #tpu.memory_space<vmem>>, vector<1x8x128xf32>
    %75 = vector.shape_cast %74 : vector<1x8x128xf32> to vector<8x128xf32>
    %76 = vector.shape_cast %69 : vector<8x128xf32> to vector<1x8x128xf32>
    tpu.vector_store %arg11[%c0_43, %c0_44, %c0_45], %76 {strides = array<i32>} : memref<1x8x128xf32, #tpu.memory_space<vmem>>, vector<1x8x128xf32>,
    return
  }
  func.func @transform_0(%arg0: i32, %arg1: i32) -> (i32, i32, i32) {
    %c0_i32 = arith.constant 0 : i32
    %c0_i32_0 = arith.constant 0 : i32
    %c0_i32_1 = arith.constant 0 : i32
    return %arg0, %c0_i32, %c0_i32_0 : i32, i32, i32
  }
  func.func @transform_1(%arg0: i32, %arg1: i32) -> (i32, i32, i32) {
    %c0_i32 = arith.constant 0 : i32
    %c0_i32_0 = arith.constant 0 : i32
    %c0_i32_1 = arith.constant 0 : i32
    %c0_i32_2 = arith.constant 0 : i32
    return %c0_i32, %c0_i32_0, %c0_i32_1 : i32, i32, i32
  }
  func.func @transform_2(%arg0: i32, %arg1: i32) -> (i32, i32) {
    %c0_i32 = arith.constant 0 : i32
    %c0_i32_0 = arith.constant 0 : i32
    %c0_i32_1 = arith.constant 0 : i32
    return %c0_i32, %c0_i32_0 : i32, i32
  }
  func.func @transform_3(%arg0: i32, %arg1: i32) -> (i32, i32, i32) {
    %c0_i32 = arith.constant 0 : i32
    %c0_i32_0 = arith.constant 0 : i32
    %c0_i32_1 = arith.constant 0 : i32
    %c0_i32_2 = arith.constant 0 : i32
    return %c0_i32, %c0_i32_0, %c0_i32_1 : i32, i32, i32
  }
  func.func @transform_4(%arg0: i32, %arg1: i32) -> (i32, i32) {
    %c0_i32 = arith.constant 0 : i32
    %c0_i32_0 = arith.constant 0 : i32
    %c0_i32_1 = arith.constant 0 : i32
    return %c0_i32, %c0_i32_0 : i32, i32
  }
  func.func @transform_5(%arg0: i32, %arg1: i32) -> (i32, i32) {
    %c0_i32 = arith.constant 0 : i32
    %c0_i32_0 = arith.constant 0 : i32
    %c0_i32_1 = arith.constant 0 : i32
    return %c0_i32, %c0_i32_0 : i32, i32
  }
  func.func @transform_6(%arg0: i32, %arg1: i32) -> (i32, i32) {
    %c0_i32 = arith.constant 0 : i32
    %c0_i32_0 = arith.constant 0 : i32
    %c0_i32_1 = arith.constant 0 : i32
    return %c0_i32, %c0_i32_0 : i32, i32
  }
  func.func @transform_7(%arg0: i32, %arg1: i32) -> (i32, i32, i32) {
    %c0_i32 = arith.constant 0 : i32
    %c0_i32_0 = arith.constant 0 : i32
    return %arg0, %arg1, %c0_i32 : i32, i32, i32
  }
  func.func @transform_8(%arg0: i32, %arg1: i32) -> (i32, i32, i32) {
    %c0_i32 = arith.constant 0 : i32
    %c0_i32_0 = arith.constant 0 : i32
    return %arg0, %arg1, %c0_i32 : i32, i32, i32
  }
  func.func @transform_9(%arg0: i32, %arg1: i32) -> (i32, i32, i32) {
    %c0_i32 = arith.constant 0 : i32
    %c0_i32_0 = arith.constant 0 : i32
    return %arg0, %arg1, %c0_i32 : i32, i32, i32
  }
}

module attributes {stable_mosaic.version = 11 : i64} {
  func.func @_resblock_kernel(%arg0: i32, %arg1: i32, %arg2: memref<1x12x128xbf16, #tpu.memory_space<vmem>>, %arg3: memref<3x128x128xbf16, #tpu.memory_space<vmem>>, %arg4: memref<1x128xf32, #tpu.memory_space<vmem>>, %arg5: memref<3x128x128xbf16, #tpu.memory_space<vmem>>, %arg6: memref<1x128xf32, #tpu.memory_space<vmem>>, %arg7: memref<128x128xbf16, #tpu.memory_space<vmem>>, %arg8: memref<1x128xf32, #tpu.memory_space<vmem>>, %arg9: memref<1x8x128xf32, #tpu.memory_space<vmem>>, %arg10: memref<1x8x128xbf16, #tpu.memory_space<vmem>>) attributes {dimension_semantics = [#tpu.dimension_semantics<parallel>, #tpu.dimension_semantics<parallel>], iteration_bounds = array<i64: 2, 1>, scalar_prefetch = 0 : i64, scratch_operands = 0 : i64, tpu.core_type = #tpu.core_type<tc>, window_params = [{transform_indices = @transform_0, window_bounds = array<i64: 1, 12, 128>}, {pipeline_mode = #tpu.pipeline_mode<synchronous>, transform_indices = @transform_1, window_bounds = array<i64: 3, 128, 128>}, {pipeline_mode = #tpu.pipeline_mode<synchronous>, transform_indices = @transform_2, window_bounds = array<i64: 1, 128>}, {pipeline_mode = #tpu.pipeline_mode<synchronous>, transform_indices = @transform_3, window_bounds = array<i64: 3, 128, 128>}, {pipeline_mode = #tpu.pipeline_mode<synchronous>, transform_indices = @transform_4, window_bounds = array<i64: 1, 128>}, {pipeline_mode = #tpu.pipeline_mode<synchronous>, transform_indices = @transform_5, window_bounds = array<i64: 128, 128>}, {pipeline_mode = #tpu.pipeline_mode<synchronous>, transform_indices = @transform_6, window_bounds = array<i64: 1, 128>}, {transform_indices = @transform_7, window_bounds = array<i64: 1, 8, 128>}, {transform_indices = @transform_8, window_bounds = array<i64: 1, 8, 128>}]} {
    %c0 = arith.constant 0 : index
    %c0_0 = arith.constant 0 : index
    %c0_1 = arith.constant 0 : index
    %0 = vector.load %arg2[%c0, %c0_0, %c0_1] : memref<1x12x128xbf16, #tpu.memory_space<vmem>>, vector<1x12x128xbf16>
    %1 = vector.shape_cast %0 : vector<1x12x128xbf16> to vector<12x128xbf16>
    %cst = arith.constant 0.000000e+00 : f32
    %2 = vector.broadcast %cst : f32 to vector<10x128xf32>
    %3 = vector.extract_strided_slice %1 {offsets = [0, 0], sizes = [10, 128], strides = [1, 1]} : vector<12x128xbf16> to vector<10x128xbf16>
    %c0_2 = arith.constant 0 : index
    %c0_3 = arith.constant 0 : index
    %c0_4 = arith.constant 0 : index
    %4 = vector.load %arg3[%c0_2, %c0_3, %c0_4] : memref<3x128x128xbf16, #tpu.memory_space<vmem>>, vector<1x128x128xbf16>
    %5 = vector.shape_cast %4 : vector<1x128x128xbf16> to vector<128x128xbf16>
    %cst_5 = arith.constant dense<0.000000e+00> : vector<10x128xf32>
    %6 = tpu.matmul %3, %5, %cst_5 {dimension_numbers = #tpu.dot_dimension_numbers<[1], [0], [0], [1], [0, 0, 1, 1], [], []>} : vector<10x128xbf16>, vector<128x128xbf16>, vector<10x128xf32> -> vector<10x128xf32>
    %7 = arith.addf %2, %6 : vector<10x128xf32>
    %8 = vector.extract_strided_slice %1 {offsets = [1, 0], sizes = [10, 128], strides = [1, 1]} : vector<12x128xbf16> to vector<10x128xbf16>
    %c1 = arith.constant 1 : index
    %c0_6 = arith.constant 0 : index
    %c0_7 = arith.constant 0 : index
    %9 = vector.load %arg3[%c1, %c0_6, %c0_7] : memref<3x128x128xbf16, #tpu.memory_space<vmem>>, vector<1x128x128xbf16>
    %10 = vector.shape_cast %9 : vector<1x128x128xbf16> to vector<128x128xbf16>
    %cst_8 = arith.constant dense<0.000000e+00> : vector<10x128xf32>
    %11 = tpu.matmul %8, %10, %cst_8 {dimension_numbers = #tpu.dot_dimension_numbers<[1], [0], [0], [1], [0, 0, 1, 1], [], []>} : vector<10x128xbf16>, vector<128x128xbf16>, vector<10x128xf32> -> vector<10x128xf32>
    %12 = arith.addf %7, %11 : vector<10x128xf32>
    %13 = vector.extract_strided_slice %1 {offsets = [2, 0], sizes = [10, 128], strides = [1, 1]} : vector<12x128xbf16> to vector<10x128xbf16>
    %c2 = arith.constant 2 : index
    %c0_9 = arith.constant 0 : index
    %c0_10 = arith.constant 0 : index
    %14 = vector.load %arg3[%c2, %c0_9, %c0_10] : memref<3x128x128xbf16, #tpu.memory_space<vmem>>, vector<1x128x128xbf16>
    %15 = vector.shape_cast %14 : vector<1x128x128xbf16> to vector<128x128xbf16>
    %cst_11 = arith.constant dense<0.000000e+00> : vector<10x128xf32>
    %16 = tpu.matmul %13, %15, %cst_11 {dimension_numbers = #tpu.dot_dimension_numbers<[1], [0], [0], [1], [0, 0, 1, 1], [], []>} : vector<10x128xbf16>, vector<128x128xbf16>, vector<10x128xf32> -> vector<10x128xf32>
    %17 = arith.addf %12, %16 : vector<10x128xf32>
    %c0_12 = arith.constant 0 : index
    %c0_13 = arith.constant 0 : index
    %18 = vector.load %arg4[%c0_12, %c0_13] : memref<1x128xf32, #tpu.memory_space<vmem>>, vector<1x128xf32>
    %19 = vector.broadcast %18 : vector<1x128xf32> to vector<10x128xf32>
    %20 = arith.addf %17, %19 : vector<10x128xf32>
    %cst_14 = arith.constant 0.000000e+00 : f32
    %21 = vector.broadcast %cst_14 : f32 to vector<10x128xf32>
    %22 = arith.cmpf ogt, %20, %21 : vector<10x128xf32>
    %cst_15 = arith.constant 0.00999999977 : f32
    %23 = vector.broadcast %cst_15 : f32 to vector<10x128xf32>
    %24 = arith.mulf %23, %20 : vector<10x128xf32>
    %25 = arith.select %22, %20, %24 : vector<10x128xi1>, vector<10x128xf32>
    %26 = tpu.iota {dimensions = array<i32: 0>} : vector<10x1xi32>
    %c-1_i32 = arith.constant -1 : i32
    %27 = vector.broadcast %c-1_i32 : i32 to vector<10x1xi32>
    %28 = arith.addi %27, %26 : vector<10x1xi32>
    %c0_i32 = arith.constant 0 : i32
    %29 = vector.broadcast %c0_i32 : i32 to vector<10x1xi32>
    %30 = arith.cmpi sge, %28, %29 : vector<10x1xi32>
    %c8_i32 = arith.constant 8 : i32
    %31 = vector.broadcast %c8_i32 : i32 to vector<10x1xi32>
    %32 = arith.cmpi slt, %28, %31 : vector<10x1xi32>
    %33 = arith.andi %30, %32 : vector<10x1xi1>
    %cst_16 = arith.constant 0.000000e+00 : f32
    %34 = vector.shape_cast %33 : vector<10x1xi1> to vector<10x1xi1>
    %35 = vector.broadcast %34 : vector<10x1xi1> to vector<10x128xi1>
    %36 = vector.broadcast %cst_16 : f32 to vector<10x128xf32>
    %37 = arith.select %35, %25, %36 : vector<10x128xi1>, vector<10x128xf32>
    %38 = arith.truncf %37 : vector<10x128xf32> to vector<10x128xbf16>
    %cst_17 = arith.constant 0.000000e+00 : f32
    %39 = vector.broadcast %cst_17 : f32 to vector<8x128xf32>
    %40 = vector.extract_strided_slice %38 {offsets = [0, 0], sizes = [8, 128], strides = [1, 1]} : vector<10x128xbf16> to vector<8x128xbf16>
    %c0_18 = arith.constant 0 : index
    %c0_19 = arith.constant 0 : index
    %c0_20 = arith.constant 0 : index
    %41 = vector.load %arg5[%c0_18, %c0_19, %c0_20] : memref<3x128x128xbf16, #tpu.memory_space<vmem>>, vector<1x128x128xbf16>
    %42 = vector.shape_cast %41 : vector<1x128x128xbf16> to vector<128x128xbf16>
    %cst_21 = arith.constant dense<0.000000e+00> : vector<8x128xf32>
    %43 = tpu.matmul %40, %42, %cst_21 {dimension_numbers = #tpu.dot_dimension_numbers<[1], [0], [0], [1], [0, 0, 1, 1], [], []>} : vector<8x128xbf16>, vector<128x128xbf16>, vector<8x128xf32> -> vector<8x128xf32>
    %44 = arith.addf %39, %43 : vector<8x128xf32>
    %45 = vector.extract_strided_slice %38 {offsets = [1, 0], sizes = [8, 128], strides = [1, 1]} : vector<10x128xbf16> to vector<8x128xbf16>
    %c1_22 = arith.constant 1 : index
    %c0_23 = arith.constant 0 : index
    %c0_24 = arith.constant 0 : index
    %46 = vector.load %arg5[%c1_22, %c0_23, %c0_24] : memref<3x128x128xbf16, #tpu.memory_space<vmem>>, vector<1x128x128xbf16>
    %47 = vector.shape_cast %46 : vector<1x128x128xbf16> to vector<128x128xbf16>
    %cst_25 = arith.constant dense<0.000000e+00> : vector<8x128xf32>
    %48 = tpu.matmul %45, %47, %cst_25 {dimension_numbers = #tpu.dot_dimension_numbers<[1], [0], [0], [1], [0, 0, 1, 1], [], []>} : vector<8x128xbf16>, vector<128x128xbf16>, vector<8x128xf32> -> vector<8x128xf32>
    %49 = arith.addf %44, %48 : vector<8x128xf32>
    %50 = vector.extract_strided_slice %38 {offsets = [2, 0], sizes = [8, 128], strides = [1, 1]} : vector<10x128xbf16> to vector<8x128xbf16>
    %c2_26 = arith.constant 2 : index
    %c0_27 = arith.constant 0 : index
    %c0_28 = arith.constant 0 : index
    %51 = vector.load %arg5[%c2_26, %c0_27, %c0_28] : memref<3x128x128xbf16, #tpu.memory_space<vmem>>, vector<1x128x128xbf16>
    %52 = vector.shape_cast %51 : vector<1x128x128xbf16> to vector<128x128xbf16>
    %cst_29 = arith.constant dense<0.000000e+00> : vector<8x128xf32>
    %53 = tpu.matmul %50, %52, %cst_29 {dimension_numbers = #tpu.dot_dimension_numbers<[1], [0], [0], [1], [0, 0, 1, 1], [], []>} : vector<8x128xbf16>, vector<128x128xbf16>, vector<8x128xf32> -> vector<8x128xf32>
    %54 = arith.addf %49, %53 : vector<8x128xf32>
    %c0_30 = arith.constant 0 : index
    %c0_31 = arith.constant 0 : index
    %55 = vector.load %arg6[%c0_30, %c0_31] : memref<1x128xf32, #tpu.memory_space<vmem>>, vector<1x128xf32>
    %56 = vector.broadcast %55 : vector<1x128xf32> to vector<8x128xf32>
    %57 = arith.addf %54, %56 : vector<8x128xf32>
    %58 = vector.extract_strided_slice %1 {offsets = [2, 0], sizes = [8, 128], strides = [1, 1]} : vector<12x128xbf16> to vector<8x128xbf16>
    %59 = arith.extf %58 : vector<8x128xbf16> to vector<8x128xf32>
    %60 = arith.addf %57, %59 : vector<8x128xf32>
    %61 = arith.truncf %60 : vector<8x128xf32> to vector<8x128xbf16>
    %c0_32 = arith.constant 0 : index
    %c0_33 = arith.constant 0 : index
    %62 = vector.load %arg7[%c0_32, %c0_33] : memref<128x128xbf16, #tpu.memory_space<vmem>>, vector<128x128xbf16>
    %cst_34 = arith.constant dense<0.000000e+00> : vector<8x128xf32>
    %63 = tpu.matmul %61, %62, %cst_34 {dimension_numbers = #tpu.dot_dimension_numbers<[1], [0], [0], [1], [0, 0, 1, 1], [], []>} : vector<8x128xbf16>, vector<128x128xbf16>, vector<8x128xf32> -> vector<8x128xf32>
    %c0_35 = arith.constant 0 : index
    %c0_36 = arith.constant 0 : index
    %64 = vector.load %arg8[%c0_35, %c0_36] : memref<1x128xf32, #tpu.memory_space<vmem>>, vector<1x128xf32>
    %65 = vector.broadcast %64 : vector<1x128xf32> to vector<8x128xf32>
    %66 = arith.addf %63, %65 : vector<8x128xf32>
    %c0_37 = arith.constant 0 : index
    %c0_38 = arith.constant 0 : index
    %c0_39 = arith.constant 0 : index
    %67 = vector.load %arg9[%c0_37, %c0_38, %c0_39] : memref<1x8x128xf32, #tpu.memory_space<vmem>>, vector<1x8x128xf32>
    %68 = vector.shape_cast %67 : vector<1x8x128xf32> to vector<8x128xf32>
    %69 = arith.addf %68, %66 : vector<8x128xf32>
    %70 = arith.addf %60, %69 : vector<8x128xf32>
    %71 = arith.truncf %70 : vector<8x128xf32> to vector<8x128xbf16>
    %c0_40 = arith.constant 0 : index
    %c0_41 = arith.constant 0 : index
    %c0_42 = arith.constant 0 : index
    %72 = vector.load %arg10[%c0_40, %c0_41, %c0_42] : memref<1x8x128xbf16, #tpu.memory_space<vmem>>, vector<1x8x128xbf16>
    %73 = vector.shape_cast %72 : vector<1x8x128xbf16> to vector<8x128xbf16>
    %74 = vector.shape_cast %71 : vector<8x128xbf16> to vector<1x8x128xbf16>
    tpu.vector_store %arg10[%c0_40, %c0_41, %c0_42], %74 {strides = array<i32>} : memref<1x8x128xbf16, #tpu.memory_space<vmem>>, vector<1x8x128xbf16>,
    return
  }
  func.func @transform_0(%arg0: i32, %arg1: i32) -> (i32, i32, i32) {
    %c0_i32 = arith.constant 0 : i32
    %c0_i32_0 = arith.constant 0 : i32
    %c0_i32_1 = arith.constant 0 : i32
    return %arg0, %c0_i32, %c0_i32_0 : i32, i32, i32
  }
  func.func @transform_1(%arg0: i32, %arg1: i32) -> (i32, i32, i32) {
    %c0_i32 = arith.constant 0 : i32
    %c0_i32_0 = arith.constant 0 : i32
    %c0_i32_1 = arith.constant 0 : i32
    %c0_i32_2 = arith.constant 0 : i32
    return %c0_i32, %c0_i32_0, %c0_i32_1 : i32, i32, i32
  }
  func.func @transform_2(%arg0: i32, %arg1: i32) -> (i32, i32) {
    %c0_i32 = arith.constant 0 : i32
    %c0_i32_0 = arith.constant 0 : i32
    %c0_i32_1 = arith.constant 0 : i32
    return %c0_i32, %c0_i32_0 : i32, i32
  }
  func.func @transform_3(%arg0: i32, %arg1: i32) -> (i32, i32, i32) {
    %c0_i32 = arith.constant 0 : i32
    %c0_i32_0 = arith.constant 0 : i32
    %c0_i32_1 = arith.constant 0 : i32
    %c0_i32_2 = arith.constant 0 : i32
    return %c0_i32, %c0_i32_0, %c0_i32_1 : i32, i32, i32
  }
  func.func @transform_4(%arg0: i32, %arg1: i32) -> (i32, i32) {
    %c0_i32 = arith.constant 0 : i32
    %c0_i32_0 = arith.constant 0 : i32
    %c0_i32_1 = arith.constant 0 : i32
    return %c0_i32, %c0_i32_0 : i32, i32
  }
  func.func @transform_5(%arg0: i32, %arg1: i32) -> (i32, i32) {
    %c0_i32 = arith.constant 0 : i32
    %c0_i32_0 = arith.constant 0 : i32
    %c0_i32_1 = arith.constant 0 : i32
    return %c0_i32, %c0_i32_0 : i32, i32
  }
  func.func @transform_6(%arg0: i32, %arg1: i32) -> (i32, i32) {
    %c0_i32 = arith.constant 0 : i32
    %c0_i32_0 = arith.constant 0 : i32
    %c0_i32_1 = arith.constant 0 : i32
    return %c0_i32, %c0_i32_0 : i32, i32
  }
  func.func @transform_7(%arg0: i32, %arg1: i32) -> (i32, i32, i32) {
    %c0_i32 = arith.constant 0 : i32
    %c0_i32_0 = arith.constant 0 : i32
    return %arg0, %arg1, %c0_i32 : i32, i32, i32
  }
  func.func @transform_8(%arg0: i32, %arg1: i32) -> (i32, i32, i32) {
    %c0_i32 = arith.constant 0 : i32
    %c0_i32_0 = arith.constant 0 : i32
    return %arg0, %arg1, %c0_i32 : i32, i32, i32
  }
}

module attributes {stable_mosaic.version = 11 : i64} {
  func.func @_conv_kernel(%arg0: i32, %arg1: i32, %arg2: memref<1x10x128xbf16, #tpu.memory_space<vmem>>, %arg3: memref<3x128x512xbf16, #tpu.memory_space<vmem>>, %arg4: memref<1x512xf32, #tpu.memory_space<vmem>>, %arg5: memref<1x8x512xbf16, #tpu.memory_space<vmem>>) attributes {dimension_semantics = [#tpu.dimension_semantics<parallel>, #tpu.dimension_semantics<parallel>], iteration_bounds = array<i64: 2, 1>, scalar_prefetch = 0 : i64, scratch_operands = 0 : i64, tpu.core_type = #tpu.core_type<tc>, window_params = [{transform_indices = @transform_0, window_bounds = array<i64: 1, 10, 128>}, {pipeline_mode = #tpu.pipeline_mode<synchronous>, transform_indices = @transform_1, window_bounds = array<i64: 3, 128, 512>}, {pipeline_mode = #tpu.pipeline_mode<synchronous>, transform_indices = @transform_2, window_bounds = array<i64: 1, 512>}, {transform_indices = @transform_3, window_bounds = array<i64: 1, 8, 512>}]} {
    %c0 = arith.constant 0 : index
    %c0_0 = arith.constant 0 : index
    %c0_1 = arith.constant 0 : index
    %0 = vector.load %arg2[%c0, %c0_0, %c0_1] : memref<1x10x128xbf16, #tpu.memory_space<vmem>>, vector<1x10x128xbf16>
    %1 = vector.shape_cast %0 : vector<1x10x128xbf16> to vector<10x128xbf16>
    %cst = arith.constant 0.000000e+00 : f32
    %2 = vector.broadcast %cst : f32 to vector<8x512xf32>
    %3 = vector.extract_strided_slice %1 {offsets = [0, 0], sizes = [8, 128], strides = [1, 1]} : vector<10x128xbf16> to vector<8x128xbf16>
    %c0_2 = arith.constant 0 : index
    %c0_3 = arith.constant 0 : index
    %c0_4 = arith.constant 0 : index
    %4 = vector.load %arg3[%c0_2, %c0_3, %c0_4] : memref<3x128x512xbf16, #tpu.memory_space<vmem>>, vector<1x128x512xbf16>
    %5 = vector.shape_cast %4 : vector<1x128x512xbf16> to vector<128x512xbf16>
    %cst_5 = arith.constant dense<0.000000e+00> : vector<8x512xf32>
    %6 = tpu.matmul %3, %5, %cst_5 {dimension_numbers = #tpu.dot_dimension_numbers<[1], [0], [0], [1], [0, 0, 1, 1], [], []>} : vector<8x128xbf16>, vector<128x512xbf16>, vector<8x512xf32> -> vector<8x512xf32>
    %7 = arith.addf %2, %6 : vector<8x512xf32>
    %8 = vector.extract_strided_slice %1 {offsets = [1, 0], sizes = [8, 128], strides = [1, 1]} : vector<10x128xbf16> to vector<8x128xbf16>
    %c1 = arith.constant 1 : index
    %c0_6 = arith.constant 0 : index
    %c0_7 = arith.constant 0 : index
    %9 = vector.load %arg3[%c1, %c0_6, %c0_7] : memref<3x128x512xbf16, #tpu.memory_space<vmem>>, vector<1x128x512xbf16>
    %10 = vector.shape_cast %9 : vector<1x128x512xbf16> to vector<128x512xbf16>
    %cst_8 = arith.constant dense<0.000000e+00> : vector<8x512xf32>
    %11 = tpu.matmul %8, %10, %cst_8 {dimension_numbers = #tpu.dot_dimension_numbers<[1], [0], [0], [1], [0, 0, 1, 1], [], []>} : vector<8x128xbf16>, vector<128x512xbf16>, vector<8x512xf32> -> vector<8x512xf32>
    %12 = arith.addf %7, %11 : vector<8x512xf32>
    %13 = vector.extract_strided_slice %1 {offsets = [2, 0], sizes = [8, 128], strides = [1, 1]} : vector<10x128xbf16> to vector<8x128xbf16>
    %c2 = arith.constant 2 : index
    %c0_9 = arith.constant 0 : index
    %c0_10 = arith.constant 0 : index
    %14 = vector.load %arg3[%c2, %c0_9, %c0_10] : memref<3x128x512xbf16, #tpu.memory_space<vmem>>, vector<1x128x512xbf16>
    %15 = vector.shape_cast %14 : vector<1x128x512xbf16> to vector<128x512xbf16>
    %cst_11 = arith.constant dense<0.000000e+00> : vector<8x512xf32>
    %16 = tpu.matmul %13, %15, %cst_11 {dimension_numbers = #tpu.dot_dimension_numbers<[1], [0], [0], [1], [0, 0, 1, 1], [], []>} : vector<8x128xbf16>, vector<128x512xbf16>, vector<8x512xf32> -> vector<8x512xf32>
    %17 = arith.addf %12, %16 : vector<8x512xf32>
    %c0_12 = arith.constant 0 : index
    %c0_13 = arith.constant 0 : index
    %18 = vector.load %arg4[%c0_12, %c0_13] : memref<1x512xf32, #tpu.memory_space<vmem>>, vector<1x512xf32>
    %19 = vector.broadcast %18 : vector<1x512xf32> to vector<8x512xf32>
    %20 = arith.addf %17, %19 : vector<8x512xf32>
    %21 = arith.truncf %20 : vector<8x512xf32> to vector<8x512xbf16>
    %c0_14 = arith.constant 0 : index
    %c0_15 = arith.constant 0 : index
    %c0_16 = arith.constant 0 : index
    %22 = vector.load %arg5[%c0_14, %c0_15, %c0_16] : memref<1x8x512xbf16, #tpu.memory_space<vmem>>, vector<1x8x512xbf16>
    %23 = vector.shape_cast %22 : vector<1x8x512xbf16> to vector<8x512xbf16>
    %24 = vector.shape_cast %21 : vector<8x512xbf16> to vector<1x8x512xbf16>
    tpu.vector_store %arg5[%c0_14, %c0_15, %c0_16], %24 {strides = array<i32>} : memref<1x8x512xbf16, #tpu.memory_space<vmem>>, vector<1x8x512xbf16>,
    return
  }
  func.func @transform_0(%arg0: i32, %arg1: i32) -> (i32, i32, i32) {
    %c0_i32 = arith.constant 0 : i32
    %c0_i32_0 = arith.constant 0 : i32
    %c0_i32_1 = arith.constant 0 : i32
    return %arg0, %c0_i32, %c0_i32_0 : i32, i32, i32
  }
  func.func @transform_1(%arg0: i32, %arg1: i32) -> (i32, i32, i32) {
    %c0_i32 = arith.constant 0 : i32
    %c0_i32_0 = arith.constant 0 : i32
    %c0_i32_1 = arith.constant 0 : i32
    %c0_i32_2 = arith.constant 0 : i32
    return %c0_i32, %c0_i32_0, %c0_i32_1 : i32, i32, i32
  }
  func.func @transform_2(%arg0: i32, %arg1: i32) -> (i32, i32) {
    %c0_i32 = arith.constant 0 : i32
    %c0_i32_0 = arith.constant 0 : i32
    %c0_i32_1 = arith.constant 0 : i32
    return %c0_i32, %c0_i32_0 : i32, i32
  }
  func.func @transform_3(%arg0: i32, %arg1: i32) -> (i32, i32, i32) {
    %c0_i32 = arith.constant 0 : i32
    %c0_i32_0 = arith.constant 0 : i32
    return %arg0, %arg1, %c0_i32 : i32, i32, i32
  }
}

module attributes {stable_mosaic.version = 11 : i64} {
  func.func @_conv_kernel(%arg0: i32, %arg1: i32, %arg2: memref<1x18x256xbf16, #tpu.memory_space<vmem>>, %arg3: memref<3x256x1024xbf16, #tpu.memory_space<vmem>>, %arg4: memref<1x1024xf32, #tpu.memory_space<vmem>>, %arg5: memref<1x16x1024xbf16, #tpu.memory_space<vmem>>) attributes {dimension_semantics = [#tpu.dimension_semantics<parallel>, #tpu.dimension_semantics<parallel>], iteration_bounds = array<i64: 2, 1>, scalar_prefetch = 0 : i64, scratch_operands = 0 : i64, tpu.core_type = #tpu.core_type<tc>, window_params = [{transform_indices = @transform_0, window_bounds = array<i64: 1, 18, 256>}, {pipeline_mode = #tpu.pipeline_mode<synchronous>, transform_indices = @transform_1, window_bounds = array<i64: 3, 256, 1024>}, {pipeline_mode = #tpu.pipeline_mode<synchronous>, transform_indices = @transform_2, window_bounds = array<i64: 1, 1024>}, {transform_indices = @transform_3, window_bounds = array<i64: 1, 16, 1024>}]} {
    %c0 = arith.constant 0 : index
    %c0_0 = arith.constant 0 : index
    %c0_1 = arith.constant 0 : index
    %0 = vector.load %arg2[%c0, %c0_0, %c0_1] : memref<1x18x256xbf16, #tpu.memory_space<vmem>>, vector<1x18x256xbf16>
    %1 = vector.shape_cast %0 : vector<1x18x256xbf16> to vector<18x256xbf16>
    %cst = arith.constant 0.000000e+00 : f32
    %2 = vector.broadcast %cst : f32 to vector<16x1024xf32>
    %3 = vector.extract_strided_slice %1 {offsets = [0, 0], sizes = [16, 256], strides = [1, 1]} : vector<18x256xbf16> to vector<16x256xbf16>
    %c0_2 = arith.constant 0 : index
    %c0_3 = arith.constant 0 : index
    %c0_4 = arith.constant 0 : index
    %4 = vector.load %arg3[%c0_2, %c0_3, %c0_4] : memref<3x256x1024xbf16, #tpu.memory_space<vmem>>, vector<1x256x1024xbf16>
    %5 = vector.shape_cast %4 : vector<1x256x1024xbf16> to vector<256x1024xbf16>
    %cst_5 = arith.constant dense<0.000000e+00> : vector<16x1024xf32>
    %6 = tpu.matmul %3, %5, %cst_5 {dimension_numbers = #tpu.dot_dimension_numbers<[1], [0], [0], [1], [0, 0, 1, 1], [], []>} : vector<16x256xbf16>, vector<256x1024xbf16>, vector<16x1024xf32> -> vector<16x1024xf32>
    %7 = arith.addf %2, %6 : vector<16x1024xf32>
    %8 = vector.extract_strided_slice %1 {offsets = [1, 0], sizes = [16, 256], strides = [1, 1]} : vector<18x256xbf16> to vector<16x256xbf16>
    %c1 = arith.constant 1 : index
    %c0_6 = arith.constant 0 : index
    %c0_7 = arith.constant 0 : index
    %9 = vector.load %arg3[%c1, %c0_6, %c0_7] : memref<3x256x1024xbf16, #tpu.memory_space<vmem>>, vector<1x256x1024xbf16>
    %10 = vector.shape_cast %9 : vector<1x256x1024xbf16> to vector<256x1024xbf16>
    %cst_8 = arith.constant dense<0.000000e+00> : vector<16x1024xf32>
    %11 = tpu.matmul %8, %10, %cst_8 {dimension_numbers = #tpu.dot_dimension_numbers<[1], [0], [0], [1], [0, 0, 1, 1], [], []>} : vector<16x256xbf16>, vector<256x1024xbf16>, vector<16x1024xf32> -> vector<16x1024xf32>
    %12 = arith.addf %7, %11 : vector<16x1024xf32>
    %13 = vector.extract_strided_slice %1 {offsets = [2, 0], sizes = [16, 256], strides = [1, 1]} : vector<18x256xbf16> to vector<16x256xbf16>
    %c2 = arith.constant 2 : index
    %c0_9 = arith.constant 0 : index
    %c0_10 = arith.constant 0 : index
    %14 = vector.load %arg3[%c2, %c0_9, %c0_10] : memref<3x256x1024xbf16, #tpu.memory_space<vmem>>, vector<1x256x1024xbf16>
    %15 = vector.shape_cast %14 : vector<1x256x1024xbf16> to vector<256x1024xbf16>
    %cst_11 = arith.constant dense<0.000000e+00> : vector<16x1024xf32>
    %16 = tpu.matmul %13, %15, %cst_11 {dimension_numbers = #tpu.dot_dimension_numbers<[1], [0], [0], [1], [0, 0, 1, 1], [], []>} : vector<16x256xbf16>, vector<256x1024xbf16>, vector<16x1024xf32> -> vector<16x1024xf32>
    %17 = arith.addf %12, %16 : vector<16x1024xf32>
    %c0_12 = arith.constant 0 : index
    %c0_13 = arith.constant 0 : index
    %18 = vector.load %arg4[%c0_12, %c0_13] : memref<1x1024xf32, #tpu.memory_space<vmem>>, vector<1x1024xf32>
    %19 = vector.broadcast %18 : vector<1x1024xf32> to vector<16x1024xf32>
    %20 = arith.addf %17, %19 : vector<16x1024xf32>
    %21 = arith.truncf %20 : vector<16x1024xf32> to vector<16x1024xbf16>
    %c0_14 = arith.constant 0 : index
    %c0_15 = arith.constant 0 : index
    %c0_16 = arith.constant 0 : index
    %22 = vector.load %arg5[%c0_14, %c0_15, %c0_16] : memref<1x16x1024xbf16, #tpu.memory_space<vmem>>, vector<1x16x1024xbf16>
    %23 = vector.shape_cast %22 : vector<1x16x1024xbf16> to vector<16x1024xbf16>
    %24 = vector.shape_cast %21 : vector<16x1024xbf16> to vector<1x16x1024xbf16>
    tpu.vector_store %arg5[%c0_14, %c0_15, %c0_16], %24 {strides = array<i32>} : memref<1x16x1024xbf16, #tpu.memory_space<vmem>>, vector<1x16x1024xbf16>,
    return
  }
  func.func @transform_0(%arg0: i32, %arg1: i32) -> (i32, i32, i32) {
    %c0_i32 = arith.constant 0 : i32
    %c0_i32_0 = arith.constant 0 : i32
    %c0_i32_1 = arith.constant 0 : i32
    return %arg0, %c0_i32, %c0_i32_0 : i32, i32, i32
  }
  func.func @transform_1(%arg0: i32, %arg1: i32) -> (i32, i32, i32) {
    %c0_i32 = arith.constant 0 : i32
    %c0_i32_0 = arith.constant 0 : i32
    %c0_i32_1 = arith.constant 0 : i32
    %c0_i32_2 = arith.constant 0 : i32
    return %c0_i32, %c0_i32_0, %c0_i32_1 : i32, i32, i32
  }
  func.func @transform_2(%arg0: i32, %arg1: i32) -> (i32, i32) {
    %c0_i32 = arith.constant 0 : i32
    %c0_i32_0 = arith.constant 0 : i32
    %c0_i32_1 = arith.constant 0 : i32
    return %c0_i32, %c0_i32_0 : i32, i32
  }
  func.func @transform_3(%arg0: i32, %arg1: i32) -> (i32, i32, i32) {
    %c0_i32 = arith.constant 0 : i32
    %c0_i32_0 = arith.constant 0 : i32
    return %arg0, %arg1, %c0_i32 : i32, i32, i32
  }
}

module attributes {stable_mosaic.version = 11 : i64} {
  func.func @_conv_kernel(%arg0: i32, %arg1: i32, %arg2: memref<1x34x512xbf16, #tpu.memory_space<vmem>>, %arg3: memref<3x512x128xbf16, #tpu.memory_space<vmem>>, %arg4: memref<1x128xf32, #tpu.memory_space<vmem>>, %arg5: memref<1x32x128xf32, #tpu.memory_space<vmem>>) attributes {dimension_semantics = [#tpu.dimension_semantics<parallel>, #tpu.dimension_semantics<parallel>], iteration_bounds = array<i64: 2, 1>, scalar_prefetch = 0 : i64, scratch_operands = 0 : i64, tpu.core_type = #tpu.core_type<tc>, window_params = [{transform_indices = @transform_0, window_bounds = array<i64: 1, 34, 512>}, {pipeline_mode = #tpu.pipeline_mode<synchronous>, transform_indices = @transform_1, window_bounds = array<i64: 3, 512, 128>}, {pipeline_mode = #tpu.pipeline_mode<synchronous>, transform_indices = @transform_2, window_bounds = array<i64: 1, 128>}, {transform_indices = @transform_3, window_bounds = array<i64: 1, 32, 128>}]} {
    %c0 = arith.constant 0 : index
    %c0_0 = arith.constant 0 : index
    %c0_1 = arith.constant 0 : index
    %0 = vector.load %arg2[%c0, %c0_0, %c0_1] : memref<1x34x512xbf16, #tpu.memory_space<vmem>>, vector<1x34x512xbf16>
    %1 = vector.shape_cast %0 : vector<1x34x512xbf16> to vector<34x512xbf16>
    %cst = arith.constant 0.000000e+00 : f32
    %2 = vector.broadcast %cst : f32 to vector<32x128xf32>
    %3 = vector.extract_strided_slice %1 {offsets = [0, 0], sizes = [32, 512], strides = [1, 1]} : vector<34x512xbf16> to vector<32x512xbf16>
    %c0_2 = arith.constant 0 : index
    %c0_3 = arith.constant 0 : index
    %c0_4 = arith.constant 0 : index
    %4 = vector.load %arg3[%c0_2, %c0_3, %c0_4] : memref<3x512x128xbf16, #tpu.memory_space<vmem>>, vector<1x512x128xbf16>
    %5 = vector.shape_cast %4 : vector<1x512x128xbf16> to vector<512x128xbf16>
    %cst_5 = arith.constant dense<0.000000e+00> : vector<32x128xf32>
    %6 = tpu.matmul %3, %5, %cst_5 {dimension_numbers = #tpu.dot_dimension_numbers<[1], [0], [0], [1], [0, 0, 1, 1], [], []>} : vector<32x512xbf16>, vector<512x128xbf16>, vector<32x128xf32> -> vector<32x128xf32>
    %7 = arith.addf %2, %6 : vector<32x128xf32>
    %8 = vector.extract_strided_slice %1 {offsets = [1, 0], sizes = [32, 512], strides = [1, 1]} : vector<34x512xbf16> to vector<32x512xbf16>
    %c1 = arith.constant 1 : index
    %c0_6 = arith.constant 0 : index
    %c0_7 = arith.constant 0 : index
    %9 = vector.load %arg3[%c1, %c0_6, %c0_7] : memref<3x512x128xbf16, #tpu.memory_space<vmem>>, vector<1x512x128xbf16>
    %10 = vector.shape_cast %9 : vector<1x512x128xbf16> to vector<512x128xbf16>
    %cst_8 = arith.constant dense<0.000000e+00> : vector<32x128xf32>
    %11 = tpu.matmul %8, %10, %cst_8 {dimension_numbers = #tpu.dot_dimension_numbers<[1], [0], [0], [1], [0, 0, 1, 1], [], []>} : vector<32x512xbf16>, vector<512x128xbf16>, vector<32x128xf32> -> vector<32x128xf32>
    %12 = arith.addf %7, %11 : vector<32x128xf32>
    %13 = vector.extract_strided_slice %1 {offsets = [2, 0], sizes = [32, 512], strides = [1, 1]} : vector<34x512xbf16> to vector<32x512xbf16>
    %c2 = arith.constant 2 : index
    %c0_9 = arith.constant 0 : index
    %c0_10 = arith.constant 0 : index
    %14 = vector.load %arg3[%c2, %c0_9, %c0_10] : memref<3x512x128xbf16, #tpu.memory_space<vmem>>, vector<1x512x128xbf16>
    %15 = vector.shape_cast %14 : vector<1x512x128xbf16> to vector<512x128xbf16>
    %cst_11 = arith.constant dense<0.000000e+00> : vector<32x128xf32>
    %16 = tpu.matmul %13, %15, %cst_11 {dimension_numbers = #tpu.dot_dimension_numbers<[1], [0], [0], [1], [0, 0, 1, 1], [], []>} : vector<32x512xbf16>, vector<512x128xbf16>, vector<32x128xf32> -> vector<32x128xf32>
    %17 = arith.addf %12, %16 : vector<32x128xf32>
    %c0_12 = arith.constant 0 : index
    %c0_13 = arith.constant 0 : index
    %18 = vector.load %arg4[%c0_12, %c0_13] : memref<1x128xf32, #tpu.memory_space<vmem>>, vector<1x128xf32>
    %19 = vector.broadcast %18 : vector<1x128xf32> to vector<32x128xf32>
    %20 = arith.addf %17, %19 : vector<32x128xf32>
    %c0_14 = arith.constant 0 : index
    %c0_15 = arith.constant 0 : index
    %c0_16 = arith.constant 0 : index
    %21 = vector.load %arg5[%c0_14, %c0_15, %c0_16] : memref<1x32x128xf32, #tpu.memory_space<vmem>>, vector<1x32x128xf32>
    %22 = vector.shape_cast %21 : vector<1x32x128xf32> to vector<32x128xf32>
    %23 = vector.shape_cast %20 : vector<32x128xf32> to vector<1x32x128xf32>
    tpu.vector_store %arg5[%c0_14, %c0_15, %c0_16], %23 {strides = array<i32>} : memref<1x32x128xf32, #tpu.memory_space<vmem>>, vector<1x32x128xf32>,
    return
  }
  func.func @transform_0(%arg0: i32, %arg1: i32) -> (i32, i32, i32) {
    %c0_i32 = arith.constant 0 : i32
    %c0_i32_0 = arith.constant 0 : i32
    %c0_i32_1 = arith.constant 0 : i32
    return %arg0, %c0_i32, %c0_i32_0 : i32, i32, i32
  }
  func.func @transform_1(%arg0: i32, %arg1: i32) -> (i32, i32, i32) {
    %c0_i32 = arith.constant 0 : i32
    %c0_i32_0 = arith.constant 0 : i32
    %c0_i32_1 = arith.constant 0 : i32
    %c0_i32_2 = arith.constant 0 : i32
    return %c0_i32, %c0_i32_0, %c0_i32_1 : i32, i32, i32
  }
  func.func @transform_2(%arg0: i32, %arg1: i32) -> (i32, i32) {
    %c0_i32 = arith.constant 0 : i32
    %c0_i32_0 = arith.constant 0 : i32
    %c0_i32_1 = arith.constant 0 : i32
    return %c0_i32, %c0_i32_0 : i32, i32
  }
  func.func @transform_3(%arg0: i32, %arg1: i32) -> (i32, i32, i32) {
    %c0_i32 = arith.constant 0 : i32
    %c0_i32_0 = arith.constant 0 : i32
    return %arg0, %arg1, %c0_i32 : i32, i32, i32
  }
}

</mosaic_0001>

<bundles_post_ra>
// kernel: tile.53
= control target key start
LH: loop header
LB: loop body
LE: loop exit
PB: predicated region body
PF: predicated region fallthrough
CT: control target
= control target key end

     0   :  { %s22_s0 = inlined_call_operand.vmem [shape: f32[16], index: 0, kind: input, shape index: {}]   ;;  %s23_s1 = inlined_call_operand.vmem [shape: f32[8,16], index: 1, kind: output, shape index: {}]  }
   0x1   :  { %v4_v0 = vld [vmem:[%s22_s0] ss:$0 sm:$0xff] }
   0x2   :  { %5 = vst [vmem:[%s23_s1] sm:$0xff] %v4_v0 }

// kernel: tile.54
= control target key start
LH: loop header
LB: loop body
LE: loop exit
PB: predicated region body
PF: predicated region fallthrough
CT: control target
= control target key end

     0   :  { %s67_s10 = smov 112   ;;  %s68_s11 = smov 80   ;;  %vm3_vm0 = vcmask 130048   ;;  %vm9_vm1 = vcmask 1048448   ;;  %vm15_vm2 = vcmask 917248   ;;  %vm21_vm3 = vcmask 786048   ;;  %s111_s0 = inlined_call_operand.vmem [shape: f32[8,16], index: 0, kind: input, shape index: {}]   ;;  %s112_s1 = inlined_call_operand.vmem [shape: f32[1,128], index: 1, kind: output, shape index: {}]  }
   0x1   :  { %v53_v0 = vld [vmem:[%s111_s0 + $0x7] sm:$0x1]   ;;  %v55_v1 = vld [vmem:[%s111_s0 + $0x5] sm:$0x1]   ;;  %v54_v2 = vld [vmem:[%s111_s0 + $0x6] sm:$0x1]  }
   0x2   :  { %7 = vrot.lane.b32.xlu0 %v53_v0, %s67_s10  ;;  %19 = vrot.lane.b32.xlu1 %v55_v1, %s68_s11  ;;  %v56_v3 = vld [vmem:[%s111_s0 + $0x4] sm:$0x1]   ;;  %v2_v4 = vld [vmem:[%s111_s0] sm:$0x1]   ;;  %s69_s18 = smov 96   ;;  %s70_s19 = smov 64  }
   0x3   :  { %4 = vst.msk [vmem:[#allocation0] sm:$0x1] %vm3_vm0, %v2_v4   ;;  %v57_v5 = vld [vmem:[%s111_s0 + $0x3] sm:$0x1]   ;;  %v58_v6 = vld [vmem:[%s111_s0 + $0x2] sm:$0x1]  }
   0x4   :  { %s71_s24 = smov 48   ;;  %s72_s25 = smov 32   ;;  %v59_v7 = vld [vmem:[%s111_s0 + $0x1] sm:$0x1]   ;;  %vm27_vm4 = vcmask 654848   ;;  %vm33_vm5 = vcmask 523648  }
   0x5   :  { %s73_s0 = smov 16   ;;  %vm39_vm6 = vcmask 392448   ;;  %vm45_vm7 = vcmask 261248  }
   0x6   :  { %13 = vrot.lane.b32.xlu0 %v54_v2, %s69_s18  ;;  %25 = vrot.lane.b32.xlu1 %v56_v3, %s70_s19 }
   0xa   :  { %31 = vrot.lane.b32.xlu0 %v57_v5, %s71_s24  ;;  %37 = vrot.lane.b32.xlu1 %v58_v6, %s72_s25 }
   0xe   :  { %43 = vrot.lane.b32.xlu0 %v59_v7, %s73_s0 }
  0x74   :  { %v8_v8 = vpop.permute.xlu0 %7   ;;  %v20_v9 = vpop.permute.xlu1 %19  }
  0x75   :  { %10 = vst.msk [vmem:[#allocation0] sm:$0x1] %vm9_vm1, %v8_v8  }
  0x78   :  { %v14_v10 = vpop.permute.xlu0 %13   ;;  %v26_v11 = vpop.permute.xlu1 %25  }
  0x79   :  { %16 = vst.msk [vmem:[#allocation0] sm:$0x1] %vm15_vm2, %v14_v10  }
  0x7a   :  { %22 = vst.msk [vmem:[#allocation0] sm:$0x1] %vm21_vm3, %v20_v9  }
  0x7b   :  { %28 = vst.msk [vmem:[#allocation0] sm:$0x1] %vm27_vm4, %v26_v11  }
  0x7c   :  { %v32_v12 = vpop.permute.xlu0 %31   ;;  %v38_v13 = vpop.permute.xlu1 %37  }
  0x7d   :  { %34 = vst.msk [vmem:[#allocation0] sm:$0x1] %vm33_vm5, %v32_v12  }
  0x7e   :  { %40 = vst.msk [vmem:[#allocation0] sm:$0x1] %vm39_vm6, %v38_v13  }
  0x80   :  { %v44_v14 = vpop.permute.xlu0 %43  }
  0x81   :  { %46 = vst.msk [vmem:[#allocation0] sm:$0x1] %vm45_vm7, %v44_v14  }
  0x88   :  { %v50_v15 = vld [vmem:[#allocation0] sm:$0x1] }
  0x89   :  { %52 = vst [vmem:[%s112_s1] sm:$0x1] %v50_v15 }

// kernel: g_forward.6
= control target key start
LH: loop header
LB: loop body
LE: loop exit
PB: predicated region body
PF: predicated region fallthrough
CT: control target
= control target key end

     0   :  { %s1090_s12 = smov 0   ;;  %s1092_s13 = smov 0   ;;  %s1249_s0 = inlined_call_operand.vmem [shape: bf16[2,16,24], index: 0, kind: input, shape index: {}]   ;;  %s1250_s1 = inlined_call_operand.vmem [shape: bf16[9,24,128], index: 1, kind: input, shape index: {}]   ;;  %s1251_s2 = inlined_call_operand.vmem [shape: f32[1,128], index: 2, kind: input, shape index: {}]   ;;  %s1252_s3 = inlined_call_operand.vmem [shape: bf16[2,8,128], index: 3, kind: output, shape index: {}]  }
   0x1   :  { %s1094_s14 = smov 0  }
   0x2 LB: > { %s25_s15 = sadd.s32 1, %s1062_s13  ;;  %p840_p0 = scmp.ge.s32.totalorder %s1066_s14, 1  ;;  %s1066_s14 = sphi %s1094_s14, %s13_s14   ;;  %s1062_s13 = sphi %s1092_s13, %s1254_s13   ;;  %s1058_s12 = sphi %s1090_s12, %s1253_s12  }
   0x3   : > { %p27_p1 = scmp.ge.s32.totalorder %s25_s15, 2  ;;  %p151_p2 = scmp.lt.s32.totalorder %s1066_s14, 3 }
   0x5   : > { %s1256_s15 = smov (%p27_p1, %s25_s15), 0  ;;  %p152_p3 = pnand %p840_p0, %p151_p2 }
   0x6   : > { %v1025_v0 = vld [vmem:[%s1250_s1 + $0xc] sm:$0xff] (!%p152_p3)   ;;  %v1068_v1 = vmov (!%p152_p3), 0.0   ;;  %v1026_v2 = vld [vmem:[%s1250_s1] sm:$0xff] (!%p152_p3)   ;;  %vm224_vm0 = vcmask (!%p152_p3), 1043456   ;;  %v1027_v3 = vld [vmem:[%s1250_s1 + $0x14] ss:$0 sps:$4 sm:$0xff] (!%p152_p3)  }
   0x7   : > { %155 = sbr.rel (%p152_p3) target bundleno = 277 (0x115), region = 32  ;;  %927 = vmatprep.subr.bf16.mxu0 (!%p152_p3), %v1068_v1  ;;  %935 = vmatprep.subr.bf16.mxu1 (!%p152_p3), %v1068_v1  ;;  %v1028_v4 = vld [vmem:[%s1250_s1 + $0x8] ss:$0 sps:$4 sm:$0xff] (!%p152_p3)   ;;  %p177_p4 = scmp.lt.s32.totalorder (!%p152_p3), %s1058_s12, 1  ;;  %v226_v5 = vsel (!%p152_p3), %vm224_vm0, %v1027_v3, 0  ;;  %vm1069_vm1 = vmmov (!%p152_p3), 0  }
   0x8   : > { %928 = vmatpush3.bf16.msra.mxu0 (!%p152_p3), %v1025_v0  ;;  %936 = vmatpush3.bf16.msra.mxu1 (!%p152_p3), %v1026_v2  ;;  %v281_v6 = vsel (!%p152_p3), %vm224_vm0, %v1028_v4, 0  ;;  %vm220_vm2 = vcmask (!%p152_p3), 195584   ;;  %v1031_v7 = vld [vmem:[%s1250_s1 + $0x24] sm:$0xff] (!%p152_p3)   ;;  %v1033_v8 = vld [vmem:[%s1250_s1 + $0x2c] ss:$0 sps:$4 sm:$0xff] (!%p152_p3)   ;;  %v1030_v18 = vld [vmem:[%s1250_s1 + $0x18] sm:$0xff] (!%p152_p3)  }
   0x9   : > { %929 = vmatprep.subr.bf16.mxu0 (!%p152_p3), %v1068_v1  ;;  %937 = vmatprep.subr.bf16.mxu1 (!%p152_p3), %v1068_v1  ;;  %v404_v14 = vsel (!%p152_p3), %vm224_vm0, %v1033_v8, 0  ;;  %v1032_v19 = vld [vmem:[%s1250_s1 + $0x20] ss:$0 sps:$4 sm:$0xff] (!%p152_p3)   ;;  %v1037_v23 = vld [vmem:[%s1250_s1 + $0x44] ss:$0 sps:$4 sm:$0xff] (!%p152_p3)   ;;  %v1034_v29 = vld [vmem:[%s1250_s1 + $0x30] sm:$0xff] (!%p152_p3)  }
   0xa   : > { %931 = vmatprep.mubr.msk.bf16.mxu0 (!%p152_p3), %vm1069_vm1, %v1068_v1  ;;  %939 = vmatprep.mubr.msk.bf16.mxu1 (!%p152_p3), %vm1069_vm1, %v1068_v1  ;;  %v1035_v22 = vld [vmem:[%s1250_s1 + $0x3c] sm:$0xff] (!%p152_p3)   ;;  %v341_v24 = vsel (!%p152_p3), %vm224_vm0, %v1032_v19, 0  ;;  %v528_v27 = vsel (!%p152_p3), %vm224_vm0, %v1037_v23, 0  ;;  %v1036_v30 = vld [vmem:[%s1250_s1 + $0x38] ss:$0 sps:$4 sm:$0xff] (!%p152_p3)   ;;  %v1038_v39 = vld [vmem:[%s1250_s1 + $0x48] sm:$0xff] (!%p152_p3)  }
   0xb   : > { %v1039_v32 = vld [vmem:[%s1250_s1 + $0x54] sm:$0xff] (!%p152_p3)   ;;  %v1041_v33 = vld [vmem:[%s1250_s1 + $0x5c] ss:$0 sps:$4 sm:$0xff] (!%p152_p3)   ;;  %v465_v34 = vsel (!%p152_p3), %vm224_vm0, %v1036_v30, 0  ;;  %v1040_v40 = vld [vmem:[%s1250_s1 + $0x50] ss:$0 sps:$4 sm:$0xff] (!%p152_p3)  }
   0xc   : > { %930 = vmatpush3.bf16.msra.mxu0 (!%p152_p3), %v226_v5  ;;  %938 = vmatpush3.bf16.msra.mxu1 (!%p152_p3), %v281_v6  ;;  %v652_v38 = vsel (!%p152_p3), %vm224_vm0, %v1041_v33, 0  ;;  %v589_v42 = vsel (!%p152_p3), %vm224_vm0, %v1040_v40, 0  ;;  %v1042_v44 = vld [vmem:[%s1250_s1 + $0x60] sm:$0xff] (!%p152_p3)   ;;  %v1043_v45 = vld [vmem:[%s1250_s1 + $0x68] ss:$0 sps:$4 sm:$0xff] (!%p152_p3)  }
   0xd   : > { %943 = vmatprep.subr.bf16.mxu0 (!%p152_p3), %v1068_v1  ;;  %951 = vmatprep.subr.bf16.mxu1 (!%p152_p3), %v1068_v1  ;;  %v712_v46 = vsel (!%p152_p3), %vm224_vm0, %v1043_v45, 0  ;;  %v896_v23 = vld [vmem:[%s1251_s2] ss:$0 sm:$0xff] (!%p152_p3) }
   0xe   : > { %s1258_s12 = smov (!%p177_p4, %s1058_s12), 1 }
   0xf   : > { %s899_s24 = sshll.u32 %s1258_s12, 3  ;;  %s843_s8 = sshll.u32 %s1258_s12, 2 }
  0x10   : > { %s181_s29 = scalar_lea.vmem %s1249_s0, %s899_s24  ;;  %s188_s11 = scalar_lea.vmem %s1252_s3, %s843_s8 }
  0x11   : > { %v190_v9 = vld [vmem:[%s181_s29] sm:$0xf]  ;;  %v1144_v10 = vld [vmem:[%s181_s29 + $0x4] sm:$0xf] }
  0x12   : > { %v1147_v11 = vcombine.low %v190_v9, %v1144_v10  ;;  %940 = vmatmul.mubr.msk.bf16.vlgmr.msra.gmra.mrb[0].mxu1 %vm220_vm2, %v190_v9 }
  0x13   : > { %952 = vmatpush3.bf16.msra.mxu1 %v1031_v7  ;;  %955 = vmatprep.mubr.msk.bf16.mxu1 %vm1069_vm1, %v1068_v1 }
  0x14   : > { %v205_v12 = vshrl.u32 %v1147_v11, 16  ;;  %v207_v13 = vshll.u32 %v1147_v11, 16  ;;  %953 = vmatprep.subr.bf16.mxu1 %v1068_v1  ;;  %v327_v28 = vrot.slane %v1147_v11, 1  ;;  %v451_v37 = vrot.slane %v1147_v11, 2 }
  0x15   : > { %v575_v43 = vrot.slane %v1147_v11, 3 }
  0x16   : > { %v209_v15 = vrot.slane %v207_v13, 1  ;;  %v388_v16 = vrot.slane %v205_v12, 1  ;;  %v389_v17 = vrot.slane %v207_v13, 2  ;;  %v512_v25 = vrot.slane %v205_v12, 2 }
  0x17   : > { %954 = vmatpush3.bf16.msra.mxu1 %v404_v14  ;;  %v513_v26 = vrot.slane %v207_v13, 3  ;;  %v636_v35 = vrot.slane %v205_v12, 3  ;;  %v637_v36 = vrot.slane %v207_v13, 4 }
  0x18   : > { %v210_v20 = vor.u32 %v209_v15, %v205_v12  ;;  %v390_v21 = vor.u32 %v389_v17, %v388_v16  ;;  %967 = vmatprep.subr.bf16.mxu1 %v1068_v1 }
  0x19   : > { %v514_v31 = vor.u32 %v513_v26, %v512_v25  ;;  %v638_v41 = vor.u32 %v637_v36, %v636_v35 }
  0x1a   : > { %932 = vmatmul.mubr.msk.bf16.vlgmr.msra.gmra.mrb[0].mxu0 %vm220_vm2, %v210_v20  ;;  %956 = vmatmul.mubr.msk.bf16.vlgmr.msra.gmra.mrb[4].mxu1 %vm220_vm2, %v390_v21 }
  0x1b   : > { %944 = vmatpush3.bf16.msra.mxu0 %v1030_v18  ;;  %947 = vmatprep.mubr.msk.bf16.mxu0 %vm1069_vm1, %v1068_v1 }
  0x1c   : > { %945 = vmatprep.subr.bf16.mxu0 %v1068_v1  ;;  %968 = vmatpush3.bf16.msra.mxu1 %v1035_v22 }
  0x1d   : > { %969 = vmatprep.subr.bf16.mxu1 %v1068_v1  ;;  %971 = vmatprep.mubr.msk.bf16.mxu1 %vm1069_vm1, %v1068_v1 }
  0x1f   : > { %946 = vmatpush3.bf16.msra.mxu0 %v341_v24 }
  0x20   : > { %959 = vmatprep.subr.bf16.mxu0 %v1068_v1  ;;  %970 = vmatpush3.bf16.msra.mxu1 %v528_v27 }
  0x21   : > { %983 = vmatprep.subr.bf16.mxu1 %v1068_v1 }
  0x22   : > { %948 = vmatmul.mubr.msk.bf16.vlgmr.msra.gmra.mrb[4].mxu0 %vm220_vm2, %v327_v28 }
  0x23   : > { %960 = vmatpush3.bf16.msra.mxu0 %v1034_v29  ;;  %963 = vmatprep.mubr.msk.bf16.mxu0 %vm1069_vm1, %v1068_v1 }
  0x24   : > { %961 = vmatprep.subr.bf16.mxu0 %v1068_v1  ;;  %972 = vmatmul.mubr.msk.bf16.vlgmr.msra.gmra.mrb[8].mxu1 %vm220_vm2, %v514_v31 }
  0x25   : > { %984 = vmatpush3.bf16.msra.mxu1 %v1039_v32  ;;  %987 = vmatprep.mubr.msk.bf16.mxu1 %vm1069_vm1, %v1068_v1 }
  0x26   : > { %985 = vmatprep.subr.bf16.mxu1 %v1068_v1 }
  0x27   : > { %962 = vmatpush3.bf16.msra.mxu0 %v465_v34 }
  0x28   : > { %975 = vmatprep.subr.bf16.mxu0 %v1068_v1 }
  0x29   : > { %986 = vmatpush3.bf16.msra.mxu1 %v652_v38 }
  0x2a   : > { %964 = vmatmul.mubr.msk.bf16.vlgmr.msra.gmra.mrb[8].mxu0 %vm220_vm2, %v451_v37 }
  0x2b   : > { %976 = vmatpush3.bf16.msra.mxu0 %v1038_v39  ;;  %979 = vmatprep.mubr.msk.bf16.mxu0 %vm1069_vm1, %v1068_v1 }
  0x2c   : > { %977 = vmatprep.subr.bf16.mxu0 %v1068_v1  ;;  %988 = vmatmul.mubr.msk.bf16.vlgmr.msra.gmra.mrb[12].mxu1 %vm220_vm2, %v638_v41 }
  0x2f   : > { %978 = vmatpush3.bf16.msra.mxu0 %v589_v42 }
  0x30   : > { %991 = vmatprep.subr.bf16.mxu0 %v1068_v1 }
  0x32   : > { %980 = vmatmul.mubr.msk.bf16.vlgmr.msra.gmra.mrb[12].mxu0 %vm220_vm2, %v575_v43 }
  0x33   : > { %992 = vmatpush3.bf16.msra.mxu0 %v1042_v44  ;;  %995 = vmatprep.mubr.msk.bf16.mxu0 %vm1069_vm1, %v1068_v1 }
  0x34   : > { %993 = vmatprep.subr.bf16.mxu0 %v1068_v1 }
  0x37   : > { %994 = vmatpush3.bf16.msra.mxu0 %v712_v46 }
  0x3a   : > { %996 = vmatmul.mubr.msk.bf16.vlgmr.msra.gmra.mrb[16].mxu0 %vm220_vm2, %v1144_v10 }
  0xe5   : > { %v317_v47 = vpop.f32.mrb[0].mxu1 }
  0xe6   : > { %v941_v48 = vpop.f32.mrb[1].mxu1 }
  0xe7   : > { %v320_v49 = vpop.f32.mrb[2].mxu1 }
  0xe8   : > { %v942_v50 = vpop.f32.mrb[3].mxu1 }
  0xed   : > { %v262_v51 = vpop.f32.mrb[0].mxu0  ;;  %v440_v52 = vpop.f32.mrb[4].mxu1 }
  0xee   : > { %v318_v53 = vadd.f32 %v317_v47, %v262_v51  ;;  %v933_v54 = vpop.f32.mrb[1].mxu0  ;;  %v957_v55 = vpop.f32.mrb[5].mxu1 }
  0xef   : > { %v265_v56 = vpop.f32.mrb[2].mxu0  ;;  %v443_v57 = vpop.f32.mrb[6].mxu1 }
  0xf0   : > { %v934_v58 = vpop.f32.mrb[3].mxu0  ;;  %v958_v59 = vpop.f32.mrb[7].mxu1 }
  0xf5   : > { %v377_v60 = vpop.f32.mrb[4].mxu0 }
  0xf6   : > { %v383_v61 = vadd.f32 %v377_v60, %v318_v53  ;;  %v949_v62 = vpop.f32.mrb[5].mxu0 }
  0xf7   : > { %v380_v63 = vpop.f32.mrb[6].mxu0  ;;  %v564_v0 = vpop.f32.mrb[8].mxu1 }
  0xf8   : > { %v446_v1 = vadd.f32 %v440_v52, %v383_v61  ;;  %v950_v2 = vpop.f32.mrb[7].mxu0  ;;  %v973_v3 = vpop.f32.mrb[9].mxu1 }
  0xf9   : > { %v567_v4 = vpop.f32.mrb[10].mxu1 }
  0xfa   : > { %v974_v5 = vpop.f32.mrb[11].mxu1 }
  0xfd   : > { %v501_v6 = vpop.f32.mrb[8].mxu0 }
  0xfe   : > { %v507_v7 = vadd.f32 %v501_v6, %v446_v1  ;;  %v965_v8 = vpop.f32.mrb[9].mxu0 }
  0xff   : > { %v504_v9 = vpop.f32.mrb[10].mxu0  ;;  %v688_v10 = vpop.f32.mrb[12].mxu1 }
 0x100   : > { %v570_v11 = vadd.f32 %v564_v0, %v507_v7  ;;  %v966_v12 = vpop.f32.mrb[11].mxu0  ;;  %v989_v13 = vpop.f32.mrb[13].mxu1 }
 0x101   : > { %v691_v14 = vpop.f32.mrb[14].mxu1 }
 0x102   : > { %v990_v15 = vpop.f32.mrb[15].mxu1 }
 0x105   : > { %v625_v16 = vpop.f32.mrb[12].mxu0 }
 0x106   : > { %v631_v17 = vadd.f32 %v625_v16, %v570_v11  ;;  %v981_v18 = vpop.f32.mrb[13].mxu0 }
 0x107   : > { %v628_v19 = vpop.f32.mrb[14].mxu0 }
 0x108   : > { %v694_v20 = vadd.f32 %v688_v10, %v631_v17  ;;  %v982_v21 = vpop.f32.mrb[15].mxu0 }
 0x10d   : > { %v748_v22 = vpop.f32.mrb[16].mxu0 }
 0x10e   : > { %v754_v24 = vadd.f32 %v748_v22, %v694_v20  ;;  %v997_v25 = vpop.f32.mrb[17].mxu0 }
 0x10f   : > { %v751_v26 = vpop.f32.mrb[18].mxu0 }
 0x110   : > { %v762_v27 = vadd.f32 %v896_v23, %v754_v24  ;;  %v998_v28 = vpop.f32.mrb[19].mxu0 }
 0x112   : > { %v763_v29 = vpack.c.bf16 %v762_v27, %v762_v27 }
 0x114   : > { %764 = vst [vmem:[%s188_s11] sm:$0xf] %v763_v29 }
 0x115 PF: > { %s13_s14 = sadd.s32 1, %s1066_s14   ;;  %s1253_s12 = smov %s1062_s13 }
 0x116   : > { %p10_p5 = scmp.ge.s32.totalorder %s13_s14, 4   ;;  %s1254_s13 = smov %s1256_s15 }
 0x118   :  { %12 = sbr.rel (!%p10_p5) target bundleno = 2 (0x2), region = 70 }

// kernel: g_forward.7
= control target key start
LH: loop header
LB: loop body
LE: loop exit
PB: predicated region body
PF: predicated region fallthrough
CT: control target
= control target key end

     0   :  { %s1858_s30 = smov 0   ;;  %s1860_s10 = smov 0   ;;  %s2161_s0 = inlined_call_operand.vmem [shape: bf16[2,12,128], index: 0, kind: input, shape index: {}]   ;;  %s2162_s1 = inlined_call_operand.vmem [shape: bf16[3,128,128], index: 1, kind: input, shape index: {}]   ;;  %s2163_s2 = inlined_call_operand.vmem [shape: f32[1,128], index: 2, kind: input, shape index: {}]   ;;  %s2164_s3 = inlined_call_operand.vmem [shape: bf16[3,128,128], index: 3, kind: input, shape index: {}]   ;;  %s2165_s4 = inlined_call_operand.vmem [shape: f32[1,128], index: 4, kind: input, shape index: {}]   ;;  %s2166_s5 = inlined_call_operand.vmem [shape: bf16[128,128], index: 5, kind: input, shape index: {}]   ;;  %s2167_s6 = inlined_call_operand.vmem [shape: f32[1,128], index: 6, kind: input, shape index: {}]   ;;  %s2168_s7 = inlined_call_operand.vmem [shape: f32[2,8,128], index: 7, kind: input, shape index: {}, may-alias: {7,9}]   ;;  %s2169_s8 = inlined_call_operand.vmem [shape: bf16[2,8,128], index: 8, kind: output, shape index: {0}]   ;;  %s2170_s9 = inlined_call_operand.vmem [shape: f32[2,8,128], index: 9, kind: output, shape index: {1}, may-alias: {7,9}]  }
   0x1   :  { %s1862_s11 = smov 0  }
   0x2 LB: > { %s32_s12 = sadd.s32 1, %s1800_s10  ;;  %p1360_p0 = scmp.ge.s32.totalorder %s1804_s11, 1  ;;  %s1804_s11 = sphi %s1862_s11, %s20_s11   ;;  %s1800_s10 = sphi %s1860_s10, %s2172_s10   ;;  %s1796_s30 = sphi %s1858_s30, %s2171_s30  }
   0x3   : > { %p34_p1 = scmp.ge.s32.totalorder %s32_s12, 2  ;;  %p320_p2 = scmp.lt.s32.totalorder %s1804_s11, 3 }
   0x5   : > { %s2174_s12 = smov (%p34_p1, %s32_s12), 0  ;;  %p321_p3 = pnand %p1360_p0, %p320_p2 }
   0x6   : > { %v1725_v0 = vld [vmem:[%s2162_s1 + $0x40] sm:$0xff] (!%p321_p3)   ;;  %v1806_v1 = vmov (!%p321_p3), 0.0   ;;  %v1727_v3 = vld [vmem:[%s2162_s1 + $0x48] sm:$0xff] (!%p321_p3)   ;;  %vm1807_vm0 = vmmov (!%p321_p3), 0   ;;  %p372_p4 = scmp.lt.s32.totalorder (!%p321_p3), %s1796_s30, 1  ;;  %v1729_v5 = vld [vmem:[%s2162_s1 + $0x50] sm:$0xff] (!%p321_p3)   ;;  %v751_v59 = vlaneseq (!%p321_p3) }
   0x7   : > { %324 = sbr.rel (%p321_p3) target bundleno = 770 (0x302), region = 52  ;;  %1559 = vmatprep.subr.bf16.mxu0 (!%p321_p3), %v1806_v1  ;;  %1579 = vmatprep.subr.bf16.mxu1 (!%p321_p3), %v1806_v1  ;;  %v1726_v2 = vld [vmem:[%s2162_s1] sm:$0xff] (!%p321_p3)   ;;  %v1728_v4 = vld [vmem:[%s2162_s1 + $0x8] sm:$0xff] (!%p321_p3)   ;;  %v1730_v6 = vld [vmem:[%s2162_s1 + $0x10] sm:$0xff] (!%p321_p3)   ;;  %vm1107_vm6 = vcmask (!%p321_p3), 1045504  }
   0x8   : > { %1560 = vmatpush3.bf16.msra.mxu0 (!%p321_p3), %v1725_v0  ;;  %1575 = vmatprep.mubr.msk.bf16.mxu0 (!%p321_p3), %vm1807_vm0, %v1806_v1  ;;  %v1731_v7 = vld [vmem:[%s2162_s1 + $0x58] sm:$0xff] (!%p321_p3)   ;;  %v1733_v9 = vld [vmem:[%s2162_s1 + $0x60] sm:$0xff] (!%p321_p3)   ;;  %v1735_v14 = vld [vmem:[%s2162_s1 + $0x68] sm:$0xff] (!%p321_p3)   ;;  %v752_v60 = vshrl.u32 (!%p321_p3), %v751_v59, 7 }
   0x9   : > { %1580 = vmatpush3.bf16.msra.mxu1 (!%p321_p3), %v1726_v2  ;;  %1561 = vmatprep.subr.bf16.mxu0 (!%p321_p3), %v1806_v1  ;;  %v1732_v8 = vld [vmem:[%s2162_s1 + $0x18] sm:$0xff] (!%p321_p3)   ;;  %v1734_v10 = vld [vmem:[%s2162_s1 + $0x20] sm:$0xff] (!%p321_p3)   ;;  %v1736_v15 = vld [vmem:[%s2162_s1 + $0x28] sm:$0xff] (!%p321_p3)  }
   0xa   : > { %1581 = vmatprep.subr.bf16.mxu1 (!%p321_p3), %v1806_v1  ;;  %1595 = vmatprep.mubr.msk.bf16.mxu1 (!%p321_p3), %vm1807_vm0, %v1806_v1  ;;  %v1737_v17 = vld [vmem:[%s2162_s1 + $0x70] sm:$0xff] (!%p321_p3)   ;;  %v1739_v19 = vld [vmem:[%s2162_s1 + $0x78] sm:$0xff] (!%p321_p3)   ;;  %v1742_v23 = vld [vmem:[%s2162_s1 + $0x80] sm:$0xff] (!%p321_p3)   ;;  %v753_v61 = vadd.s32 (!%p321_p3), 8, %v752_v60 }
   0xb   : > { %v1738_v18 = vld [vmem:[%s2162_s1 + $0x30] sm:$0xff] (!%p321_p3)   ;;  %v1740_v22 = vld [vmem:[%s2162_s1 + $0x38] sm:$0xff] (!%p321_p3)   ;;  %v1743_v25 = vld [vmem:[%s2162_s1 + $0x88] sm:$0xff] (!%p321_p3)  }
   0xc   : > { %1562 = vmatpush3.bf16.msra.mxu0 (!%p321_p3), %v1727_v3  ;;  %v1744_v26 = vld [vmem:[%s2162_s1 + $0x90] sm:$0xff] (!%p321_p3)   ;;  %v1745_v27 = vld [vmem:[%s2162_s1 + $0x98] sm:$0xff] (!%p321_p3)   ;;  %v1746_v28 = vld [vmem:[%s2162_s1 + $0xa0] sm:$0xff] (!%p321_p3)  }
   0xd   : > { %1582 = vmatpush3.bf16.msra.mxu1 (!%p321_p3), %v1728_v4  ;;  %1563 = vmatprep.subr.bf16.mxu0 (!%p321_p3), %v1806_v1  ;;  %v1747_v29 = vld [vmem:[%s2162_s1 + $0xa8] sm:$0xff] (!%p321_p3)   ;;  %v1748_v30 = vld [vmem:[%s2162_s1 + $0xb0] sm:$0xff] (!%p321_p3)   ;;  %v1749_v31 = vld [vmem:[%s2162_s1 + $0xb8] sm:$0xff] (!%p321_p3)   ;;  %v755_v4 = vadd.s32 (!%p321_p3), 4294967295, %v753_v61 }
   0xe   : > { %s2176_s30 = smov (!%p372_p4, %s1796_s30), 1  ;;  %1583 = vmatprep.subr.bf16.mxu1 %v1806_v1  ;;  %v1750_v33 = vld [vmem:[%s2164_s3] sm:$0xff]   ;;  %v1751_v35 = vld [vmem:[%s2164_s3 + $0x8] sm:$0xff]   ;;  %v1753_v37 = vld [vmem:[%s2164_s3 + $0x10] sm:$0xff]  }
   0xf   : > { %s1910_s27 = sshll.u32 %s2176_s30, 3  ;;  %v1752_v34 = vld [vmem:[%s2164_s3 + $0x40] sm:$0xff]   ;;  %v1754_v36 = vld [vmem:[%s2164_s3 + $0x48] sm:$0xff]   ;;  %v1756_v38 = vld [vmem:[%s2164_s3 + $0x50] sm:$0xff]   ;;  %vm759_vm2 = vcmp.lt.s32.totalorder %v755_v4, 8  ;;  %s1364_s20 = sshll.u32 %s2176_s30, 2 }
  0x10   : > { %1564 = vmatpush3.bf16.msra.mxu0 %v1729_v5  ;;  %s376_s15 = scalar_lea.vmem %s2161_s0, %s1910_s27  ;;  %v1755_v39 = vld [vmem:[%s2164_s3 + $0x18] sm:$0xff]   ;;  %v1757_v41 = vld [vmem:[%s2164_s3 + $0x20] sm:$0xff]   ;;  %v1759_v42 = vld [vmem:[%s2164_s3 + $0x28] sm:$0xff]   ;;  %s390_s23 = scalar_lea.vmem %s2169_s8, %s1364_s20 }
  0x11   : > { %1584 = vmatpush3.bf16.msra.mxu1 %v1730_v6  ;;  %1565 = vmatprep.subr.bf16.mxu0 %v1806_v1  ;;  %v1929_v11 = vld [vmem:[%s376_s15] sm:$0xf]  ;;  %v1931_v12 = vld [vmem:[%s376_s15 + $0x4] sm:$0x3]  ;;  %v1758_v40 = vld [vmem:[%s2164_s3 + $0x58] sm:$0xff]   ;;  %s383_s26 = scalar_lea.vmem %s2168_s7, %s1910_s27  ;;  %s397_s14 = scalar_lea.vmem %s2170_s9, %s1910_s27 }
  0x12   : > { %1585 = vmatprep.subr.bf16.mxu1 %v1806_v1  ;;  %v1382_v13 = vcombine.low %v1929_v11, %v1931_v12  ;;  %v1760_v43 = vld [vmem:[%s2164_s3 + $0x60] sm:$0xff]   ;;  %v1761_v44 = vld [vmem:[%s2164_s3 + $0x30] sm:$0xff]   ;;  %v1762_v45 = vld [vmem:[%s2164_s3 + $0x68] sm:$0xff]  }
  0x13   : > { %v1763_v46 = vld [vmem:[%s2164_s3 + $0x38] sm:$0xff]   ;;  %v1764_v47 = vld [vmem:[%s2164_s3 + $0x70] sm:$0xff]   ;;  %v1423_v63 = vld [vmem:[%s2163_s2] ss:$0 sm:$0xff] }
  0x14   : > { %1566 = vmatpush3.bf16.msra.mxu0 %v1731_v7  ;;  %v442_v16 = vshll.u32 %v1382_v13, 16  ;;  %v440_v20 = vshrl.u32 %v1382_v13, 16  ;;  %v643_v32 = vrot.slane %v1382_v13, 1  ;;  %v1765_v48 = vld [vmem:[%s2164_s3 + $0x78] sm:$0xff]   ;;  %v1484_v61 = vld [vmem:[%s2167_s6] ss:$0 sm:$0xff] }
  0x15   : > { %1586 = vmatpush3.bf16.msra.mxu1 %v1732_v8  ;;  %1567 = vmatprep.subr.bf16.mxu0 %v1806_v1  ;;  %v754_v8 = vadd.s32 4294967295, %v752_v60 }
  0x16   : > { %1587 = vmatprep.subr.bf16.mxu1 %v1806_v1  ;;  %v444_v21 = vrot.slane %v442_v16, 1 }
  0x17   : > { %vm756_vm4 = vcmp.ge.s32.totalorder %v754_v8, 0 }
  0x18   : > { %1568 = vmatpush3.bf16.msra.mxu0 %v1733_v9  ;;  %v445_v24 = vor.u32 %v444_v21, %v440_v20  ;;  %vm1456_vm5 = vmpackc.low %vm759_vm2, %vm756_vm4 }
  0x19   : > { %1588 = vmatpush3.bf16.msra.mxu1 %v1734_v10  ;;  %1569 = vmatprep.subr.bf16.mxu0 %v1806_v1 }
  0x1a   : > { %1589 = vmatprep.subr.bf16.mxu1 %v1806_v1 }
  0x1c   : > { %1570 = vmatpush3.bf16.msra.mxu0 %v1735_v14 }
  0x1d   : > { %1590 = vmatpush3.bf16.msra.mxu1 %v1736_v15  ;;  %1571 = vmatprep.subr.bf16.mxu0 %v1806_v1 }
  0x1e   : > { %1591 = vmatprep.subr.bf16.mxu1 %v1806_v1 }
  0x20   : > { %1572 = vmatpush3.bf16.msra.mxu0 %v1737_v17 }
  0x21   : > { %1592 = vmatpush3.bf16.msra.mxu1 %v1738_v18  ;;  %1573 = vmatprep.subr.bf16.mxu0 %v1806_v1 }
  0x22   : > { %1593 = vmatprep.subr.bf16.mxu1 %v1806_v1 }
  0x24   : > { %1574 = vmatpush3.bf16.msra.mxu0 %v1739_v19 }
  0x25   : > { %1594 = vmatpush3.bf16.msra.mxu1 %v1740_v22  ;;  %1599 = vmatprep.subr.bf16.mxu0 %v1806_v1 }
  0x26   : > { %1619 = vmatprep.subr.bf16.mxu1 %v1806_v1 }
  0x27   : > { %1576 = vmatmul.mubr.bf16.vlgmr.msra.gmra.mrb[0].mxu0 %v445_v24 }
  0x28   : > { %1596 = vmatmul.mubr.bf16.vlgmr.msra.gmra.mrb[0].mxu1 %v1382_v13  ;;  %1600 = vmatpush3.bf16.msra.mxu0 %v1742_v23  ;;  %v1766_v23 = vld [vmem:[%s2164_s3 + $0x80] sm:$0xff]  }
  0x29   : > { %1601 = vmatprep.subr.bf16.mxu0 %v1806_v1  ;;  %1615 = vmatprep.mubr.msk.bf16.mxu0 %vm1807_vm0, %v1806_v1 }
  0x2a   : > { %1635 = vmatprep.mubr.msk.bf16.mxu1 %vm1807_vm0, %v1806_v1  ;;  %1620 = vmatpush3.bf16.msra.mxu1 %v1752_v34  ;;  %v1775_v34 = vld [vmem:[%s2166_s5 + $0x8] sm:$0xff]  }
  0x2b   : > { %1621 = vmatprep.subr.bf16.mxu1 %v1806_v1 }
  0x2c   : > { %1602 = vmatpush3.bf16.msra.mxu0 %v1743_v25  ;;  %v1767_v25 = vld [vmem:[%s2164_s3 + $0x88] sm:$0xff]  }
  0x2d   : > { %1603 = vmatprep.subr.bf16.mxu0 %v1806_v1 }
  0x2e   : > { %1622 = vmatpush3.bf16.msra.mxu1 %v1754_v36  ;;  %v1777_v36 = vld [vmem:[%s2166_s5 + $0x18] sm:$0xff]  }
  0x2f   : > { %1623 = vmatprep.subr.bf16.mxu1 %v1806_v1 }
  0x30   : > { %1604 = vmatpush3.bf16.msra.mxu0 %v1744_v26  ;;  %v1768_v26 = vld [vmem:[%s2164_s3 + $0x90] sm:$0xff]  }
  0x31   : > { %1605 = vmatprep.subr.bf16.mxu0 %v1806_v1 }
  0x32   : > { %1624 = vmatpush3.bf16.msra.mxu1 %v1756_v38  ;;  %v1779_v38 = vld [vmem:[%s2166_s5 + $0x28] sm:$0xff]  }
  0x33   : > { %1625 = vmatprep.subr.bf16.mxu1 %v1806_v1 }
  0x34   : > { %1606 = vmatpush3.bf16.msra.mxu0 %v1745_v27  ;;  %v1769_v27 = vld [vmem:[%s2164_s3 + $0x98] sm:$0xff]  }
  0x35   : > { %1607 = vmatprep.subr.bf16.mxu0 %v1806_v1 }
  0x36   : > { %1626 = vmatpush3.bf16.msra.mxu1 %v1758_v40  ;;  %v1781_v40 = vld [vmem:[%s2166_s5 + $0x38] sm:$0xff]  }
  0x37   : > { %1627 = vmatprep.subr.bf16.mxu1 %v1806_v1 }
  0x38   : > { %1608 = vmatpush3.bf16.msra.mxu0 %v1746_v28  ;;  %v1770_v28 = vld [vmem:[%s2164_s3 + $0xa0] sm:$0xff]  }
  0x39   : > { %1609 = vmatprep.subr.bf16.mxu0 %v1806_v1 }
  0x3a   : > { %1628 = vmatpush3.bf16.msra.mxu1 %v1760_v43 }
  0x3b   : > { %1629 = vmatprep.subr.bf16.mxu1 %v1806_v1 }
  0x3c   : > { %1610 = vmatpush3.bf16.msra.mxu0 %v1747_v29  ;;  %v1771_v29 = vld [vmem:[%s2164_s3 + $0xa8] sm:$0xff]  }
  0x3d   : > { %1611 = vmatprep.subr.bf16.mxu0 %v1806_v1 }
  0x3e   : > { %1630 = vmatpush3.bf16.msra.mxu1 %v1762_v45 }
  0x3f   : > { %1631 = vmatprep.subr.bf16.mxu1 %v1806_v1 }
  0x40   : > { %1612 = vmatpush3.bf16.msra.mxu0 %v1748_v30  ;;  %v1772_v30 = vld [vmem:[%s2164_s3 + $0xb0] sm:$0xff]  }
  0x41   : > { %1613 = vmatprep.subr.bf16.mxu0 %v1806_v1 }
  0x42   : > { %1632 = vmatpush3.bf16.msra.mxu1 %v1764_v47 }
  0x43   : > { %1633 = vmatprep.subr.bf16.mxu1 %v1806_v1 }
  0x44   : > { %1614 = vmatpush3.bf16.msra.mxu0 %v1749_v31  ;;  %v1773_v31 = vld [vmem:[%s2164_s3 + $0xb8] sm:$0xff]  }
  0x45   : > { %1639 = vmatprep.subr.bf16.mxu0 %v1806_v1 }
  0x46   : > { %1634 = vmatpush3.bf16.msra.mxu1 %v1765_v48 }
  0x47   : > { %1616 = vmatmul.mubr.bf16.vlgmr.msra.gmra.mrb[4].mxu0 %v643_v32  ;;  %1659 = vmatprep.subr.bf16.mxu1 %v1806_v1 }
  0x48   : > { %1655 = vmatprep.mubr.msk.bf16.mxu0 %vm1807_vm0, %v1806_v1  ;;  %1640 = vmatpush3.bf16.msra.mxu0 %v1750_v33  ;;  %v1774_v33 = vld [vmem:[%s2166_s5] sm:$0xff]  }
  0x49   : > { %1641 = vmatprep.subr.bf16.mxu0 %v1806_v1 }
  0x4c   : > { %1642 = vmatpush3.bf16.msra.mxu0 %v1751_v35  ;;  %v1776_v35 = vld [vmem:[%s2166_s5 + $0x10] sm:$0xff]  }
  0x4d   : > { %1643 = vmatprep.subr.bf16.mxu0 %v1806_v1 }
  0x50   : > { %1644 = vmatpush3.bf16.msra.mxu0 %v1753_v37  ;;  %v1778_v37 = vld [vmem:[%s2166_s5 + $0x20] sm:$0xff]  }
  0x51   : > { %1645 = vmatprep.subr.bf16.mxu0 %v1806_v1 }
  0x54   : > { %1646 = vmatpush3.bf16.msra.mxu0 %v1755_v39  ;;  %v1780_v39 = vld [vmem:[%s2166_s5 + $0x30] sm:$0xff]  }
  0x55   : > { %1647 = vmatprep.subr.bf16.mxu0 %v1806_v1 }
  0x58   : > { %1648 = vmatpush3.bf16.msra.mxu0 %v1757_v41 }
  0x59   : > { %1649 = vmatprep.subr.bf16.mxu0 %v1806_v1 }
  0x5c   : > { %1650 = vmatpush3.bf16.msra.mxu0 %v1759_v42 }
  0x5d   : > { %1651 = vmatprep.subr.bf16.mxu0 %v1806_v1 }
  0x60   : > { %1652 = vmatpush3.bf16.msra.mxu0 %v1761_v44 }
  0x61   : > { %1653 = vmatprep.subr.bf16.mxu0 %v1806_v1 }
  0x64   : > { %1654 = vmatpush3.bf16.msra.mxu0 %v1763_v46 }
  0x65   : > { %1679 = vmatprep.subr.bf16.mxu0 %v1806_v1 }
  0xfa   : > { %v529_v49 = vpop.f32.mrb[0].mxu0 }
  0xfb   : > { %v619_v50 = vpop.f32.mrb[0].mxu1  ;;  %v1577_v51 = vpop.f32.mrb[1].mxu0 }
  0xfc   : > { %v620_v52 = vadd.f32 %v619_v50, %v529_v49  ;;  %v1597_v53 = vpop.f32.mrb[1].mxu1  ;;  %v532_v54 = vpop.f32.mrb[2].mxu0  ;;  %v1103_v50 = vunpack.c.l.bf16 %v1929_v11  ;;  %v1104_v51 = vunpack.c.l.bf16 %v1931_v12 }
  0xfd   : > { %v622_v55 = vpop.f32.mrb[2].mxu1  ;;  %v1578_v56 = vpop.f32.mrb[3].mxu0 }
  0xfe   : > { %v623_v57 = vadd.f32 %v622_v55, %v532_v54  ;;  %v1598_v58 = vpop.f32.mrb[3].mxu1  ;;  %v1483_v54 = vld [vmem:[%s2165_s4] ss:$0 sm:$0xff] }
 0x11a   : > { %v727_v62 = vpop.f32.mrb[4].mxu0 }
 0x11b   : > { %v734_v0 = vadd.f32 %v727_v62, %v620_v52  ;;  %v1617_v2 = vpop.f32.mrb[5].mxu0  ;;  %v1109_v52 = vrot.slane %v1104_v51, 2 }
 0x11c   : > { %v730_v3 = vpop.f32.mrb[6].mxu0 }
 0x11d   : > { %v743_v5 = vadd.f32 %v1423_v63, %v734_v0  ;;  %v735_v6 = vadd.f32 %v730_v3, %v623_v57  ;;  %v1618_v7 = vpop.f32.mrb[7].mxu0 }
 0x11f   : > { %vm745_vm1 = vcmp.gt.f32.partialorder %v743_v5, 0.0  ;;  %v747_v9 = vmul.f32 0.01, %v743_v5  ;;  %v744_v10 = vadd.f32 %v1423_v63, %v735_v6  ;;  %v1225_v63 = vld [vmem:[%s383_s26] sm:$0xff] }
 0x121   : > { %v749_v13 = vsel %vm745_vm1, %v743_v5, %v747_v9  ;;  %vm746_vm3 = vcmp.gt.f32.partialorder %v744_v10, 0.0  ;;  %v748_v14 = vmul.f32 0.01, %v744_v10 }
 0x122   : > { %v766_v17 = vsel %vm756_vm4, %v749_v13, 0.0 }
 0x123   : > { %v750_v15 = vsel %vm746_vm3, %v744_v10, %v748_v14 }
 0x124   : > { %v1457_v16 = vpack.c.bf16 %v750_v15, %v749_v13  ;;  %v767_v18 = vsel %vm759_vm2, %v750_v15, 0.0 }
 0x125   : > { %v768_v19 = vpack.c.bf16 %v767_v18, %v766_v17 }
 0x126   : > { %1656 = vmatmul.mubr.msk.bf16.vlgmr.msra.gmra.mrb[8].mxu0 %vm1456_vm5, %v1457_v16 }
 0x127   : > { %v805_v20 = vshll.u32 %v768_v19, 16  ;;  %1695 = vmatprep.mubr.msk.bf16.mxu0 %vm1807_vm0, %v1806_v1  ;;  %v803_v21 = vshrl.u32 %v768_v19, 16  ;;  %v1004_v32 = vrot.slane %v768_v19, 1  ;;  %1680 = vmatpush3.bf16.msra.mxu0 %v1774_v33 }
 0x128   : > { %1681 = vmatprep.subr.bf16.mxu0 %v1806_v1 }
 0x129   : > { %v807_v22 = vrot.slane %v805_v20, 1 }
 0x12b   : > { %v808_v24 = vor.u32 %v807_v22, %v803_v21  ;;  %1682 = vmatpush3.bf16.msra.mxu0 %v1775_v34 }
 0x12c   : > { %1683 = vmatprep.subr.bf16.mxu0 %v1806_v1 }
 0x12d   : > { %1636 = vmatmul.mubr.bf16.vlgmr.msra.gmra.mrb[4].mxu1 %v808_v24 }
 0x12e   : > { %1660 = vmatpush3.bf16.msra.mxu1 %v1766_v23  ;;  %1675 = vmatprep.mubr.msk.bf16.mxu1 %vm1807_vm0, %v1806_v1 }
 0x12f   : > { %1661 = vmatprep.subr.bf16.mxu1 %v1806_v1  ;;  %1684 = vmatpush3.bf16.msra.mxu0 %v1776_v35 }
 0x130   : > { %1685 = vmatprep.subr.bf16.mxu0 %v1806_v1 }
 0x132   : > { %1662 = vmatpush3.bf16.msra.mxu1 %v1767_v25 }
 0x133   : > { %1663 = vmatprep.subr.bf16.mxu1 %v1806_v1  ;;  %1686 = vmatpush3.bf16.msra.mxu0 %v1777_v36 }
 0x134   : > { %1687 = vmatprep.subr.bf16.mxu0 %v1806_v1 }
 0x136   : > { %1664 = vmatpush3.bf16.msra.mxu1 %v1768_v26 }
 0x137   : > { %1665 = vmatprep.subr.bf16.mxu1 %v1806_v1  ;;  %1688 = vmatpush3.bf16.msra.mxu0 %v1778_v37 }
 0x138   : > { %1689 = vmatprep.subr.bf16.mxu0 %v1806_v1 }
 0x13a   : > { %1666 = vmatpush3.bf16.msra.mxu1 %v1769_v27 }
 0x13b   : > { %1667 = vmatprep.subr.bf16.mxu1 %v1806_v1  ;;  %1690 = vmatpush3.bf16.msra.mxu0 %v1779_v38 }
 0x13c   : > { %1691 = vmatprep.subr.bf16.mxu0 %v1806_v1 }
 0x13e   : > { %1668 = vmatpush3.bf16.msra.mxu1 %v1770_v28 }
 0x13f   : > { %1669 = vmatprep.subr.bf16.mxu1 %v1806_v1  ;;  %1692 = vmatpush3.bf16.msra.mxu0 %v1780_v39 }
 0x140   : > { %1693 = vmatprep.subr.bf16.mxu0 %v1806_v1 }
 0x142   : > { %1670 = vmatpush3.bf16.msra.mxu1 %v1771_v29 }
 0x143   : > { %1671 = vmatprep.subr.bf16.mxu1 %v1806_v1  ;;  %1694 = vmatpush3.bf16.msra.mxu0 %v1781_v40 }
 0x146   : > { %1672 = vmatpush3.bf16.msra.mxu1 %v1772_v30 }
 0x147   : > { %1673 = vmatprep.subr.bf16.mxu1 %v1806_v1  ;;  %v1108_v1 = vrot.slane %v1103_v50, 2 }
 0x149   : > { %v1110_v57 = vsel %vm1107_vm6, %v1108_v1, %v1109_v52 }
 0x14a   : > { %1674 = vmatpush3.bf16.msra.mxu1 %v1773_v31 }
 0x14d   : > { %1676 = vmatmul.mubr.bf16.vlgmr.msra.gmra.mrb[8].mxu1 %v1004_v32 }
 0x1f9   : > { %v980_v41 = vpop.f32.mrb[8].mxu0 }
 0x1fa   : > { %v1657_v42 = vpop.f32.mrb[9].mxu0 }
 0x1fb   : > { %v983_v43 = vpop.f32.mrb[10].mxu0 }
 0x1fc   : > { %v1658_v44 = vpop.f32.mrb[11].mxu0 }
 0x200   : > { %v892_v45 = vpop.f32.mrb[4].mxu1 }
 0x201   : > { %v981_v46 = vadd.f32 %v980_v41, %v892_v45  ;;  %v1637_v47 = vpop.f32.mrb[5].mxu1 }
 0x202   : > { %v895_v48 = vpop.f32.mrb[6].mxu1 }
 0x203   : > { %v1638_v49 = vpop.f32.mrb[7].mxu1 }
 0x220   : > { %v1088_v53 = vpop.f32.mrb[8].mxu1 }
 0x221   : > { %v1094_v55 = vadd.f32 %v1088_v53, %v981_v46  ;;  %v1677_v56 = vpop.f32.mrb[9].mxu1 }
 0x222   : > { %v1091_v58 = vpop.f32.mrb[10].mxu1 }
 0x223   : > { %v1102_v59 = vadd.f32 %v1483_v54, %v1094_v55  ;;  %v1678_v60 = vpop.f32.mrb[11].mxu1 }
 0x225   : > { %v1112_v11 = vadd.f32 %v1110_v57, %v1102_v59 }
 0x227   : > { %v1113_v12 = vpack.c.bf16 %v1112_v11, %v1112_v11 }
 0x229   : > { %1227 = vst [vmem:[%s390_s23] sm:$0xf] %v1113_v12  ;;  %1696 = vmatmul.mubr.bf16.vlgmr.msra.gmra.mrb[12].mxu0 %v1113_v12 }
 0x2fc   : > { %v1219_v62 = vpop.f32.mrb[12].mxu0 }
 0x2fd   : > { %v1220_v0 = vadd.f32 %v1484_v61, %v1219_v62  ;;  %v1697_v2 = vpop.f32.mrb[13].mxu0 }
 0x2fe   : > { %v1222_v3 = vpop.f32.mrb[14].mxu0 }
 0x2ff   : > { %v1226_v4 = vadd.f32 %v1225_v63, %v1220_v0  ;;  %v1698_v5 = vpop.f32.mrb[15].mxu0 }
 0x301   : > { %1228 = vst [vmem:[%s397_s14] sm:$0xff] %v1226_v4 }
 0x302 PF: > { %s20_s11 = sadd.s32 1, %s1804_s11   ;;  %s2171_s30 = smov %s1800_s10 }
 0x303   : > { %p17_p5 = scmp.ge.s32.totalorder %s20_s11, 4   ;;  %s2172_s10 = smov %s2174_s12 }
 0x305   :  { %19 = sbr.rel (!%p17_p5) target bundleno = 2 (0x2), region = 101 }

// kernel: g_forward.8
= control target key start
LH: loop header
LB: loop body
LE: loop exit
PB: predicated region body
PF: predicated region fallthrough
CT: control target
= control target key end

     0   :  { %s1766_s27 = smov 0   ;;  %s1768_s28 = smov 0   ;;  %s2065_s0 = inlined_call_operand.vmem [shape: bf16[2,12,128], index: 0, kind: input, shape index: {}]   ;;  %s2066_s1 = inlined_call_operand.vmem [shape: bf16[3,128,128], index: 1, kind: input, shape index: {}]   ;;  %s2067_s2 = inlined_call_operand.vmem [shape: f32[1,128], index: 2, kind: input, shape index: {}]   ;;  %s2068_s3 = inlined_call_operand.vmem [shape: bf16[3,128,128], index: 3, kind: input, shape index: {}]   ;;  %s2069_s4 = inlined_call_operand.vmem [shape: f32[1,128], index: 4, kind: input, shape index: {}]   ;;  %s2070_s5 = inlined_call_operand.vmem [shape: bf16[128,128], index: 5, kind: input, shape index: {}]   ;;  %s2071_s6 = inlined_call_operand.vmem [shape: f32[1,128], index: 6, kind: input, shape index: {}]   ;;  %s2072_s7 = inlined_call_operand.vmem [shape: f32[2,8,128], index: 7, kind: input, shape index: {}]   ;;  %s2073_s8 = inlined_call_operand.vmem [shape: bf16[2,8,128], index: 8, kind: output, shape index: {}]  }
   0x1   :  { %s1770_s29 = smov 0  }
   0x2 LB: > { %s30_s30 = sadd.s32 1, %s1713_s28  ;;  %p1274_p0 = scmp.ge.s32.totalorder %s1717_s29, 1  ;;  %s1717_s29 = sphi %s1770_s29, %s18_s29   ;;  %s1713_s28 = sphi %s1768_s28, %s2075_s28   ;;  %s1709_s27 = sphi %s1766_s27, %s2074_s27  }
   0x3   : > { %p32_p1 = scmp.ge.s32.totalorder %s30_s30, 2  ;;  %p290_p2 = scmp.lt.s32.totalorder %s1717_s29, 3 }
   0x5   : > { %s2077_s30 = smov (%p32_p1, %s30_s30), 0  ;;  %p291_p3 = pnand %p1274_p0, %p290_p2 }
   0x6   : > { %v1638_v0 = vld [vmem:[%s2066_s1 + $0x40] sm:$0xff] (!%p291_p3)   ;;  %v1719_v1 = vmov (!%p291_p3), 0.0   ;;  %v1640_v3 = vld [vmem:[%s2066_s1 + $0x48] sm:$0xff] (!%p291_p3)   ;;  %vm1720_vm0 = vmmov (!%p291_p3), 0   ;;  %p333_p4 = scmp.lt.s32.totalorder (!%p291_p3), %s1709_s27, 1  ;;  %v1642_v5 = vld [vmem:[%s2066_s1 + $0x50] sm:$0xff] (!%p291_p3)   ;;  %v705_v59 = vlaneseq (!%p291_p3) }
   0x7   : > { %294 = sbr.rel (%p291_p3) target bundleno = 774 (0x306), region = 52  ;;  %1472 = vmatprep.subr.bf16.mxu0 (!%p291_p3), %v1719_v1  ;;  %1492 = vmatprep.subr.bf16.mxu1 (!%p291_p3), %v1719_v1  ;;  %v1639_v2 = vld [vmem:[%s2066_s1] sm:$0xff] (!%p291_p3)   ;;  %v1641_v4 = vld [vmem:[%s2066_s1 + $0x8] sm:$0xff] (!%p291_p3)   ;;  %v1643_v6 = vld [vmem:[%s2066_s1 + $0x10] sm:$0xff] (!%p291_p3)   ;;  %vm1061_vm6 = vcmask (!%p291_p3), 1045504  }
   0x8   : > { %1473 = vmatpush3.bf16.msra.mxu0 (!%p291_p3), %v1638_v0  ;;  %1488 = vmatprep.mubr.msk.bf16.mxu0 (!%p291_p3), %vm1720_vm0, %v1719_v1  ;;  %v1644_v7 = vld [vmem:[%s2066_s1 + $0x58] sm:$0xff] (!%p291_p3)   ;;  %v1646_v9 = vld [vmem:[%s2066_s1 + $0x60] sm:$0xff] (!%p291_p3)   ;;  %v1648_v14 = vld [vmem:[%s2066_s1 + $0x68] sm:$0xff] (!%p291_p3)   ;;  %v706_v60 = vshrl.u32 (!%p291_p3), %v705_v59, 7 }
   0x9   : > { %1493 = vmatpush3.bf16.msra.mxu1 (!%p291_p3), %v1639_v2  ;;  %1474 = vmatprep.subr.bf16.mxu0 (!%p291_p3), %v1719_v1  ;;  %v1645_v8 = vld [vmem:[%s2066_s1 + $0x18] sm:$0xff] (!%p291_p3)   ;;  %v1647_v10 = vld [vmem:[%s2066_s1 + $0x20] sm:$0xff] (!%p291_p3)   ;;  %v1649_v15 = vld [vmem:[%s2066_s1 + $0x28] sm:$0xff] (!%p291_p3)  }
   0xa   : > { %1494 = vmatprep.subr.bf16.mxu1 (!%p291_p3), %v1719_v1  ;;  %1508 = vmatprep.mubr.msk.bf16.mxu1 (!%p291_p3), %vm1720_vm0, %v1719_v1  ;;  %v1650_v17 = vld [vmem:[%s2066_s1 + $0x70] sm:$0xff] (!%p291_p3)   ;;  %v1652_v19 = vld [vmem:[%s2066_s1 + $0x78] sm:$0xff] (!%p291_p3)   ;;  %v1655_v23 = vld [vmem:[%s2066_s1 + $0x80] sm:$0xff] (!%p291_p3)   ;;  %v707_v61 = vadd.s32 (!%p291_p3), 8, %v706_v60 }
   0xb   : > { %v1651_v18 = vld [vmem:[%s2066_s1 + $0x30] sm:$0xff] (!%p291_p3)   ;;  %v1653_v22 = vld [vmem:[%s2066_s1 + $0x38] sm:$0xff] (!%p291_p3)   ;;  %v1656_v25 = vld [vmem:[%s2066_s1 + $0x88] sm:$0xff] (!%p291_p3)  }
   0xc   : > { %1475 = vmatpush3.bf16.msra.mxu0 (!%p291_p3), %v1640_v3  ;;  %v1657_v26 = vld [vmem:[%s2066_s1 + $0x90] sm:$0xff] (!%p291_p3)   ;;  %v1658_v27 = vld [vmem:[%s2066_s1 + $0x98] sm:$0xff] (!%p291_p3)   ;;  %v1659_v28 = vld [vmem:[%s2066_s1 + $0xa0] sm:$0xff] (!%p291_p3)  }
   0xd   : > { %1495 = vmatpush3.bf16.msra.mxu1 (!%p291_p3), %v1641_v4  ;;  %1476 = vmatprep.subr.bf16.mxu0 (!%p291_p3), %v1719_v1  ;;  %v1660_v29 = vld [vmem:[%s2066_s1 + $0xa8] sm:$0xff] (!%p291_p3)   ;;  %v1661_v30 = vld [vmem:[%s2066_s1 + $0xb0] sm:$0xff] (!%p291_p3)   ;;  %v1662_v31 = vld [vmem:[%s2066_s1 + $0xb8] sm:$0xff] (!%p291_p3)   ;;  %v709_v4 = vadd.s32 (!%p291_p3), 4294967295, %v707_v61 }
   0xe   : > { %s2079_s27 = smov (!%p333_p4, %s1709_s27), 1  ;;  %1496 = vmatprep.subr.bf16.mxu1 %v1719_v1  ;;  %v1663_v33 = vld [vmem:[%s2068_s3] sm:$0xff]   ;;  %v1664_v35 = vld [vmem:[%s2068_s3 + $0x8] sm:$0xff]   ;;  %v1666_v37 = vld [vmem:[%s2068_s3 + $0x10] sm:$0xff]  }
   0xf   : > { %s1408_s23 = sshll.u32 %s2079_s27, 3  ;;  %v1665_v34 = vld [vmem:[%s2068_s3 + $0x40] sm:$0xff]   ;;  %v1667_v36 = vld [vmem:[%s2068_s3 + $0x48] sm:$0xff]   ;;  %v1669_v38 = vld [vmem:[%s2068_s3 + $0x50] sm:$0xff]   ;;  %vm713_vm2 = vcmp.lt.s32.totalorder %v709_v4, 8  ;;  %s1278_s14 = sshll.u32 %s2079_s27, 2 }
  0x10   : > { %1477 = vmatpush3.bf16.msra.mxu0 %v1642_v5  ;;  %s337_s10 = scalar_lea.vmem %s2065_s0, %s1408_s23  ;;  %v1668_v39 = vld [vmem:[%s2068_s3 + $0x18] sm:$0xff]   ;;  %v1670_v41 = vld [vmem:[%s2068_s3 + $0x20] sm:$0xff]   ;;  %v1672_v42 = vld [vmem:[%s2068_s3 + $0x28] sm:$0xff]   ;;  %s344_s11 = scalar_lea.vmem %s2072_s7, %s1408_s23 }
  0x11   : > { %1497 = vmatpush3.bf16.msra.mxu1 %v1643_v6  ;;  %1478 = vmatprep.subr.bf16.mxu0 %v1719_v1  ;;  %v1836_v11 = vld [vmem:[%s337_s10] sm:$0xf]  ;;  %v1838_v12 = vld [vmem:[%s337_s10 + $0x4] sm:$0x3]  ;;  %v1671_v40 = vld [vmem:[%s2068_s3 + $0x58] sm:$0xff]   ;;  %s351_s17 = scalar_lea.vmem %s2073_s8, %s1278_s14 }
  0x12   : > { %1498 = vmatprep.subr.bf16.mxu1 %v1719_v1  ;;  %v1295_v13 = vcombine.low %v1836_v11, %v1838_v12  ;;  %v1673_v43 = vld [vmem:[%s2068_s3 + $0x60] sm:$0xff]   ;;  %v1674_v44 = vld [vmem:[%s2068_s3 + $0x30] sm:$0xff]   ;;  %v1675_v45 = vld [vmem:[%s2068_s3 + $0x68] sm:$0xff]  }
  0x13   : > { %v1676_v46 = vld [vmem:[%s2068_s3 + $0x38] sm:$0xff]   ;;  %v1677_v47 = vld [vmem:[%s2068_s3 + $0x70] sm:$0xff]   ;;  %v1336_v63 = vld [vmem:[%s2067_s2] ss:$0 sm:$0xff] }
  0x14   : > { %1479 = vmatpush3.bf16.msra.mxu0 %v1644_v7  ;;  %v396_v16 = vshll.u32 %v1295_v13, 16  ;;  %v394_v20 = vshrl.u32 %v1295_v13, 16  ;;  %v597_v32 = vrot.slane %v1295_v13, 1  ;;  %v1678_v48 = vld [vmem:[%s2068_s3 + $0x78] sm:$0xff]  }
  0x15   : > { %1499 = vmatpush3.bf16.msra.mxu1 %v1645_v8  ;;  %1480 = vmatprep.subr.bf16.mxu0 %v1719_v1  ;;  %v708_v8 = vadd.s32 4294967295, %v706_v60 }
  0x16   : > { %1500 = vmatprep.subr.bf16.mxu1 %v1719_v1  ;;  %v398_v21 = vrot.slane %v396_v16, 1 }
  0x17   : > { %vm710_vm4 = vcmp.ge.s32.totalorder %v708_v8, 0 }
  0x18   : > { %1481 = vmatpush3.bf16.msra.mxu0 %v1646_v9  ;;  %v399_v24 = vor.u32 %v398_v21, %v394_v20  ;;  %vm1369_vm5 = vmpackc.low %vm713_vm2, %vm710_vm4 }
  0x19   : > { %1501 = vmatpush3.bf16.msra.mxu1 %v1647_v10  ;;  %1482 = vmatprep.subr.bf16.mxu0 %v1719_v1 }
  0x1a   : > { %1502 = vmatprep.subr.bf16.mxu1 %v1719_v1 }
  0x1c   : > { %1483 = vmatpush3.bf16.msra.mxu0 %v1648_v14 }
  0x1d   : > { %1503 = vmatpush3.bf16.msra.mxu1 %v1649_v15  ;;  %1484 = vmatprep.subr.bf16.mxu0 %v1719_v1 }
  0x1e   : > { %1504 = vmatprep.subr.bf16.mxu1 %v1719_v1 }
  0x20   : > { %1485 = vmatpush3.bf16.msra.mxu0 %v1650_v17 }
  0x21   : > { %1505 = vmatpush3.bf16.msra.mxu1 %v1651_v18  ;;  %1486 = vmatprep.subr.bf16.mxu0 %v1719_v1 }
  0x22   : > { %1506 = vmatprep.subr.bf16.mxu1 %v1719_v1 }
  0x24   : > { %1487 = vmatpush3.bf16.msra.mxu0 %v1652_v19 }
  0x25   : > { %1507 = vmatpush3.bf16.msra.mxu1 %v1653_v22  ;;  %1512 = vmatprep.subr.bf16.mxu0 %v1719_v1 }
  0x26   : > { %1532 = vmatprep.subr.bf16.mxu1 %v1719_v1 }
  0x27   : > { %1489 = vmatmul.mubr.bf16.vlgmr.msra.gmra.mrb[0].mxu0 %v399_v24 }
  0x28   : > { %1509 = vmatmul.mubr.bf16.vlgmr.msra.gmra.mrb[0].mxu1 %v1295_v13  ;;  %1513 = vmatpush3.bf16.msra.mxu0 %v1655_v23  ;;  %v1679_v23 = vld [vmem:[%s2068_s3 + $0x80] sm:$0xff]  }
  0x29   : > { %1514 = vmatprep.subr.bf16.mxu0 %v1719_v1  ;;  %1528 = vmatprep.mubr.msk.bf16.mxu0 %vm1720_vm0, %v1719_v1 }
  0x2a   : > { %1548 = vmatprep.mubr.msk.bf16.mxu1 %vm1720_vm0, %v1719_v1  ;;  %1533 = vmatpush3.bf16.msra.mxu1 %v1665_v34  ;;  %v1688_v34 = vld [vmem:[%s2070_s5 + $0x8] sm:$0xff]  }
  0x2b   : > { %1534 = vmatprep.subr.bf16.mxu1 %v1719_v1 }
  0x2c   : > { %1515 = vmatpush3.bf16.msra.mxu0 %v1656_v25  ;;  %v1680_v25 = vld [vmem:[%s2068_s3 + $0x88] sm:$0xff]  }
  0x2d   : > { %1516 = vmatprep.subr.bf16.mxu0 %v1719_v1 }
  0x2e   : > { %1535 = vmatpush3.bf16.msra.mxu1 %v1667_v36  ;;  %v1690_v36 = vld [vmem:[%s2070_s5 + $0x18] sm:$0xff]  }
  0x2f   : > { %1536 = vmatprep.subr.bf16.mxu1 %v1719_v1 }
  0x30   : > { %1517 = vmatpush3.bf16.msra.mxu0 %v1657_v26  ;;  %v1681_v26 = vld [vmem:[%s2068_s3 + $0x90] sm:$0xff]  }
  0x31   : > { %1518 = vmatprep.subr.bf16.mxu0 %v1719_v1 }
  0x32   : > { %1537 = vmatpush3.bf16.msra.mxu1 %v1669_v38  ;;  %v1692_v38 = vld [vmem:[%s2070_s5 + $0x28] sm:$0xff]  }
  0x33   : > { %1538 = vmatprep.subr.bf16.mxu1 %v1719_v1 }
  0x34   : > { %1519 = vmatpush3.bf16.msra.mxu0 %v1658_v27  ;;  %v1682_v27 = vld [vmem:[%s2068_s3 + $0x98] sm:$0xff]  }
  0x35   : > { %1520 = vmatprep.subr.bf16.mxu0 %v1719_v1 }
  0x36   : > { %1539 = vmatpush3.bf16.msra.mxu1 %v1671_v40  ;;  %v1694_v40 = vld [vmem:[%s2070_s5 + $0x38] sm:$0xff]  }
  0x37   : > { %1540 = vmatprep.subr.bf16.mxu1 %v1719_v1 }
  0x38   : > { %1521 = vmatpush3.bf16.msra.mxu0 %v1659_v28  ;;  %v1683_v28 = vld [vmem:[%s2068_s3 + $0xa0] sm:$0xff]  }
  0x39   : > { %1522 = vmatprep.subr.bf16.mxu0 %v1719_v1 }
  0x3a   : > { %1541 = vmatpush3.bf16.msra.mxu1 %v1673_v43 }
  0x3b   : > { %1542 = vmatprep.subr.bf16.mxu1 %v1719_v1 }
  0x3c   : > { %1523 = vmatpush3.bf16.msra.mxu0 %v1660_v29  ;;  %v1684_v29 = vld [vmem:[%s2068_s3 + $0xa8] sm:$0xff]  }
  0x3d   : > { %1524 = vmatprep.subr.bf16.mxu0 %v1719_v1 }
  0x3e   : > { %1543 = vmatpush3.bf16.msra.mxu1 %v1675_v45 }
  0x3f   : > { %1544 = vmatprep.subr.bf16.mxu1 %v1719_v1 }
  0x40   : > { %1525 = vmatpush3.bf16.msra.mxu0 %v1661_v30  ;;  %v1685_v30 = vld [vmem:[%s2068_s3 + $0xb0] sm:$0xff]  }
  0x41   : > { %1526 = vmatprep.subr.bf16.mxu0 %v1719_v1 }
  0x42   : > { %1545 = vmatpush3.bf16.msra.mxu1 %v1677_v47 }
  0x43   : > { %1546 = vmatprep.subr.bf16.mxu1 %v1719_v1 }
  0x44   : > { %1527 = vmatpush3.bf16.msra.mxu0 %v1662_v31  ;;  %v1686_v31 = vld [vmem:[%s2068_s3 + $0xb8] sm:$0xff]  }
  0x45   : > { %1552 = vmatprep.subr.bf16.mxu0 %v1719_v1 }
  0x46   : > { %1547 = vmatpush3.bf16.msra.mxu1 %v1678_v48 }
  0x47   : > { %1529 = vmatmul.mubr.bf16.vlgmr.msra.gmra.mrb[4].mxu0 %v597_v32  ;;  %1572 = vmatprep.subr.bf16.mxu1 %v1719_v1 }
  0x48   : > { %1568 = vmatprep.mubr.msk.bf16.mxu0 %vm1720_vm0, %v1719_v1  ;;  %1553 = vmatpush3.bf16.msra.mxu0 %v1663_v33  ;;  %v1687_v33 = vld [vmem:[%s2070_s5] sm:$0xff]  }
  0x49   : > { %1554 = vmatprep.subr.bf16.mxu0 %v1719_v1 }
  0x4c   : > { %1555 = vmatpush3.bf16.msra.mxu0 %v1664_v35  ;;  %v1689_v35 = vld [vmem:[%s2070_s5 + $0x10] sm:$0xff]  }
  0x4d   : > { %1556 = vmatprep.subr.bf16.mxu0 %v1719_v1 }
  0x50   : > { %1557 = vmatpush3.bf16.msra.mxu0 %v1666_v37  ;;  %v1691_v37 = vld [vmem:[%s2070_s5 + $0x20] sm:$0xff]  }
  0x51   : > { %1558 = vmatprep.subr.bf16.mxu0 %v1719_v1 }
  0x54   : > { %1559 = vmatpush3.bf16.msra.mxu0 %v1668_v39  ;;  %v1693_v39 = vld [vmem:[%s2070_s5 + $0x30] sm:$0xff]  }
  0x55   : > { %1560 = vmatprep.subr.bf16.mxu0 %v1719_v1 }
  0x58   : > { %1561 = vmatpush3.bf16.msra.mxu0 %v1670_v41 }
  0x59   : > { %1562 = vmatprep.subr.bf16.mxu0 %v1719_v1 }
  0x5c   : > { %1563 = vmatpush3.bf16.msra.mxu0 %v1672_v42 }
  0x5d   : > { %1564 = vmatprep.subr.bf16.mxu0 %v1719_v1 }
  0x60   : > { %1565 = vmatpush3.bf16.msra.mxu0 %v1674_v44 }
  0x61   : > { %1566 = vmatprep.subr.bf16.mxu0 %v1719_v1 }
  0x64   : > { %1567 = vmatpush3.bf16.msra.mxu0 %v1676_v46 }
  0x65   : > { %1592 = vmatprep.subr.bf16.mxu0 %v1719_v1 }
  0xfa   : > { %v483_v49 = vpop.f32.mrb[0].mxu0 }
  0xfb   : > { %v573_v50 = vpop.f32.mrb[0].mxu1  ;;  %v1490_v51 = vpop.f32.mrb[1].mxu0 }
  0xfc   : > { %v574_v52 = vadd.f32 %v573_v50, %v483_v49  ;;  %v1510_v53 = vpop.f32.mrb[1].mxu1  ;;  %v486_v54 = vpop.f32.mrb[2].mxu0  ;;  %v1057_v50 = vunpack.c.l.bf16 %v1836_v11  ;;  %v1058_v51 = vunpack.c.l.bf16 %v1838_v12  ;;  %v1397_v12 = vld [vmem:[%s2071_s6] ss:$0 sm:$0xff] }
  0xfd   : > { %v576_v55 = vpop.f32.mrb[2].mxu1  ;;  %v1491_v56 = vpop.f32.mrb[3].mxu0 }
  0xfe   : > { %v577_v57 = vadd.f32 %v576_v55, %v486_v54  ;;  %v1511_v58 = vpop.f32.mrb[3].mxu1  ;;  %v1396_v54 = vld [vmem:[%s2069_s4] ss:$0 sm:$0xff] }
 0x11a   : > { %v681_v62 = vpop.f32.mrb[4].mxu0 }
 0x11b   : > { %v688_v0 = vadd.f32 %v681_v62, %v574_v52  ;;  %v1530_v2 = vpop.f32.mrb[5].mxu0  ;;  %v1063_v52 = vrot.slane %v1058_v51, 2 }
 0x11c   : > { %v684_v3 = vpop.f32.mrb[6].mxu0 }
 0x11d   : > { %v697_v5 = vadd.f32 %v1336_v63, %v688_v0  ;;  %v689_v6 = vadd.f32 %v684_v3, %v577_v57  ;;  %v1531_v7 = vpop.f32.mrb[7].mxu0 }
 0x11f   : > { %vm699_vm1 = vcmp.gt.f32.partialorder %v697_v5, 0.0  ;;  %v701_v9 = vmul.f32 0.01, %v697_v5  ;;  %v698_v10 = vadd.f32 %v1336_v63, %v689_v6  ;;  %v1179_v63 = vld [vmem:[%s344_s11] sm:$0xff] }
 0x121   : > { %v703_v13 = vsel %vm699_vm1, %v697_v5, %v701_v9  ;;  %vm700_vm3 = vcmp.gt.f32.partialorder %v698_v10, 0.0  ;;  %v702_v14 = vmul.f32 0.01, %v698_v10 }
 0x122   : > { %v720_v17 = vsel %vm710_vm4, %v703_v13, 0.0 }
 0x123   : > { %v704_v15 = vsel %vm700_vm3, %v698_v10, %v702_v14 }
 0x124   : > { %v1370_v16 = vpack.c.bf16 %v704_v15, %v703_v13  ;;  %v721_v18 = vsel %vm713_vm2, %v704_v15, 0.0 }
 0x125   : > { %v722_v19 = vpack.c.bf16 %v721_v18, %v720_v17 }
 0x126   : > { %1569 = vmatmul.mubr.msk.bf16.vlgmr.msra.gmra.mrb[8].mxu0 %vm1369_vm5, %v1370_v16 }
 0x127   : > { %v759_v20 = vshll.u32 %v722_v19, 16  ;;  %1608 = vmatprep.mubr.msk.bf16.mxu0 %vm1720_vm0, %v1719_v1  ;;  %v757_v21 = vshrl.u32 %v722_v19, 16  ;;  %v958_v32 = vrot.slane %v722_v19, 1  ;;  %1593 = vmatpush3.bf16.msra.mxu0 %v1687_v33 }
 0x128   : > { %1594 = vmatprep.subr.bf16.mxu0 %v1719_v1 }
 0x129   : > { %v761_v22 = vrot.slane %v759_v20, 1 }
 0x12b   : > { %v762_v24 = vor.u32 %v761_v22, %v757_v21  ;;  %1595 = vmatpush3.bf16.msra.mxu0 %v1688_v34 }
 0x12c   : > { %1596 = vmatprep.subr.bf16.mxu0 %v1719_v1 }
 0x12d   : > { %1549 = vmatmul.mubr.bf16.vlgmr.msra.gmra.mrb[4].mxu1 %v762_v24 }
 0x12e   : > { %1573 = vmatpush3.bf16.msra.mxu1 %v1679_v23  ;;  %1588 = vmatprep.mubr.msk.bf16.mxu1 %vm1720_vm0, %v1719_v1 }
 0x12f   : > { %1574 = vmatprep.subr.bf16.mxu1 %v1719_v1  ;;  %1597 = vmatpush3.bf16.msra.mxu0 %v1689_v35 }
 0x130   : > { %1598 = vmatprep.subr.bf16.mxu0 %v1719_v1 }
 0x132   : > { %1575 = vmatpush3.bf16.msra.mxu1 %v1680_v25 }
 0x133   : > { %1576 = vmatprep.subr.bf16.mxu1 %v1719_v1  ;;  %1599 = vmatpush3.bf16.msra.mxu0 %v1690_v36 }
 0x134   : > { %1600 = vmatprep.subr.bf16.mxu0 %v1719_v1 }
 0x136   : > { %1577 = vmatpush3.bf16.msra.mxu1 %v1681_v26 }
 0x137   : > { %1578 = vmatprep.subr.bf16.mxu1 %v1719_v1  ;;  %1601 = vmatpush3.bf16.msra.mxu0 %v1691_v37 }
 0x138   : > { %1602 = vmatprep.subr.bf16.mxu0 %v1719_v1 }
 0x13a   : > { %1579 = vmatpush3.bf16.msra.mxu1 %v1682_v27 }
 0x13b   : > { %1580 = vmatprep.subr.bf16.mxu1 %v1719_v1  ;;  %1603 = vmatpush3.bf16.msra.mxu0 %v1692_v38 }
 0x13c   : > { %1604 = vmatprep.subr.bf16.mxu0 %v1719_v1 }
 0x13e   : > { %1581 = vmatpush3.bf16.msra.mxu1 %v1683_v28 }
 0x13f   : > { %1582 = vmatprep.subr.bf16.mxu1 %v1719_v1  ;;  %1605 = vmatpush3.bf16.msra.mxu0 %v1693_v39 }
 0x140   : > { %1606 = vmatprep.subr.bf16.mxu0 %v1719_v1 }
 0x142   : > { %1583 = vmatpush3.bf16.msra.mxu1 %v1684_v29 }
 0x143   : > { %1584 = vmatprep.subr.bf16.mxu1 %v1719_v1  ;;  %1607 = vmatpush3.bf16.msra.mxu0 %v1694_v40 }
 0x146   : > { %1585 = vmatpush3.bf16.msra.mxu1 %v1685_v30 }
 0x147   : > { %1586 = vmatprep.subr.bf16.mxu1 %v1719_v1  ;;  %v1062_v1 = vrot.slane %v1057_v50, 2 }
 0x149   : > { %v1064_v57 = vsel %vm1061_vm6, %v1062_v1, %v1063_v52 }
 0x14a   : > { %1587 = vmatpush3.bf16.msra.mxu1 %v1686_v31 }
 0x14d   : > { %1589 = vmatmul.mubr.bf16.vlgmr.msra.gmra.mrb[8].mxu1 %v958_v32 }
 0x1f9   : > { %v934_v41 = vpop.f32.mrb[8].mxu0 }
 0x1fa   : > { %v1570_v42 = vpop.f32.mrb[9].mxu0 }
 0x1fb   : > { %v937_v43 = vpop.f32.mrb[10].mxu0 }
 0x1fc   : > { %v1571_v44 = vpop.f32.mrb[11].mxu0 }
 0x200   : > { %v846_v45 = vpop.f32.mrb[4].mxu1 }
 0x201   : > { %v935_v46 = vadd.f32 %v934_v41, %v846_v45  ;;  %v1550_v47 = vpop.f32.mrb[5].mxu1 }
 0x202   : > { %v849_v48 = vpop.f32.mrb[6].mxu1 }
 0x203   : > { %v1551_v49 = vpop.f32.mrb[7].mxu1 }
 0x220   : > { %v1042_v53 = vpop.f32.mrb[8].mxu1 }
 0x221   : > { %v1048_v55 = vadd.f32 %v1042_v53, %v935_v46  ;;  %v1590_v56 = vpop.f32.mrb[9].mxu1 }
 0x222   : > { %v1045_v58 = vpop.f32.mrb[10].mxu1 }
 0x223   : > { %v1056_v59 = vadd.f32 %v1396_v54, %v1048_v55  ;;  %v1591_v60 = vpop.f32.mrb[11].mxu1 }
 0x225   : > { %v1066_v61 = vadd.f32 %v1064_v57, %v1056_v59 }
 0x227   : > { %v1067_v11 = vpack.c.bf16 %v1066_v61, %v1066_v61 }
 0x229   : > { %1609 = vmatmul.mubr.bf16.vlgmr.msra.gmra.mrb[12].mxu0 %v1067_v11 }
 0x2fc   : > { %v1173_v62 = vpop.f32.mrb[12].mxu0 }
 0x2fd   : > { %v1174_v0 = vadd.f32 %v1397_v12, %v1173_v62  ;;  %v1610_v2 = vpop.f32.mrb[13].mxu0 }
 0x2fe   : > { %v1176_v3 = vpop.f32.mrb[14].mxu0 }
 0x2ff   : > { %v1180_v4 = vadd.f32 %v1179_v63, %v1174_v0  ;;  %v1611_v5 = vpop.f32.mrb[15].mxu0 }
 0x301   : > { %v1181_v6 = vadd.f32 %v1180_v4, %v1066_v61 }
 0x303   : > { %v1182_v7 = vpack.c.bf16 %v1181_v6, %v1181_v6 }
 0x305   : > { %1183 = vst [vmem:[%s351_s17] sm:$0xf] %v1182_v7 }
 0x306 PF: > { %s18_s29 = sadd.s32 1, %s1717_s29   ;;  %s2074_s27 = smov %s1713_s28 }
 0x307   : > { %p15_p5 = scmp.ge.s32.totalorder %s18_s29, 4   ;;  %s2075_s28 = smov %s2077_s30 }
 0x309   :  { %17 = sbr.rel (!%p15_p5) target bundleno = 2 (0x2), region = 89 }

// kernel: tile.88
= control target key start
LH: loop header
LB: loop body
LE: loop exit
PB: predicated region body
PF: predicated region fallthrough
CT: control target
= control target key end

     0   :  { %s22_s0 = inlined_call_operand.vmem [shape: f32[64], index: 0, kind: input, shape index: {}]   ;;  %s23_s1 = inlined_call_operand.vmem [shape: f32[8,64], index: 1, kind: output, shape index: {}]  }
   0x1   :  { %v4_v0 = vld [vmem:[%s22_s0] ss:$0 sm:$0xff] }
   0x2   :  { %5 = vst [vmem:[%s23_s1] sm:$0xff] %v4_v0 }

// kernel: tile.89
= control target key start
LH: loop header
LB: loop body
LE: loop exit
PB: predicated region body
PF: predicated region fallthrough
CT: control target
= control target key end

     0   :  { %vm3_vm0 = vcmask 523264   ;;  %s41_s8 = smov 64   ;;  %vm9_vm1 = vcmask 1048064   ;;  %s70_s0 = inlined_call_operand.vmem [shape: f32[8,64], index: 0, kind: input, shape index: {}]   ;;  %s71_s1 = inlined_call_operand.vmem [shape: f32[1,512], index: 1, kind: output, shape index: {}]  }
   0x1   :  { %v36_v0 = vld [vmem:[%s70_s0 + $0x1] ss:$2 sm:$0xf]   ;;  %v2_v1 = vld [vmem:[%s70_s0] ss:$2 sm:$0xf]  }
   0x2   :  { %7 = vrot.lane.b32.xlu0 %v36_v0, %s41_s8  ;;  %4 = vst.msk [vmem:[#allocation0] ss:$8 sm:$0xf] %vm3_vm0, %v2_v1  }
  0x74   :  { %v8_v2 = vpop.permute.xlu0 %7  }
  0x75   :  { %10 = vst.msk [vmem:[#allocation0] ss:$8 sm:$0xf] %vm9_vm1, %v8_v2  }
  0x7c   :  { %v14_v3 = vld [vmem:[#allocation0] sm:$0x1]  ;;  %v18_v4 = vld [vmem:[#allocation0 + $0x8] sm:$0x1]  ;;  %v23_v5 = vld [vmem:[#allocation0 + $0x10] sm:$0x1] }
  0x7d   :  { %16 = vst [vmem:[%s71_s1] sm:$0x1] %v14_v3  ;;  %37 = vst [vmem:[%s71_s1 + $0x1] sm:$0x1] %v18_v4  ;;  %v29_v6 = vld [vmem:[#allocation0 + $0x18] sm:$0x1] }
  0x7e   :  { %38 = vst [vmem:[%s71_s1 + $0x2] sm:$0x1] %v23_v5  ;;  %39 = vst [vmem:[%s71_s1 + $0x3] sm:$0x1] %v29_v6 }

// kernel: g_forward.9
= control target key start
LH: loop header
LB: loop body
LE: loop exit
PB: predicated region body
PF: predicated region fallthrough
CT: control target
= control target key end

     0   :  { %s1559_s12 = smov 0   ;;  %s1561_s13 = smov 0   ;;  %s1907_s0 = inlined_call_operand.vmem [shape: bf16[2,10,128], index: 0, kind: input, shape index: {}]   ;;  %s1908_s1 = inlined_call_operand.vmem [shape: bf16[3,128,512], index: 1, kind: input, shape index: {}]   ;;  %s1909_s2 = inlined_call_operand.vmem [shape: f32[1,512], index: 2, kind: input, shape index: {}]   ;;  %s1910_s3 = inlined_call_operand.vmem [shape: bf16[2,8,512], index: 3, kind: output, shape index: {}]  }
   0x1   :  { %s1563_s14 = smov 0  }
   0x2 LB: > { %s25_s15 = sadd.s32 1, %s1532_s13  ;;  %p1170_p0 = scmp.ge.s32.totalorder %s1536_s14, 1  ;;  %s1536_s14 = sphi %s1563_s14, %s13_s14   ;;  %s1532_s13 = sphi %s1561_s13, %s1912_s13   ;;  %s1528_s12 = sphi %s1559_s12, %s1911_s12  }
   0x3   : > { %p27_p1 = scmp.ge.s32.totalorder %s25_s15, 2  ;;  %p151_p2 = scmp.lt.s32.totalorder %s1536_s14, 3 }
   0x5   : > { %s1914_s15 = smov (%p27_p1, %s25_s15), 0  ;;  %p152_p3 = pnand %p1170_p0, %p151_p2 }
   0x6   : > { %v1369_v0 = vld [vmem:[%s1908_s1 + $0x104] ss:$16 sps:$4 sm:$0xff] (!%p152_p3)   ;;  %v1371_v1 = vld [vmem:[%s1908_s1 + $0x10c] ss:$16 sps:$4 sm:$0xff] (!%p152_p3)   ;;  %v1538_v2 = vmov (!%p152_p3), 0   ;;  %p179_p4 = scmp.lt.s32.totalorder (!%p152_p3), %s1528_s12, 1 }
   0x7   : > { %155 = sbr.rel (%p152_p3) target bundleno = 324 (0x144), region = 32  ;;  %466 = vmatprep.mubr.bf16.mxu0 (!%p152_p3), %v1538_v2  ;;  %507 = vmatprep.mubr.bf16.mxu1 (!%p152_p3), %v1538_v2  ;;  %v1373_v3 = vld [vmem:[%s1908_s1 + $0x100] ss:$16 sps:$4 sm:$0xff] (!%p152_p3)   ;;  %v1374_v4 = vld [vmem:[%s1908_s1 + $0x108] ss:$16 sps:$4 sm:$0xff] (!%p152_p3)  }
   0x8   : > { %434 = vmatprep.subr.bf16.mxu0 (!%p152_p3), %v1369_v0  ;;  %475 = vmatprep.subr.bf16.mxu1 (!%p152_p3), %v1371_v1  ;;  %v1375_v5 = vld [vmem:[%s1908_s1 + $0x124] ss:$16 sps:$4 sm:$0xff] (!%p152_p3)   ;;  %v1377_v6 = vld [vmem:[%s1908_s1 + $0x12c] ss:$16 sps:$4 sm:$0xff] (!%p152_p3)   ;;  %v1379_v7 = vld [vmem:[%s1908_s1 + $0x120] ss:$16 sps:$4 sm:$0xff] (!%p152_p3)  }
   0x9   : > { %435 = vmatpush1.bf16.msra.mxu0 (!%p152_p3), %v1373_v3  ;;  %476 = vmatpush1.bf16.msra.mxu1 (!%p152_p3), %v1374_v4  ;;  %v1380_v8 = vld [vmem:[%s1908_s1 + $0x128] ss:$16 sps:$4 sm:$0xff] (!%p152_p3)   ;;  %v1381_v9 = vld [vmem:[%s1908_s1 + $0x144] ss:$16 sps:$4 sm:$0xff] (!%p152_p3)   ;;  %v1383_v10 = vld [vmem:[%s1908_s1 + $0x14c] ss:$16 sps:$4 sm:$0xff] (!%p152_p3)  }
   0xa   : > { %436 = vmatprep.subr.bf16.mxu0 (!%p152_p3), %v1375_v5  ;;  %477 = vmatprep.subr.bf16.mxu1 (!%p152_p3), %v1377_v6  ;;  %v1385_v11 = vld [vmem:[%s1908_s1 + $0x140] ss:$16 sps:$4 sm:$0xff] (!%p152_p3)   ;;  %v1386_v12 = vld [vmem:[%s1908_s1 + $0x148] ss:$16 sps:$4 sm:$0xff] (!%p152_p3)   ;;  %v1387_v13 = vld [vmem:[%s1908_s1 + $0x164] ss:$16 sps:$4 sm:$0xff] (!%p152_p3)  }
   0xb   : > { %v1389_v14 = vld [vmem:[%s1908_s1 + $0x16c] ss:$16 sps:$4 sm:$0xff] (!%p152_p3)   ;;  %v1391_v15 = vld [vmem:[%s1908_s1 + $0x160] ss:$16 sps:$4 sm:$0xff] (!%p152_p3)   ;;  %v1392_v16 = vld [vmem:[%s1908_s1 + $0x168] ss:$16 sps:$4 sm:$0xff] (!%p152_p3)  }
   0xc   : > { %v1393_v17 = vld [vmem:[%s1908_s1 + $0x184] ss:$16 sps:$4 sm:$0xff] (!%p152_p3)   ;;  %v1395_v18 = vld [vmem:[%s1908_s1 + $0x18c] ss:$16 sps:$4 sm:$0xff] (!%p152_p3)   ;;  %v1397_v19 = vld [vmem:[%s1908_s1 + $0x180] ss:$16 sps:$4 sm:$0xff] (!%p152_p3)  }
   0xd   : > { %437 = vmatpush1.bf16.msra.mxu0 (!%p152_p3), %v1379_v7  ;;  %478 = vmatpush1.bf16.msra.mxu1 (!%p152_p3), %v1380_v8  ;;  %v1398_v20 = vld [vmem:[%s1908_s1 + $0x188] ss:$16 sps:$4 sm:$0xff] (!%p152_p3)   ;;  %v1399_v21 = vld [vmem:[%s1908_s1 + $0x1a4] ss:$16 sps:$4 sm:$0xff] (!%p152_p3)   ;;  %v1401_v22 = vld [vmem:[%s1908_s1 + $0x1ac] ss:$16 sps:$4 sm:$0xff] (!%p152_p3)  }
   0xe   : > { %438 = vmatprep.subr.bf16.mxu0 %v1381_v9  ;;  %479 = vmatprep.subr.bf16.mxu1 %v1383_v10  ;;  %s1916_s12 = smov (!%p179_p4, %s1528_s12), 1  ;;  %v1403_v23 = vld [vmem:[%s1908_s1 + $0x1a0] ss:$16 sps:$4 sm:$0xff]   ;;  %v1404_v24 = vld [vmem:[%s1908_s1 + $0x1a8] ss:$16 sps:$4 sm:$0xff]  }
   0xf   : > { %s1340_s6 = sshll.u32 %s1916_s12, 3  ;;  %v1405_v25 = vld [vmem:[%s1908_s1 + $0x1c4] ss:$16 sps:$4 sm:$0xff]   ;;  %v1407_v26 = vld [vmem:[%s1908_s1 + $0x1cc] ss:$16 sps:$4 sm:$0xff]   ;;  %s1341_s30 = sshll.u32 %s1916_s12, 4 }
  0x10   : > { %s183_s17 = scalar_lea.vmem %s1907_s0, %s1340_s6  ;;  %v1409_v30 = vld [vmem:[%s1908_s1 + $0x1c0] ss:$16 sps:$4 sm:$0xff]   ;;  %v1410_v31 = vld [vmem:[%s1908_s1 + $0x1c8] ss:$16 sps:$4 sm:$0xff]   ;;  %v1411_v32 = vld [vmem:[%s1908_s1 + $0x1e4] ss:$16 sps:$4 sm:$0xff]   ;;  %s192_s6 = scalar_lea.vmem %s1910_s3, %s1341_s30 }
  0x11   : > { %439 = vmatpush1.bf16.msra.mxu0 %v1385_v11  ;;  %480 = vmatpush1.bf16.msra.mxu1 %v1386_v12  ;;  %v1667_v27 = vld [vmem:[%s183_s17] sm:$0xf]  ;;  %v195_v28 = vld [vmem:[%s183_s17 + $0x4] sm:$0x1]  ;;  %v1413_v34 = vld [vmem:[%s1908_s1 + $0x1ec] ss:$16 sps:$4 sm:$0xff]  }
  0x12   : > { %440 = vmatprep.subr.bf16.mxu0 %v1387_v13  ;;  %481 = vmatprep.subr.bf16.mxu1 %v1389_v14  ;;  %v1670_v29 = vcombine.low %v1667_v27, %v195_v28  ;;  %v1415_v35 = vld [vmem:[%s1908_s1 + $0x1e0] ss:$16 sps:$4 sm:$0xff]   ;;  %v1416_v38 = vld [vmem:[%s1908_s1 + $0x1e8] ss:$16 sps:$4 sm:$0xff]   ;;  %v1420_v39 = vld [vmem:[%s1908_s1 + $0x4] ss:$16 sps:$4 sm:$0xff]  }
  0x13   : > { %v1423_v40 = vld [vmem:[%s1908_s1 + $0xc] ss:$16 sps:$4 sm:$0xff]   ;;  %v1418_v42 = vld [vmem:[%s1908_s1] ss:$16 sps:$4 sm:$0xff]   ;;  %v1421_v43 = vld [vmem:[%s1908_s1 + $0x8] ss:$16 sps:$4 sm:$0xff]  }
  0x14   : > { %v269_v33 = vshll.u32 %v1670_v29, 16  ;;  %v267_v36 = vshrl.u32 %v1670_v29, 16  ;;  %v1426_v44 = vld [vmem:[%s1908_s1 + $0x24] ss:$16 sps:$4 sm:$0xff]   ;;  %v1429_v45 = vld [vmem:[%s1908_s1 + $0x2c] ss:$16 sps:$4 sm:$0xff]  }
  0x15   : > { %441 = vmatpush1.bf16.msra.mxu0 %v1391_v15  ;;  %482 = vmatpush1.bf16.msra.mxu1 %v1392_v16  ;;  %v1424_v46 = vld [vmem:[%s1908_s1 + $0x20] ss:$16 sps:$4 sm:$0xff]   ;;  %v1427_v47 = vld [vmem:[%s1908_s1 + $0x28] ss:$16 sps:$4 sm:$0xff]   ;;  %v1432_v48 = vld [vmem:[%s1908_s1 + $0x44] ss:$16 sps:$4 sm:$0xff]  }
  0x16   : > { %442 = vmatprep.subr.bf16.mxu0 %v1393_v17  ;;  %483 = vmatprep.subr.bf16.mxu1 %v1395_v18  ;;  %v271_v37 = vrot.slane %v269_v33, 1  ;;  %v1435_v49 = vld [vmem:[%s1908_s1 + $0x4c] ss:$16 sps:$4 sm:$0xff]   ;;  %v1430_v50 = vld [vmem:[%s1908_s1 + $0x40] ss:$16 sps:$4 sm:$0xff]  }
  0x17   : > { %v1433_v51 = vld [vmem:[%s1908_s1 + $0x48] ss:$16 sps:$4 sm:$0xff]   ;;  %v1438_v52 = vld [vmem:[%s1908_s1 + $0x64] ss:$16 sps:$4 sm:$0xff]   ;;  %v1441_v53 = vld [vmem:[%s1908_s1 + $0x6c] ss:$16 sps:$4 sm:$0xff]  }
  0x18   : > { %v272_v41 = vor.u32 %v271_v37, %v267_v36  ;;  %v1436_v54 = vld [vmem:[%s1908_s1 + $0x60] ss:$16 sps:$4 sm:$0xff]   ;;  %v1439_v55 = vld [vmem:[%s1908_s1 + $0x68] ss:$16 sps:$4 sm:$0xff]   ;;  %v1444_v56 = vld [vmem:[%s1908_s1 + $0x84] ss:$16 sps:$4 sm:$0xff]  }
  0x19   : > { %443 = vmatpush1.bf16.msra.mxu0 %v1397_v19  ;;  %484 = vmatpush1.bf16.msra.mxu1 %v1398_v20  ;;  %v1447_v57 = vld [vmem:[%s1908_s1 + $0x8c] ss:$16 sps:$4 sm:$0xff]   ;;  %v1442_v58 = vld [vmem:[%s1908_s1 + $0x80] ss:$16 sps:$4 sm:$0xff]   ;;  %v1445_v59 = vld [vmem:[%s1908_s1 + $0x88] ss:$16 sps:$4 sm:$0xff]  }
  0x1a   : > { %444 = vmatprep.subr.bf16.mxu0 %v1399_v21  ;;  %485 = vmatprep.subr.bf16.mxu1 %v1401_v22  ;;  %v1450_v60 = vld [vmem:[%s1908_s1 + $0xa4] ss:$16 sps:$4 sm:$0xff]   ;;  %v1453_v61 = vld [vmem:[%s1908_s1 + $0xac] ss:$16 sps:$4 sm:$0xff]   ;;  %v1448_v62 = vld [vmem:[%s1908_s1 + $0xa0] ss:$16 sps:$4 sm:$0xff]  }
  0x1b   : > { %v1451_v63 = vld [vmem:[%s1908_s1 + $0xa8] ss:$16 sps:$4 sm:$0xff]   ;;  %v1456_v0 = vld [vmem:[%s1908_s1 + $0xc4] ss:$16 sps:$4 sm:$0xff]   ;;  %v1459_v1 = vld [vmem:[%s1908_s1 + $0xcc] ss:$16 sps:$4 sm:$0xff]  }
  0x1c   : > { %v1454_v3 = vld [vmem:[%s1908_s1 + $0xc0] ss:$16 sps:$4 sm:$0xff]   ;;  %v1457_v4 = vld [vmem:[%s1908_s1 + $0xc8] ss:$16 sps:$4 sm:$0xff]   ;;  %v1462_v5 = vld [vmem:[%s1908_s1 + $0xe4] ss:$16 sps:$4 sm:$0xff]  }
  0x1d   : > { %445 = vmatpush1.bf16.msra.mxu0 %v1403_v23  ;;  %486 = vmatpush1.bf16.msra.mxu1 %v1404_v24  ;;  %v1465_v6 = vld [vmem:[%s1908_s1 + $0xec] ss:$16 sps:$4 sm:$0xff]   ;;  %v1460_v7 = vld [vmem:[%s1908_s1 + $0xe0] ss:$16 sps:$4 sm:$0xff]   ;;  %v1463_v8 = vld [vmem:[%s1908_s1 + $0xe8] ss:$16 sps:$4 sm:$0xff]  }
  0x1e   : > { %446 = vmatprep.subr.bf16.mxu0 %v1405_v25  ;;  %487 = vmatprep.subr.bf16.mxu1 %v1407_v26  ;;  %v1468_v9 = vld [vmem:[%s1908_s1 + $0x204] ss:$16 sps:$4 sm:$0xff]   ;;  %v1471_v10 = vld [vmem:[%s1908_s1 + $0x20c] ss:$16 sps:$4 sm:$0xff]   ;;  %v1466_v11 = vld [vmem:[%s1908_s1 + $0x200] ss:$16 sps:$4 sm:$0xff]  }
  0x1f   : > { %v1469_v12 = vld [vmem:[%s1908_s1 + $0x208] ss:$16 sps:$4 sm:$0xff]   ;;  %v1474_v13 = vld [vmem:[%s1908_s1 + $0x224] ss:$16 sps:$4 sm:$0xff]   ;;  %v1477_v14 = vld [vmem:[%s1908_s1 + $0x22c] ss:$16 sps:$4 sm:$0xff]  }
  0x20   : > { %v1472_v15 = vld [vmem:[%s1908_s1 + $0x220] ss:$16 sps:$4 sm:$0xff]   ;;  %v1475_v16 = vld [vmem:[%s1908_s1 + $0x228] ss:$16 sps:$4 sm:$0xff]   ;;  %v1480_v17 = vld [vmem:[%s1908_s1 + $0x244] ss:$16 sps:$4 sm:$0xff]  }
  0x21   : > { %447 = vmatpush1.bf16.msra.mxu0 %v1409_v30  ;;  %488 = vmatpush1.bf16.msra.mxu1 %v1410_v31  ;;  %v1483_v18 = vld [vmem:[%s1908_s1 + $0x24c] ss:$16 sps:$4 sm:$0xff]   ;;  %v1478_v19 = vld [vmem:[%s1908_s1 + $0x240] ss:$16 sps:$4 sm:$0xff]   ;;  %v1481_v20 = vld [vmem:[%s1908_s1 + $0x248] ss:$16 sps:$4 sm:$0xff]  }
  0x22   : > { %448 = vmatprep.subr.bf16.mxu0 %v1411_v32  ;;  %489 = vmatprep.subr.bf16.mxu1 %v1413_v34  ;;  %v1486_v21 = vld [vmem:[%s1908_s1 + $0x264] ss:$16 sps:$4 sm:$0xff]   ;;  %v1484_v22 = vld [vmem:[%s1908_s1 + $0x260] ss:$16 sps:$4 sm:$0xff]   ;;  %v1487_v23 = vld [vmem:[%s1908_s1 + $0x268] ss:$16 sps:$4 sm:$0xff]  }
  0x23   : > { %v1492_v24 = vld [vmem:[%s1908_s1 + $0x284] ss:$16 sps:$4 sm:$0xff]   ;;  %v1495_v25 = vld [vmem:[%s1908_s1 + $0x28c] ss:$16 sps:$4 sm:$0xff]   ;;  %v1490_v26 = vld [vmem:[%s1908_s1 + $0x280] ss:$16 sps:$4 sm:$0xff]  }
  0x24   : > { %v1498_v28 = vld [vmem:[%s1908_s1 + $0x2a4] ss:$16 sps:$4 sm:$0xff]   ;;  %v1501_v30 = vld [vmem:[%s1908_s1 + $0x2ac] ss:$16 sps:$4 sm:$0xff]   ;;  %v1496_v31 = vld [vmem:[%s1908_s1 + $0x2a0] ss:$16 sps:$4 sm:$0xff]  }
  0x25   : > { %449 = vmatpush1.bf16.msra.mxu0 %v1415_v35  ;;  %490 = vmatpush1.bf16.msra.mxu1 %v1416_v38  ;;  %v1499_v32 = vld [vmem:[%s1908_s1 + $0x2a8] ss:$16 sps:$4 sm:$0xff]   ;;  %v1504_v33 = vld [vmem:[%s1908_s1 + $0x2c4] ss:$16 sps:$4 sm:$0xff]   ;;  %v1507_v34 = vld [vmem:[%s1908_s1 + $0x2cc] ss:$16 sps:$4 sm:$0xff]  }
  0x26   : > { %676 = vmatprep.subr.bf16.mxu0 %v1420_v39  ;;  %717 = vmatprep.subr.bf16.mxu1 %v1423_v40  ;;  %v1502_v35 = vld [vmem:[%s1908_s1 + $0x2c0] ss:$16 sps:$4 sm:$0xff]   ;;  %v1505_v36 = vld [vmem:[%s1908_s1 + $0x2c8] ss:$16 sps:$4 sm:$0xff]   ;;  %v1510_v37 = vld [vmem:[%s1908_s1 + $0x2e4] ss:$16 sps:$4 sm:$0xff]  }
  0x27   : > { %v1513_v38 = vld [vmem:[%s1908_s1 + $0x2ec] ss:$16 sps:$4 sm:$0xff]   ;;  %v1508_v39 = vld [vmem:[%s1908_s1 + $0x2e0] ss:$16 sps:$4 sm:$0xff]   ;;  %v1511_v40 = vld [vmem:[%s1908_s1 + $0x2e8] ss:$16 sps:$4 sm:$0xff]  }
  0x28   : > { %467 = vmatmul.mubr.bf16.vlgmr.msra.gmra.mrb[0].mxu0 %v272_v41  ;;  %508 = vmatmul.mubr.bf16.vlgmr.msra.gmra.mrb[0].mxu1 %v272_v41  ;;  %v791_v41 = vrot.slane %v1670_v29, 1 }
  0x29   : > { %677 = vmatpush1.bf16.msra.mxu0 %v1418_v42  ;;  %718 = vmatpush1.bf16.msra.mxu1 %v1421_v43 }
  0x2a   : > { %678 = vmatprep.subr.bf16.mxu0 %v1426_v44  ;;  %719 = vmatprep.subr.bf16.mxu1 %v1429_v45 }
  0x2b   : > { %708 = vmatprep.mubr.bf16.mxu0 %v1538_v2  ;;  %749 = vmatprep.mubr.bf16.mxu1 %v1538_v2 }
  0x2d   : > { %679 = vmatpush1.bf16.msra.mxu0 %v1424_v46  ;;  %720 = vmatpush1.bf16.msra.mxu1 %v1427_v47 }
  0x2e   : > { %680 = vmatprep.subr.bf16.mxu0 %v1432_v48  ;;  %721 = vmatprep.subr.bf16.mxu1 %v1435_v49 }
  0x31   : > { %681 = vmatpush1.bf16.msra.mxu0 %v1430_v50  ;;  %722 = vmatpush1.bf16.msra.mxu1 %v1433_v51 }
  0x32   : > { %682 = vmatprep.subr.bf16.mxu0 %v1438_v52  ;;  %723 = vmatprep.subr.bf16.mxu1 %v1441_v53 }
  0x35   : > { %683 = vmatpush1.bf16.msra.mxu0 %v1436_v54  ;;  %724 = vmatpush1.bf16.msra.mxu1 %v1439_v55 }
  0x36   : > { %684 = vmatprep.subr.bf16.mxu0 %v1444_v56  ;;  %725 = vmatprep.subr.bf16.mxu1 %v1447_v57 }
  0x39   : > { %685 = vmatpush1.bf16.msra.mxu0 %v1442_v58  ;;  %726 = vmatpush1.bf16.msra.mxu1 %v1445_v59 }
  0x3a   : > { %686 = vmatprep.subr.bf16.mxu0 %v1450_v60  ;;  %727 = vmatprep.subr.bf16.mxu1 %v1453_v61  ;;  %v1041_v61 = vlaneseq }
  0x3d   : > { %687 = vmatpush1.bf16.msra.mxu0 %v1448_v62  ;;  %728 = vmatpush1.bf16.msra.mxu1 %v1451_v63  ;;  %v1042_v62 = vshrl.u32 %v1041_v61, 7 }
  0x3e   : > { %688 = vmatprep.subr.bf16.mxu0 %v1456_v0  ;;  %729 = vmatprep.subr.bf16.mxu1 %v1459_v1  ;;  %v1039_v1 = vld [vmem:[%s1909_s2] sm:$0xf] }
  0x3f   : > { %v1043_v63 = vsub.s32 0, %v1042_v62  ;;  %v1051_v0 = vsub.s32 2, %v1042_v62 }
  0x41   : > { %689 = vmatpush1.bf16.msra.mxu0 %v1454_v3  ;;  %730 = vmatpush1.bf16.msra.mxu1 %v1457_v4  ;;  %v1047_v3 = vsub.s32 1, %v1042_v62  ;;  %v1055_v4 = vsub.s32 3, %v1042_v62 }
  0x42   : > { %690 = vmatprep.subr.bf16.mxu0 %v1462_v5  ;;  %731 = vmatprep.subr.bf16.mxu1 %v1465_v6  ;;  %v1044_v5 = vrot.slane %v1039_v1, %v1043_v63  ;;  %v1052_v6 = vrot.slane %v1039_v1, %v1051_v0 }
  0x45   : > { %691 = vmatpush1.bf16.msra.mxu0 %v1460_v7  ;;  %732 = vmatpush1.bf16.msra.mxu1 %v1463_v8 }
  0x46   : > { %953 = vmatprep.subr.bf16.mxu0 %v1468_v9  ;;  %994 = vmatprep.subr.bf16.mxu1 %v1471_v10  ;;  %v1048_v9 = vrot.slane %v1039_v1, %v1047_v3  ;;  %v1056_v10 = vrot.slane %v1039_v1, %v1055_v4 }
  0x48   : > { %709 = vmatmul.mubr.bf16.vlgmr.msra.gmra.mrb[4].mxu0 %v1667_v27  ;;  %750 = vmatmul.mubr.bf16.vlgmr.msra.gmra.mrb[4].mxu1 %v1667_v27  ;;  %v1493_v27 = vld [vmem:[%s1908_s1 + $0x288] ss:$16 sps:$4 sm:$0xff]  }
  0x49   : > { %954 = vmatpush1.bf16.msra.mxu0 %v1466_v11  ;;  %995 = vmatpush1.bf16.msra.mxu1 %v1469_v12 }
  0x4a   : > { %955 = vmatprep.subr.bf16.mxu0 %v1474_v13  ;;  %996 = vmatprep.subr.bf16.mxu1 %v1477_v14 }
  0x4b   : > { %985 = vmatprep.mubr.bf16.mxu0 %v1538_v2  ;;  %1026 = vmatprep.mubr.bf16.mxu1 %v1538_v2  ;;  %v1489_v2 = vld [vmem:[%s1908_s1 + $0x26c] ss:$16 sps:$4 sm:$0xff]  }
  0x4d   : > { %956 = vmatpush1.bf16.msra.mxu0 %v1472_v15  ;;  %997 = vmatpush1.bf16.msra.mxu1 %v1475_v16 }
  0x4e   : > { %957 = vmatprep.subr.bf16.mxu0 %v1480_v17  ;;  %998 = vmatprep.subr.bf16.mxu1 %v1483_v18 }
  0x51   : > { %958 = vmatpush1.bf16.msra.mxu0 %v1478_v19  ;;  %999 = vmatpush1.bf16.msra.mxu1 %v1481_v20 }
  0x52   : > { %959 = vmatprep.subr.bf16.mxu0 %v1486_v21  ;;  %1000 = vmatprep.subr.bf16.mxu1 %v1489_v2 }
  0x55   : > { %960 = vmatpush1.bf16.msra.mxu0 %v1484_v22  ;;  %1001 = vmatpush1.bf16.msra.mxu1 %v1487_v23 }
  0x56   : > { %961 = vmatprep.subr.bf16.mxu0 %v1492_v24  ;;  %1002 = vmatprep.subr.bf16.mxu1 %v1495_v25 }
  0x59   : > { %962 = vmatpush1.bf16.msra.mxu0 %v1490_v26  ;;  %1003 = vmatpush1.bf16.msra.mxu1 %v1493_v27 }
  0x5a   : > { %963 = vmatprep.subr.bf16.mxu0 %v1498_v28  ;;  %1004 = vmatprep.subr.bf16.mxu1 %v1501_v30 }
  0x5d   : > { %964 = vmatpush1.bf16.msra.mxu0 %v1496_v31  ;;  %1005 = vmatpush1.bf16.msra.mxu1 %v1499_v32 }
  0x5e   : > { %965 = vmatprep.subr.bf16.mxu0 %v1504_v33  ;;  %1006 = vmatprep.subr.bf16.mxu1 %v1507_v34 }
  0x61   : > { %966 = vmatpush1.bf16.msra.mxu0 %v1502_v35  ;;  %1007 = vmatpush1.bf16.msra.mxu1 %v1505_v36 }
  0x62   : > { %967 = vmatprep.subr.bf16.mxu0 %v1510_v37  ;;  %1008 = vmatprep.subr.bf16.mxu1 %v1513_v38 }
  0x65   : > { %968 = vmatpush1.bf16.msra.mxu0 %v1508_v39  ;;  %1009 = vmatpush1.bf16.msra.mxu1 %v1511_v40 }
  0x68   : > { %986 = vmatmul.mubr.bf16.vlgmr.msra.gmra.mrb[8].mxu0 %v791_v41  ;;  %1027 = vmatmul.mubr.bf16.vlgmr.msra.gmra.mrb[8].mxu1 %v791_v41 }
  0xfb   : > { %v468_v42 = vpop.f32.mrb[0].mxu0  ;;  %v509_v43 = vpop.f32.mrb[0].mxu1 }
  0xfc   : > { %v470_v44 = vpop.f32.mrb[1].mxu0  ;;  %v511_v45 = vpop.f32.mrb[1].mxu1 }
  0xfd   : > { %v472_v46 = vpop.f32.mrb[2].mxu0  ;;  %v513_v47 = vpop.f32.mrb[2].mxu1 }
  0xfe   : > { %v473_v48 = vpop.f32.mrb[3].mxu0  ;;  %v514_v49 = vpop.f32.mrb[3].mxu1 }
 0x11b   : > { %v710_v50 = vpop.f32.mrb[4].mxu0  ;;  %v751_v51 = vpop.f32.mrb[4].mxu1 }
 0x11c   : > { %v711_v52 = vadd.f32 %v710_v50, %v468_v42  ;;  %v752_v53 = vadd.f32 %v751_v51, %v509_v43  ;;  %v712_v54 = vpop.f32.mrb[5].mxu0  ;;  %v753_v55 = vpop.f32.mrb[5].mxu1 }
 0x11d   : > { %v713_v56 = vadd.f32 %v712_v54, %v470_v44  ;;  %v754_v29 = vadd.f32 %v753_v55, %v511_v45  ;;  %v714_v57 = vpop.f32.mrb[6].mxu0  ;;  %v755_v58 = vpop.f32.mrb[6].mxu1 }
 0x11e   : > { %v715_v59 = vpop.f32.mrb[7].mxu0  ;;  %v756_v60 = vpop.f32.mrb[7].mxu1 }
 0x13b   : > { %v987_v7 = vpop.f32.mrb[8].mxu0  ;;  %v1028_v8 = vpop.f32.mrb[8].mxu1 }
 0x13c   : > { %v1035_v11 = vadd.f32 %v987_v7, %v711_v52  ;;  %v1037_v12 = vadd.f32 %v1028_v8, %v752_v53  ;;  %v989_v13 = vpop.f32.mrb[9].mxu0  ;;  %v1030_v14 = vpop.f32.mrb[9].mxu1 }
 0x13d   : > { %v1036_v15 = vadd.f32 %v989_v13, %v713_v56  ;;  %v1038_v16 = vadd.f32 %v1030_v14, %v754_v29  ;;  %v991_v17 = vpop.f32.mrb[10].mxu0  ;;  %v1032_v18 = vpop.f32.mrb[10].mxu1 }
 0x13e   : > { %v1061_v19 = vadd.f32 %v1044_v5, %v1035_v11  ;;  %v1063_v20 = vadd.f32 %v1052_v6, %v1037_v12  ;;  %v992_v21 = vpop.f32.mrb[11].mxu0  ;;  %v1033_v2 = vpop.f32.mrb[11].mxu1 }
 0x13f   : > { %v1062_v22 = vadd.f32 %v1048_v9, %v1036_v15  ;;  %v1064_v23 = vadd.f32 %v1056_v10, %v1038_v16 }
 0x141   : > { %v1342_v24 = vpack.c.bf16 %v1062_v22, %v1061_v19  ;;  %v1343_v25 = vpack.c.bf16 %v1064_v23, %v1063_v20 }
 0x143   : > { %1081 = vst [vmem:[%s192_s6] sm:$0xff] %v1342_v24  ;;  %1082 = vst [vmem:[%s192_s6 + $0x8] sm:$0xff] %v1343_v25 }
 0x144 PF: > { %s13_s14 = sadd.s32 1, %s1536_s14   ;;  %s1911_s12 = smov %s1532_s13 }
 0x145   : > { %p10_p5 = scmp.ge.s32.totalorder %s13_s14, 4   ;;  %s1912_s13 = smov %s1914_s15 }
 0x147   :  { %12 = sbr.rel (!%p10_p5) target bundleno = 2 (0x2), region = 64 }

// kernel: tile.93
= control target key start
LH: loop header
LB: loop body
LE: loop exit
PB: predicated region body
PF: predicated region fallthrough
CT: control target
= control target key end

     0   :  { %s28_s0 = inlined_call_operand.vmem [shape: f32[64], index: 0, kind: input, shape index: {}]   ;;  %s29_s1 = inlined_call_operand.vmem [shape: f32[16,64], index: 1, kind: output, shape index: {}]  }
   0x1   :  { %v4_v0 = vld [vmem:[%s28_s0] ss:$0 sm:$0xff] }
   0x2   :  { %5 = vst [vmem:[%s29_s1] sm:$0xff] %v4_v0  ;;  %8 = vst [vmem:[%s29_s1 + $0x8] sm:$0xff] %v4_v0 }

// kernel: tile.94
= control target key start
LH: loop header
LB: loop body
LE: loop exit
PB: predicated region body
PF: predicated region fallthrough
CT: control target
= control target key end

     0   :  { %vm3_vm0 = vcmask 523264   ;;  %vm10_vm1 = vcmask 1048064   ;;  %s116_s0 = inlined_call_operand.vmem [shape: f32[16,64], index: 0, kind: input, shape index: {}]   ;;  %s117_s1 = inlined_call_operand.vmem [shape: f32[1,1024], index: 1, kind: output, shape index: {}]  }
   0x1   :  { %v66_v0 = vld [vmem:[%s116_s0 + $0x1] ss:$2 sm:$0xff]   ;;  %v2_v1 = vld [vmem:[%s116_s0] ss:$2 sm:$0xff]   ;;  %s75_s0 = smov 64  }
   0x2   :  { %8 = vrot.lane.b32.xlu0 %v66_v0, %s75_s0  ;;  %4 = vst.msk [vmem:[#allocation0] ss:$8 sm:$0xf] %vm3_vm0, %v2_v1   ;;  %5 = vst.msk [vmem:[#allocation0] ss:$8 sm:$0xf0] %vm3_vm0, %v2_v1  }
  0x74   :  { %v9_v2 = vpop.permute.xlu0 %8  }
  0x75   :  { %11 = vst.msk [vmem:[#allocation0] ss:$8 sm:$0xf] %vm10_vm1, %v9_v2   ;;  %12 = vst.msk [vmem:[#allocation0] ss:$8 sm:$0xf0] %vm10_vm1, %v9_v2  }
  0x7c   :  { %v16_v3 = vld [vmem:[#allocation0] sm:$0x1]  ;;  %v20_v4 = vld [vmem:[#allocation0 + $0x8] sm:$0x1]  ;;  %v25_v5 = vld [vmem:[#allocation0 + $0x10] sm:$0x1] }
  0x7d   :  { %18 = vst [vmem:[%s117_s1] sm:$0x1] %v16_v3  ;;  %67 = vst [vmem:[%s117_s1 + $0x1] sm:$0x1] %v20_v4  ;;  %v31_v6 = vld [vmem:[#allocation0 + $0x18] sm:$0x1] }
  0x7e   :  { %68 = vst [vmem:[%s117_s1 + $0x2] sm:$0x1] %v25_v5  ;;  %v37_v7 = vld [vmem:[#allocation0 + $0x20] sm:$0x1]  ;;  %v43_v8 = vld [vmem:[#allocation0 + $0x28] sm:$0x1] }
  0x7f   :  { %69 = vst [vmem:[%s117_s1 + $0x3] sm:$0x1] %v31_v6  ;;  %70 = vst [vmem:[%s117_s1 + $0x4] sm:$0x1] %v37_v7  ;;  %v49_v9 = vld [vmem:[#allocation0 + $0x30] sm:$0x1] }
  0x80   :  { %71 = vst [vmem:[%s117_s1 + $0x5] sm:$0x1] %v43_v8  ;;  %v55_v10 = vld [vmem:[#allocation0 + $0x38] sm:$0x1]  ;;  %72 = vst [vmem:[%s117_s1 + $0x6] sm:$0x1] %v49_v9 }
  0x81   :  { %73 = vst [vmem:[%s117_s1 + $0x7] sm:$0x1] %v55_v10 }

// kernel: g_forward.10
= control target key start
LH: loop header
LB: loop body
LE: loop exit
PB: predicated region body
PF: predicated region fallthrough
CT: control target
= control target key end

     0   :  { %s4068_s12 = smov 0   ;;  %s4070_s13 = smov 0   ;;  %s5345_s0 = inlined_call_operand.vmem [shape: bf16[2,18,256], index: 0, kind: input, shape index: {}]   ;;  %s5346_s1 = inlined_call_operand.vmem [shape: bf16[3,256,1024], index: 1, kind: input, shape index: {}]   ;;  %s5347_s2 = inlined_call_operand.vmem [shape: f32[1,1024], index: 2, kind: input, shape index: {}]   ;;  %s5348_s3 = inlined_call_operand.vmem [shape: bf16[2,16,1024], index: 3, kind: output, shape index: {}]  }
   0x1   :  { %s4072_s14 = smov 0  }
   0x2 LB: > { %s25_s15 = sadd.s32 1, %s4042_s13  ;;  %p3293_p0 = scmp.ge.s32.totalorder %s4046_s14, 1  ;;  %s4046_s14 = sphi %s4072_s14, %s13_s14   ;;  %s4042_s13 = sphi %s4070_s13, %s5350_s13   ;;  %s4038_s12 = sphi %s4068_s12, %s5349_s12  }
   0x3   : > { %p27_p1 = scmp.ge.s32.totalorder %s25_s15, 2  ;;  %p151_p2 = scmp.lt.s32.totalorder %s4046_s14, 3 }
   0x5   : > { %s5352_s15 = smov (%p27_p1, %s25_s15), 0  ;;  %p152_p3 = pnand %p3293_p0, %p151_p2 }
   0x6   : > { %v3297_v0 = vld [vmem:[%s5346_s1 + $0x400] sm:$0xff] (!%p152_p3)  ;;  %v3298_v2 = vld [vmem:[%s5346_s1 + $0x408] sm:$0xff] (!%p152_p3)  ;;  %p180_p4 = scmp.lt.s32.totalorder (!%p152_p3), %s4038_s12, 1  ;;  %vm469_vm0 = vsmask.f32 (!%p152_p3), 7424  ;;  %vm2251_vm1 = vcmask (!%p152_p3), 1046528  }
   0x7   : > { %155 = sbr.rel (%p152_p3) target bundleno = 614 (0x266), region = 32  ;;  %v3301_v1 = vld [vmem:[%s5346_s1 + $0x420] sm:$0xff] (!%p152_p3)  ;;  %v3302_v4 = vld [vmem:[%s5346_s1 + $0x428] sm:$0xff] (!%p152_p3) }
   0x8   : > { %v3430_v3 = vcombine.high (!%p152_p3), %v3297_v0, %v3301_v1  ;;  %v3429_v5 = vcombine.low (!%p152_p3), %v3297_v0, %v3301_v1  ;;  %v3305_v6 = vld [vmem:[%s5346_s1 + $0x440] sm:$0xff] (!%p152_p3)  ;;  %v3432_v8 = vcombine.high (!%p152_p3), %v3298_v2, %v3302_v4  ;;  %v3431_v9 = vcombine.low (!%p152_p3), %v3298_v2, %v3302_v4  ;;  %v3306_v11 = vld [vmem:[%s5346_s1 + $0x448] sm:$0xff] (!%p152_p3) }
   0x9   : > { %v3309_v7 = vld [vmem:[%s5346_s1 + $0x460] sm:$0xff] (!%p152_p3)  ;;  %v3310_v12 = vld [vmem:[%s5346_s1 + $0x468] sm:$0xff] (!%p152_p3) }
   0xa   : > { %v3438_v10 = vcombine.high (!%p152_p3), %v3305_v6, %v3309_v7  ;;  %v3313_v13 = vld [vmem:[%s5346_s1 + $0x480] sm:$0xff] (!%p152_p3)  ;;  %1136 = vmatprep.subr.bf16.mxu0 (!%p152_p3), %v3430_v3  ;;  %v3440_v14 = vcombine.high (!%p152_p3), %v3306_v11, %v3310_v12  ;;  %v3314_v16 = vld [vmem:[%s5346_s1 + $0x488] sm:$0xff] (!%p152_p3)  ;;  %1179 = vmatprep.subr.bf16.mxu1 (!%p152_p3), %v3432_v8  ;;  %v3437_v18 = vcombine.low (!%p152_p3), %v3305_v6, %v3309_v7 }
   0xb   : > { %v3317_v15 = vld [vmem:[%s5346_s1 + $0x4a0] sm:$0xff] (!%p152_p3)  ;;  %v3318_v17 = vld [vmem:[%s5346_s1 + $0x4a8] sm:$0xff] (!%p152_p3)  ;;  %1137 = vmatpush1.bf16.msra.mxu0 (!%p152_p3), %v3429_v5  ;;  %1180 = vmatpush1.bf16.msra.mxu1 (!%p152_p3), %v3431_v9  ;;  %v3439_v19 = vcombine.low (!%p152_p3), %v3306_v11, %v3310_v12 }
   0xc   : > { %1138 = vmatprep.subr.bf16.mxu0 (!%p152_p3), %v3438_v10  ;;  %v3446_v20 = vcombine.high (!%p152_p3), %v3313_v13, %v3317_v15  ;;  %1181 = vmatprep.subr.bf16.mxu1 (!%p152_p3), %v3440_v14  ;;  %v3448_v21 = vcombine.high (!%p152_p3), %v3314_v16, %v3318_v17  ;;  %v3321_v22 = vld [vmem:[%s5346_s1 + $0x4c0] sm:$0xff] (!%p152_p3)  ;;  %v3322_v24 = vld [vmem:[%s5346_s1 + $0x4c8] sm:$0xff] (!%p152_p3)  ;;  %v3445_v26 = vcombine.low (!%p152_p3), %v3313_v13, %v3317_v15 }
   0xd   : > { %v3325_v23 = vld [vmem:[%s5346_s1 + $0x4e0] sm:$0xff] (!%p152_p3)  ;;  %v3326_v25 = vld [vmem:[%s5346_s1 + $0x4e8] sm:$0xff] (!%p152_p3)  ;;  %v3447_v27 = vcombine.low (!%p152_p3), %v3314_v16, %v3318_v17 }
   0xe   : > { %v3454_v28 = vcombine.high %v3321_v22, %v3325_v23  ;;  %v3456_v29 = vcombine.high %v3322_v24, %v3326_v25  ;;  %v3329_v30 = vld [vmem:[%s5346_s1 + $0x500] sm:$0xff]  ;;  %v3330_v32 = vld [vmem:[%s5346_s1 + $0x508] sm:$0xff]  ;;  %s5354_s12 = smov (!%p180_p4, %s4038_s12), 1  ;;  %v3453_v34 = vcombine.low %v3321_v22, %v3325_v23  ;;  %v3455_v35 = vcombine.low %v3322_v24, %v3326_v25 }
   0xf   : > { %1139 = vmatpush1.bf16.msra.mxu0 %v3437_v18  ;;  %1182 = vmatpush1.bf16.msra.mxu1 %v3439_v19  ;;  %v3333_v31 = vld [vmem:[%s5346_s1 + $0x520] sm:$0xff]  ;;  %v3334_v33 = vld [vmem:[%s5346_s1 + $0x528] sm:$0xff]  ;;  %s3992_s18 = smul.u32 24, %s5354_s12  ;;  %s3951_s28 = sshll.u32 %s5354_s12, 6 }
  0x10   : > { %1140 = vmatprep.subr.bf16.mxu0 %v3446_v20  ;;  %1183 = vmatprep.subr.bf16.mxu1 %v3448_v21  ;;  %v3462_v36 = vcombine.high %v3329_v30, %v3333_v31  ;;  %v3464_v37 = vcombine.high %v3330_v32, %v3334_v33  ;;  %v3337_v38 = vld [vmem:[%s5346_s1 + $0x540] sm:$0xff]  ;;  %v3338_v40 = vld [vmem:[%s5346_s1 + $0x548] sm:$0xff]  ;;  %v3461_v42 = vcombine.low %v3329_v30, %v3333_v31  ;;  %s5326_s5 = scalar_lea.vmem %s5348_s3, %s3951_s28 }
  0x11   : > { %v3341_v39 = vld [vmem:[%s5346_s1 + $0x560] sm:$0xff]  ;;  %v3342_v41 = vld [vmem:[%s5346_s1 + $0x568] sm:$0xff]  ;;  %v3463_v43 = vcombine.low %v3330_v32, %v3334_v33  ;;  %s4180_s29 = scalar_lea.vmem %s5345_s0, %s3992_s18 }
  0x12   : > { %v3470_v44 = vcombine.high %v3337_v38, %v3341_v39  ;;  %v3472_v45 = vcombine.high %v3338_v40, %v3342_v41  ;;  %v3345_v46 = vld [vmem:[%s5346_s1 + $0x580] sm:$0xff]  ;;  %v3346_v48 = vld [vmem:[%s5346_s1 + $0x588] sm:$0xff]  ;;  %v3469_v50 = vcombine.low %v3337_v38, %v3341_v39  ;;  %v3471_v51 = vcombine.low %v3338_v40, %v3342_v41  ;;  %v4189_v56 = vld [vmem:[%s4180_s29 + $0x10] sm:$0x11] }
  0x13   : > { %1141 = vmatpush1.bf16.msra.mxu0 %v3445_v26  ;;  %1184 = vmatpush1.bf16.msra.mxu1 %v3447_v27  ;;  %v3349_v47 = vld [vmem:[%s5346_s1 + $0x5a0] sm:$0xff]  ;;  %v3350_v49 = vld [vmem:[%s5346_s1 + $0x5a8] sm:$0xff]  ;;  %v4202_v60 = vcombine.high %v4189_v56, %v4189_v56 }
  0x14   : > { %1142 = vmatprep.subr.bf16.mxu0 %v3454_v28  ;;  %1185 = vmatprep.subr.bf16.mxu1 %v3456_v29  ;;  %v3478_v52 = vcombine.high %v3345_v46, %v3349_v47  ;;  %v3353_v53 = vld [vmem:[%s5346_s1 + $0x5c0] sm:$0xff]  ;;  %v3480_v54 = vcombine.high %v3346_v48, %v3350_v49  ;;  %v3354_v58 = vld [vmem:[%s5346_s1 + $0x5c8] sm:$0xff]  ;;  %v3477_v61 = vcombine.low %v3345_v46, %v3349_v47 }
  0x15   : > { %v3357_v55 = vld [vmem:[%s5346_s1 + $0x5e0] sm:$0xff]  ;;  %v3358_v59 = vld [vmem:[%s5346_s1 + $0x5e8] sm:$0xff]  ;;  %v3479_v0 = vcombine.low %v3346_v48, %v3350_v49  ;;  %v490_v2 = vshll.u32 %v4202_v60, 16 }
  0x16   : > { %v4192_v57 = vld [vmem:[%s4180_s29 + $0x4] ss:$8 sps:$4 sm:$0xff]   ;;  %v3486_v1 = vcombine.high %v3353_v53, %v3357_v55  ;;  %v3488_v3 = vcombine.high %v3354_v58, %v3358_v59  ;;  %v3485_v10 = vcombine.low %v3353_v53, %v3357_v55  ;;  %v3487_v12 = vcombine.low %v3354_v58, %v3358_v59  ;;  %v4285_v53 = vld [vmem:[%s4180_s29] ss:$8 sps:$4 sm:$0xff]  }
  0x17   : > { %1143 = vmatpush1.bf16.msra.mxu0 %v3453_v34  ;;  %1186 = vmatpush1.bf16.msra.mxu1 %v3455_v35  ;;  %v483_v62 = vshrl.u32 %v4192_v57, 16  ;;  %v485_v63 = vshll.u32 %v4192_v57, 16  ;;  %v3361_v4 = vld [vmem:[%s5346_s1 + $0x600] sm:$0xff]  ;;  %v3362_v7 = vld [vmem:[%s5346_s1 + $0x608] sm:$0xff]  ;;  %v492_v9 = vrot.slane %v490_v2, 1  ;;  %v473_v2 = vshll.u32 %v4285_v53, 16 }
  0x18   : > { %1144 = vmatprep.subr.bf16.mxu0 %v3462_v36  ;;  %1187 = vmatprep.subr.bf16.mxu1 %v3464_v37  ;;  %v3365_v5 = vld [vmem:[%s5346_s1 + $0x620] sm:$0xff]  ;;  %v3366_v8 = vld [vmem:[%s5346_s1 + $0x628] sm:$0xff] }
  0x19   : > { %v487_v6 = vrot.slane %v485_v63, 1  ;;  %v3494_v13 = vcombine.high %v3361_v4, %v3365_v5  ;;  %v3496_v14 = vcombine.high %v3362_v7, %v3366_v8  ;;  %v3369_v15 = vld [vmem:[%s5346_s1 + $0x640] sm:$0xff]  ;;  %v3370_v18 = vld [vmem:[%s5346_s1 + $0x648] sm:$0xff]  ;;  %v3493_v20 = vcombine.low %v3361_v4, %v3365_v5 }
  0x1a   : > { %v3373_v16 = vld [vmem:[%s5346_s1 + $0x660] sm:$0xff]  ;;  %v3374_v19 = vld [vmem:[%s5346_s1 + $0x668] sm:$0xff]  ;;  %v3495_v21 = vcombine.low %v3362_v7, %v3366_v8 }
  0x1b   : > { %1145 = vmatpush1.bf16.msra.mxu0 %v3461_v42  ;;  %1188 = vmatpush1.bf16.msra.mxu1 %v3463_v43  ;;  %v488_v11 = vor.u32 %v487_v6, %v483_v62  ;;  %v3502_v22 = vcombine.high %v3369_v15, %v3373_v16  ;;  %v3504_v23 = vcombine.high %v3370_v18, %v3374_v19  ;;  %v3377_v24 = vld [vmem:[%s5346_s1 + $0x680] sm:$0xff]  ;;  %v3378_v26 = vld [vmem:[%s5346_s1 + $0x688] sm:$0xff] }
  0x1c   : > { %1146 = vmatprep.subr.bf16.mxu0 %v3470_v44  ;;  %1189 = vmatprep.subr.bf16.mxu1 %v3472_v45  ;;  %v3381_v25 = vld [vmem:[%s5346_s1 + $0x6a0] sm:$0xff]  ;;  %v3382_v27 = vld [vmem:[%s5346_s1 + $0x6a8] sm:$0xff]  ;;  %v3501_v28 = vcombine.low %v3369_v15, %v3373_v16  ;;  %v3503_v29 = vcombine.low %v3370_v18, %v3374_v19  ;;  %v3299_v16 = vld [vmem:[%s5346_s1 + $0x410] sm:$0xff] }
  0x1d   : > { %v4226_v17 = vsel %vm469_vm0, %v488_v11, %v492_v9  ;;  %v3510_v30 = vcombine.high %v3377_v24, %v3381_v25  ;;  %v3512_v31 = vcombine.high %v3378_v26, %v3382_v27  ;;  %v3385_v32 = vld [vmem:[%s5346_s1 + $0x6c0] sm:$0xff]  ;;  %v3386_v34 = vld [vmem:[%s5346_s1 + $0x6c8] sm:$0xff]  ;;  %v3509_v36 = vcombine.low %v3377_v24, %v3381_v25  ;;  %v3303_v18 = vld [vmem:[%s5346_s1 + $0x430] sm:$0xff] }
  0x1e   : > { %1168 = vmatprep.mubr.bf16.mxu0 %v4226_v17  ;;  %1211 = vmatprep.mubr.bf16.mxu1 %v4226_v17  ;;  %v3389_v33 = vld [vmem:[%s5346_s1 + $0x6e0] sm:$0xff]  ;;  %v3390_v35 = vld [vmem:[%s5346_s1 + $0x6e8] sm:$0xff]  ;;  %v3511_v37 = vcombine.low %v3378_v26, %v3382_v27  ;;  %v475_v11 = vrot.slane %v473_v2, 1  ;;  %v3300_v19 = vld [vmem:[%s5346_s1 + $0x418] sm:$0xff]  ;;  %v3434_v25 = vcombine.high %v3299_v16, %v3303_v18 }
  0x1f   : > { %1147 = vmatpush1.bf16.msra.mxu0 %v3469_v50  ;;  %1190 = vmatpush1.bf16.msra.mxu1 %v3471_v51  ;;  %v3518_v38 = vcombine.high %v3385_v32, %v3389_v33  ;;  %v3520_v39 = vcombine.high %v3386_v34, %v3390_v35  ;;  %v3393_v40 = vld [vmem:[%s5346_s1 + $0x700] sm:$0xff]  ;;  %v3394_v42 = vld [vmem:[%s5346_s1 + $0x708] sm:$0xff]  ;;  %v3517_v44 = vcombine.low %v3385_v32, %v3389_v33  ;;  %v3307_v27 = vld [vmem:[%s5346_s1 + $0x450] sm:$0xff] }
  0x20   : > { %1148 = vmatprep.subr.bf16.mxu0 %v3478_v52  ;;  %1191 = vmatprep.subr.bf16.mxu1 %v3480_v54  ;;  %v3397_v41 = vld [vmem:[%s5346_s1 + $0x720] sm:$0xff]  ;;  %v3398_v43 = vld [vmem:[%s5346_s1 + $0x728] sm:$0xff]  ;;  %v3519_v45 = vcombine.low %v3386_v34, %v3390_v35  ;;  %v3340_v2 = vld [vmem:[%s5346_s1 + $0x558] sm:$0xff] }
  0x21   : > { %v3526_v46 = vcombine.high %v3393_v40, %v3397_v41  ;;  %v3528_v47 = vcombine.high %v3394_v42, %v3398_v43  ;;  %v3401_v48 = vld [vmem:[%s5346_s1 + $0x740] sm:$0xff]  ;;  %v3402_v50 = vld [vmem:[%s5346_s1 + $0x748] sm:$0xff]  ;;  %v3525_v52 = vcombine.low %v3393_v40, %v3397_v41  ;;  %v3527_v54 = vcombine.low %v3394_v42, %v3398_v43 }
  0x22   : > { %v3405_v49 = vld [vmem:[%s5346_s1 + $0x760] sm:$0xff]  ;;  %v3406_v51 = vld [vmem:[%s5346_s1 + $0x768] sm:$0xff] }
  0x23   : > { %1149 = vmatpush1.bf16.msra.mxu0 %v3477_v61  ;;  %1192 = vmatpush1.bf16.msra.mxu1 %v3479_v0  ;;  %v3534_v55 = vcombine.high %v3401_v48, %v3405_v49  ;;  %v3536_v58 = vcombine.high %v3402_v50, %v3406_v51  ;;  %v3409_v59 = vld [vmem:[%s5346_s1 + $0x780] sm:$0xff]  ;;  %v3410_v62 = vld [vmem:[%s5346_s1 + $0x788] sm:$0xff]  ;;  %v3533_v0 = vcombine.low %v3401_v48, %v3405_v49 }
  0x24   : > { %1150 = vmatprep.subr.bf16.mxu0 %v3486_v1  ;;  %1193 = vmatprep.subr.bf16.mxu1 %v3488_v3  ;;  %v3413_v61 = vld [vmem:[%s5346_s1 + $0x7a0] sm:$0xff]  ;;  %v3414_v63 = vld [vmem:[%s5346_s1 + $0x7a8] sm:$0xff]  ;;  %v4301_v1 = vcombine.low %v4189_v56, %v4189_v56  ;;  %v3535_v3 = vcombine.low %v3402_v50, %v3406_v51 }
  0x25   : > { %v3542_v4 = vcombine.high %v3409_v59, %v3413_v61  ;;  %v3544_v5 = vcombine.high %v3410_v62, %v3414_v63  ;;  %v3417_v6 = vld [vmem:[%s5346_s1 + $0x7c0] sm:$0xff]  ;;  %v3418_v56 = vld [vmem:[%s5346_s1 + $0x7c8] sm:$0xff]  ;;  %v3541_v9 = vcombine.low %v3409_v59, %v3413_v61 }
  0x26   : > { %v3421_v7 = vld [vmem:[%s5346_s1 + $0x7e0] sm:$0xff]  ;;  %v3422_v8 = vld [vmem:[%s5346_s1 + $0x7e8] sm:$0xff] }
  0x27   : > { %1151 = vmatpush1.bf16.msra.mxu0 %v3485_v10  ;;  %1194 = vmatpush1.bf16.msra.mxu1 %v3487_v12  ;;  %v471_v10 = vshrl.u32 %v4285_v53, 16  ;;  %v478_v12 = vshll.u32 %v4301_v1, 16  ;;  %v3552_v15 = vcombine.high %v3418_v56, %v3422_v8  ;;  %v3551_v24 = vcombine.low %v3418_v56, %v3422_v8  ;;  %v3347_v56 = vld [vmem:[%s5346_s1 + $0x590] sm:$0xff] }
  0x28   : > { %1152 = vmatprep.subr.bf16.mxu0 %v3494_v13  ;;  %1195 = vmatprep.subr.bf16.mxu1 %v3496_v14  ;;  %v3543_v13 = vcombine.low %v3410_v62, %v3414_v63  ;;  %v3550_v14 = vcombine.high %v3417_v6, %v3421_v7  ;;  %v3339_v63 = vld [vmem:[%s5346_s1 + $0x550] sm:$0xff] }
  0x29   : > { %v3351_v8 = vld [vmem:[%s5346_s1 + $0x5b0] sm:$0xff] }
  0x2b   : > { %1153 = vmatpush1.bf16.msra.mxu0 %v3493_v20  ;;  %1196 = vmatpush1.bf16.msra.mxu1 %v3495_v21  ;;  %v3304_v20 = vld [vmem:[%s5346_s1 + $0x438] sm:$0xff]  ;;  %v3549_v21 = vcombine.low %v3417_v6, %v3421_v7 }
  0x2c   : > { %1154 = vmatprep.subr.bf16.mxu0 %v3502_v22  ;;  %1197 = vmatprep.subr.bf16.mxu1 %v3504_v23  ;;  %v476_v22 = vor.u32 %v475_v11, %v471_v10  ;;  %v480_v23 = vrot.slane %v478_v12, 1  ;;  %v3436_v26 = vcombine.high %v3300_v19, %v3304_v20  ;;  %v3435_v33 = vcombine.low %v3300_v19, %v3304_v20  ;;  %v3352_v10 = vld [vmem:[%s5346_s1 + $0x5b8] sm:$0xff] }
  0x2d   : > { %v3360_v19 = vld [vmem:[%s5346_s1 + $0x5f8] sm:$0xff]  ;;  %v3481_v20 = vcombine.low %v3347_v56, %v3351_v8 }
  0x2e   : > { %v4343_v32 = vsel %vm469_vm0, %v476_v22, %v480_v23 }
  0x2f   : > { %1155 = vmatpush1.bf16.msra.mxu0 %v3501_v28  ;;  %1198 = vmatpush1.bf16.msra.mxu1 %v3503_v29  ;;  %v3311_v28 = vld [vmem:[%s5346_s1 + $0x470] sm:$0xff]  ;;  %v3308_v29 = vld [vmem:[%s5346_s1 + $0x458] sm:$0xff] }
  0x30   : > { %1156 = vmatprep.subr.bf16.mxu0 %v3510_v30  ;;  %1199 = vmatprep.subr.bf16.mxu1 %v3512_v31  ;;  %v3312_v30 = vld [vmem:[%s5346_s1 + $0x478] sm:$0xff]  ;;  %v3433_v31 = vcombine.low %v3299_v16, %v3303_v18  ;;  %v3442_v34 = vcombine.high %v3307_v27, %v3311_v28  ;;  %v3441_v40 = vcombine.low %v3307_v27, %v3311_v28  ;;  %v3359_v16 = vld [vmem:[%s5346_s1 + $0x5f0] sm:$0xff] }
  0x31   : > { %v3444_v35 = vcombine.high %v3308_v29, %v3312_v30  ;;  %v3443_v41 = vcombine.low %v3308_v29, %v3312_v30  ;;  %v3356_v18 = vld [vmem:[%s5346_s1 + $0x5d8] sm:$0xff] }
  0x32   : > { %v3492_v23 = vcombine.high %v3356_v18, %v3360_v19  ;;  %v3368_v27 = vld [vmem:[%s5346_s1 + $0x638] sm:$0xff]  ;;  %v3491_v29 = vcombine.low %v3356_v18, %v3360_v19 }
  0x33   : > { %1157 = vmatpush1.bf16.msra.mxu0 %v3509_v36  ;;  %1200 = vmatpush1.bf16.msra.mxu1 %v3511_v37  ;;  %v3315_v36 = vld [vmem:[%s5346_s1 + $0x490] sm:$0xff] }
  0x34   : > { %1158 = vmatprep.subr.bf16.mxu0 %v3518_v38  ;;  %1201 = vmatprep.subr.bf16.mxu1 %v3520_v39  ;;  %v3319_v37 = vld [vmem:[%s5346_s1 + $0x4b0] sm:$0xff]  ;;  %v3316_v38 = vld [vmem:[%s5346_s1 + $0x498] sm:$0xff] }
  0x35   : > { %v3320_v39 = vld [vmem:[%s5346_s1 + $0x4b8] sm:$0xff]  ;;  %v3450_v42 = vcombine.high %v3315_v36, %v3319_v37  ;;  %v3449_v48 = vcombine.low %v3315_v36, %v3319_v37 }
  0x36   : > { %v3452_v43 = vcombine.high %v3316_v38, %v3320_v39  ;;  %v3451_v49 = vcombine.low %v3316_v38, %v3320_v39  ;;  %v3376_v36 = vld [vmem:[%s5346_s1 + $0x678] sm:$0xff] }
  0x37   : > { %1159 = vmatpush1.bf16.msra.mxu0 %v3517_v44  ;;  %1202 = vmatpush1.bf16.msra.mxu1 %v3519_v45  ;;  %v3323_v44 = vld [vmem:[%s5346_s1 + $0x4d0] sm:$0xff] }
  0x38   : > { %1160 = vmatprep.subr.bf16.mxu0 %v3526_v46  ;;  %1203 = vmatprep.subr.bf16.mxu1 %v3528_v47  ;;  %v3327_v45 = vld [vmem:[%s5346_s1 + $0x4f0] sm:$0xff]  ;;  %v3324_v46 = vld [vmem:[%s5346_s1 + $0x4d8] sm:$0xff] }
  0x39   : > { %v3328_v47 = vld [vmem:[%s5346_s1 + $0x4f8] sm:$0xff]  ;;  %v3458_v50 = vcombine.high %v3323_v44, %v3327_v45 }
  0x3a   : > { %v3460_v51 = vcombine.high %v3324_v46, %v3328_v47  ;;  %v3459_v59 = vcombine.low %v3324_v46, %v3328_v47 }
  0x3b   : > { %1161 = vmatpush1.bf16.msra.mxu0 %v3525_v52  ;;  %1204 = vmatpush1.bf16.msra.mxu1 %v3527_v54  ;;  %v3331_v52 = vld [vmem:[%s5346_s1 + $0x510] sm:$0xff] }
  0x3c   : > { %1162 = vmatprep.subr.bf16.mxu0 %v3534_v55  ;;  %1205 = vmatprep.subr.bf16.mxu1 %v3536_v58  ;;  %v3335_v54 = vld [vmem:[%s5346_s1 + $0x530] sm:$0xff]  ;;  %v3336_v55 = vld [vmem:[%s5346_s1 + $0x538] sm:$0xff]  ;;  %v3457_v58 = vcombine.low %v3323_v44, %v3327_v45 }
  0x3d   : > { %v3466_v61 = vcombine.high %v3331_v52, %v3335_v54  ;;  %v3384_v44 = vld [vmem:[%s5346_s1 + $0x6b8] sm:$0xff] }
  0x3f   : > { %1163 = vmatpush1.bf16.msra.mxu0 %v3533_v0  ;;  %1206 = vmatpush1.bf16.msra.mxu1 %v3535_v3  ;;  %v3343_v0 = vld [vmem:[%s5346_s1 + $0x570] sm:$0xff]  ;;  %v3344_v3 = vld [vmem:[%s5346_s1 + $0x578] sm:$0xff] }
  0x40   : > { %1164 = vmatprep.subr.bf16.mxu0 %v3542_v4  ;;  %1207 = vmatprep.subr.bf16.mxu1 %v3544_v5  ;;  %v3465_v4 = vcombine.low %v3331_v52, %v3335_v54  ;;  %v3474_v6 = vcombine.high %v3339_v63, %v3343_v0  ;;  %v3476_v7 = vcombine.high %v3340_v2, %v3344_v3  ;;  %v3392_v52 = vld [vmem:[%s5346_s1 + $0x6f8] sm:$0xff] }
  0x41   : > { %v3473_v11 = vcombine.low %v3339_v63, %v3343_v0  ;;  %v3475_v12 = vcombine.low %v3340_v2, %v3344_v3  ;;  %v3400_v63 = vld [vmem:[%s5346_s1 + $0x738] sm:$0xff] }
  0x43   : > { %1165 = vmatpush1.bf16.msra.mxu0 %v3541_v9  ;;  %1208 = vmatpush1.bf16.msra.mxu1 %v3543_v13  ;;  %v3348_v9 = vld [vmem:[%s5346_s1 + $0x598] sm:$0xff]  ;;  %v3482_v13 = vcombine.high %v3347_v56, %v3351_v8 }
  0x44   : > { %1166 = vmatprep.subr.bf16.mxu0 %v3550_v14  ;;  %1209 = vmatprep.subr.bf16.mxu1 %v3552_v15  ;;  %v3484_v14 = vcombine.high %v3348_v9, %v3352_v10  ;;  %v3355_v15 = vld [vmem:[%s5346_s1 + $0x5d0] sm:$0xff]  ;;  %v3408_v56 = vld [vmem:[%s5346_s1 + $0x778] sm:$0xff] }
  0x45   : > { %v3490_v22 = vcombine.high %v3355_v15, %v3359_v16  ;;  %v3489_v28 = vcombine.low %v3355_v15, %v3359_v16  ;;  %v3416_v15 = vld [vmem:[%s5346_s1 + $0x7b8] sm:$0xff] }
  0x47   : > { %1167 = vmatpush1.bf16.msra.mxu0 %v3549_v21  ;;  %1210 = vmatpush1.bf16.msra.mxu1 %v3551_v24  ;;  %v3483_v21 = vcombine.low %v3348_v9, %v3352_v10  ;;  %v3363_v24 = vld [vmem:[%s5346_s1 + $0x610] sm:$0xff] }
  0x48   : > { %1222 = vmatprep.subr.bf16.mxu0 %v3434_v25  ;;  %1265 = vmatprep.subr.bf16.mxu1 %v3436_v26  ;;  %v3367_v25 = vld [vmem:[%s5346_s1 + $0x630] sm:$0xff]  ;;  %v3364_v26 = vld [vmem:[%s5346_s1 + $0x618] sm:$0xff] }
  0x49   : > { %v3498_v30 = vcombine.high %v3363_v24, %v3367_v25  ;;  %v3497_v37 = vcombine.low %v3363_v24, %v3367_v25  ;;  %v3499_v38 = vcombine.low %v3364_v26, %v3368_v27  ;;  %v3424_v24 = vld [vmem:[%s5346_s1 + $0x7f8] sm:$0xff] }
  0x4a   : > { %1169 = vmatmul.mubr.bf16.vlgmr.msra.gmra.mrb[0].mxu0 %v4343_v32  ;;  %1212 = vmatmul.mubr.bf16.vlgmr.msra.gmra.mrb[0].mxu1 %v4343_v32 }
  0x4b   : > { %1223 = vmatpush1.bf16.msra.mxu0 %v3433_v31  ;;  %1266 = vmatpush1.bf16.msra.mxu1 %v3435_v33  ;;  %v3500_v31 = vcombine.high %v3364_v26, %v3368_v27  ;;  %v3371_v33 = vld [vmem:[%s5346_s1 + $0x650] sm:$0xff] }
  0x4c   : > { %1224 = vmatprep.subr.bf16.mxu0 %v3442_v34  ;;  %1267 = vmatprep.subr.bf16.mxu1 %v3444_v35  ;;  %v3375_v34 = vld [vmem:[%s5346_s1 + $0x670] sm:$0xff]  ;;  %v3372_v35 = vld [vmem:[%s5346_s1 + $0x658] sm:$0xff] }
  0x4d   : > { %1254 = vmatprep.mubr.bf16.mxu0 %v4226_v17  ;;  %1297 = vmatprep.mubr.bf16.mxu1 %v4226_v17  ;;  %v3332_v17 = vld [vmem:[%s5346_s1 + $0x518] sm:$0xff]  ;;  %v3506_v39 = vcombine.high %v3371_v33, %v3375_v34  ;;  %v3505_v45 = vcombine.low %v3371_v33, %v3375_v34  ;;  %v3507_v46 = vcombine.low %v3372_v35, %v3376_v36  ;;  %v204_v33 = vld [vmem:[%s5346_s1 + $0x28] sm:$0xff] }
  0x4e   : > { %v3468_v62 = vcombine.high %v3332_v17, %v3336_v55  ;;  %v3467_v5 = vcombine.low %v3332_v17, %v3336_v55 }
  0x4f   : > { %1225 = vmatpush1.bf16.msra.mxu0 %v3441_v40  ;;  %1268 = vmatpush1.bf16.msra.mxu1 %v3443_v41  ;;  %v3508_v40 = vcombine.high %v3372_v35, %v3376_v36  ;;  %v3379_v41 = vld [vmem:[%s5346_s1 + $0x690] sm:$0xff] }
  0x50   : > { %1226 = vmatprep.subr.bf16.mxu0 %v3450_v42  ;;  %1269 = vmatprep.subr.bf16.mxu1 %v3452_v43  ;;  %v3383_v42 = vld [vmem:[%s5346_s1 + $0x6b0] sm:$0xff]  ;;  %v3380_v43 = vld [vmem:[%s5346_s1 + $0x698] sm:$0xff] }
  0x51   : > { %v3514_v47 = vcombine.high %v3379_v41, %v3383_v42  ;;  %v3513_v54 = vcombine.low %v3379_v41, %v3383_v42  ;;  %v3515_v17 = vcombine.low %v3380_v43, %v3384_v44  ;;  %v212_v41 = vld [vmem:[%s5346_s1 + $0x68] sm:$0xff] }
  0x53   : > { %1227 = vmatpush1.bf16.msra.mxu0 %v3449_v48  ;;  %1270 = vmatpush1.bf16.msra.mxu1 %v3451_v49  ;;  %v3516_v48 = vcombine.high %v3380_v43, %v3384_v44  ;;  %v3387_v49 = vld [vmem:[%s5346_s1 + $0x6d0] sm:$0xff] }
  0x54   : > { %1228 = vmatprep.subr.bf16.mxu0 %v3458_v50  ;;  %1271 = vmatprep.subr.bf16.mxu1 %v3460_v51  ;;  %v3391_v50 = vld [vmem:[%s5346_s1 + $0x6f0] sm:$0xff]  ;;  %v3388_v51 = vld [vmem:[%s5346_s1 + $0x6d8] sm:$0xff] }
  0x55   : > { %v3522_v55 = vcombine.high %v3387_v49, %v3391_v50  ;;  %v3521_v0 = vcombine.low %v3387_v49, %v3391_v50  ;;  %v3523_v2 = vcombine.low %v3388_v51, %v3392_v52  ;;  %v220_v49 = vld [vmem:[%s5346_s1 + $0xa8] sm:$0xff] }
  0x57   : > { %1229 = vmatpush1.bf16.msra.mxu0 %v3457_v58  ;;  %1272 = vmatpush1.bf16.msra.mxu1 %v3459_v59  ;;  %v3524_v58 = vcombine.high %v3388_v51, %v3392_v52  ;;  %v3395_v59 = vld [vmem:[%s5346_s1 + $0x710] sm:$0xff] }
  0x58   : > { %1230 = vmatprep.subr.bf16.mxu0 %v3466_v61  ;;  %1273 = vmatprep.subr.bf16.mxu1 %v3468_v62  ;;  %v3399_v61 = vld [vmem:[%s5346_s1 + $0x730] sm:$0xff]  ;;  %v3396_v62 = vld [vmem:[%s5346_s1 + $0x718] sm:$0xff] }
  0x59   : > { %v3530_v3 = vcombine.high %v3395_v59, %v3399_v61  ;;  %v3529_v8 = vcombine.low %v3395_v59, %v3399_v61  ;;  %v3531_v9 = vcombine.low %v3396_v62, %v3400_v63 }
  0x5b   : > { %1231 = vmatpush1.bf16.msra.mxu0 %v3465_v4  ;;  %1274 = vmatpush1.bf16.msra.mxu1 %v3467_v5  ;;  %v3532_v4 = vcombine.high %v3396_v62, %v3400_v63  ;;  %v3403_v5 = vld [vmem:[%s5346_s1 + $0x750] sm:$0xff] }
  0x5c   : > { %1232 = vmatprep.subr.bf16.mxu0 %v3474_v6  ;;  %1275 = vmatprep.subr.bf16.mxu1 %v3476_v7  ;;  %v3407_v6 = vld [vmem:[%s5346_s1 + $0x770] sm:$0xff]  ;;  %v3404_v7 = vld [vmem:[%s5346_s1 + $0x758] sm:$0xff] }
  0x5d   : > { %v3538_v10 = vcombine.high %v3403_v5, %v3407_v6  ;;  %v3537_v16 = vcombine.low %v3403_v5, %v3407_v6  ;;  %v3539_v18 = vcombine.low %v3404_v7, %v3408_v56 }
  0x5f   : > { %1233 = vmatpush1.bf16.msra.mxu0 %v3473_v11  ;;  %1276 = vmatpush1.bf16.msra.mxu1 %v3475_v12  ;;  %v3540_v11 = vcombine.high %v3404_v7, %v3408_v56  ;;  %v3411_v12 = vld [vmem:[%s5346_s1 + $0x790] sm:$0xff]  ;;  %v239_v56 = vld [vmem:[%s5346_s1 + $0x140] sm:$0xff] }
  0x60   : > { %1234 = vmatprep.subr.bf16.mxu0 %v3482_v13  ;;  %1277 = vmatprep.subr.bf16.mxu1 %v3484_v14  ;;  %v3415_v13 = vld [vmem:[%s5346_s1 + $0x7b0] sm:$0xff]  ;;  %v3412_v14 = vld [vmem:[%s5346_s1 + $0x798] sm:$0xff] }
  0x61   : > { %v3546_v19 = vcombine.high %v3411_v12, %v3415_v13  ;;  %v3545_v25 = vcombine.low %v3411_v12, %v3415_v13  ;;  %v3547_v26 = vcombine.low %v3412_v14, %v3416_v15 }
  0x63   : > { %1235 = vmatpush1.bf16.msra.mxu0 %v3481_v20  ;;  %1278 = vmatpush1.bf16.msra.mxu1 %v3483_v21  ;;  %v3548_v20 = vcombine.high %v3412_v14, %v3416_v15  ;;  %v3419_v21 = vld [vmem:[%s5346_s1 + $0x7d0] sm:$0xff]  ;;  %v247_v15 = vld [vmem:[%s5346_s1 + $0x180] sm:$0xff] }
  0x64   : > { %1236 = vmatprep.subr.bf16.mxu0 %v3490_v22  ;;  %1279 = vmatprep.subr.bf16.mxu1 %v3492_v23  ;;  %v3423_v22 = vld [vmem:[%s5346_s1 + $0x7f0] sm:$0xff]  ;;  %v3420_v23 = vld [vmem:[%s5346_s1 + $0x7d8] sm:$0xff] }
  0x65   : > { %v3554_v27 = vcombine.high %v3419_v21, %v3423_v22  ;;  %v3553_v34 = vcombine.low %v3419_v21, %v3423_v22  ;;  %v3555_v35 = vcombine.low %v3420_v23, %v3424_v24 }
  0x67   : > { %1237 = vmatpush1.bf16.msra.mxu0 %v3489_v28  ;;  %1280 = vmatpush1.bf16.msra.mxu1 %v3491_v29  ;;  %v3556_v28 = vcombine.high %v3420_v23, %v3424_v24  ;;  %v199_v29 = vld [vmem:[%s5346_s1] sm:$0xff] }
  0x68   : > { %1238 = vmatprep.subr.bf16.mxu0 %v3498_v30  ;;  %1281 = vmatprep.subr.bf16.mxu1 %v3500_v31  ;;  %v203_v30 = vld [vmem:[%s5346_s1 + $0x20] sm:$0xff]  ;;  %v200_v31 = vld [vmem:[%s5346_s1 + $0x8] sm:$0xff] }
  0x69   : > { %v3558_v36 = vcombine.high %v199_v29, %v203_v30  ;;  %v3557_v42 = vcombine.low %v199_v29, %v203_v30  ;;  %v3559_v43 = vcombine.low %v200_v31, %v204_v33  ;;  %v255_v24 = vld [vmem:[%s5346_s1 + $0x1c0] sm:$0xff] }
  0x6b   : > { %1239 = vmatpush1.bf16.msra.mxu0 %v3497_v37  ;;  %1282 = vmatpush1.bf16.msra.mxu1 %v3499_v38  ;;  %v3560_v37 = vcombine.high %v200_v31, %v204_v33  ;;  %v207_v38 = vld [vmem:[%s5346_s1 + $0x40] sm:$0xff] }
  0x6c   : > { %1240 = vmatprep.subr.bf16.mxu0 %v3506_v39  ;;  %1283 = vmatprep.subr.bf16.mxu1 %v3508_v40  ;;  %v211_v39 = vld [vmem:[%s5346_s1 + $0x60] sm:$0xff]  ;;  %v208_v40 = vld [vmem:[%s5346_s1 + $0x48] sm:$0xff] }
  0x6d   : > { %v3566_v44 = vcombine.high %v207_v38, %v211_v39  ;;  %v3565_v50 = vcombine.low %v207_v38, %v211_v39  ;;  %v3567_v51 = vcombine.low %v208_v40, %v212_v41  ;;  %v263_v33 = vld [vmem:[%s5346_s1 + $0x200] sm:$0xff] }
  0x6f   : > { %1241 = vmatpush1.bf16.msra.mxu0 %v3505_v45  ;;  %1284 = vmatpush1.bf16.msra.mxu1 %v3507_v46  ;;  %v3568_v45 = vcombine.high %v208_v40, %v212_v41  ;;  %v215_v46 = vld [vmem:[%s5346_s1 + $0x80] sm:$0xff] }
  0x70   : > { %1242 = vmatprep.subr.bf16.mxu0 %v3514_v47  ;;  %1285 = vmatprep.subr.bf16.mxu1 %v3516_v48  ;;  %v219_v47 = vld [vmem:[%s5346_s1 + $0xa0] sm:$0xff]  ;;  %v216_v48 = vld [vmem:[%s5346_s1 + $0x88] sm:$0xff] }
  0x71   : > { %v3574_v52 = vcombine.high %v215_v46, %v219_v47  ;;  %v3573_v59 = vcombine.low %v215_v46, %v219_v47  ;;  %v3575_v61 = vcombine.low %v216_v48, %v220_v49  ;;  %v271_v41 = vld [vmem:[%s5346_s1 + $0x240] sm:$0xff] }
  0x73   : > { %1243 = vmatpush1.bf16.msra.mxu0 %v3513_v54  ;;  %1286 = vmatpush1.bf16.msra.mxu1 %v3515_v17  ;;  %v3576_v54 = vcombine.high %v216_v48, %v220_v49  ;;  %v223_v17 = vld [vmem:[%s5346_s1 + $0xc0] sm:$0xff] }
  0x74   : > { %1244 = vmatprep.subr.bf16.mxu0 %v3522_v55  ;;  %1287 = vmatprep.subr.bf16.mxu1 %v3524_v58  ;;  %v227_v55 = vld [vmem:[%s5346_s1 + $0xe0] sm:$0xff]  ;;  %v228_v58 = vld [vmem:[%s5346_s1 + $0xe8] sm:$0xff] }
  0x75   : > { %v3582_v62 = vcombine.high %v223_v17, %v227_v55  ;;  %v279_v49 = vld [vmem:[%s5346_s1 + $0x280] sm:$0xff] }
  0x77   : > { %1245 = vmatpush1.bf16.msra.mxu0 %v3521_v0  ;;  %1288 = vmatpush1.bf16.msra.mxu1 %v3523_v2  ;;  %v231_v0 = vld [vmem:[%s5346_s1 + $0x100] sm:$0xff] }
  0x78   : > { %1246 = vmatprep.subr.bf16.mxu0 %v3530_v3  ;;  %1289 = vmatprep.subr.bf16.mxu1 %v3532_v4  ;;  %v235_v2 = vld [vmem:[%s5346_s1 + $0x120] sm:$0xff]  ;;  %v236_v3 = vld [vmem:[%s5346_s1 + $0x128] sm:$0xff]  ;;  %v3581_v4 = vcombine.low %v223_v17, %v227_v55 }
  0x79   : > { %v3590_v6 = vcombine.high %v231_v0, %v235_v2 }
  0x7b   : > { %1247 = vmatpush1.bf16.msra.mxu0 %v3529_v8  ;;  %1290 = vmatpush1.bf16.msra.mxu1 %v3531_v9  ;;  %v243_v8 = vld [vmem:[%s5346_s1 + $0x160] sm:$0xff]  ;;  %v240_v9 = vld [vmem:[%s5346_s1 + $0x148] sm:$0xff] }
  0x7c   : > { %1248 = vmatprep.subr.bf16.mxu0 %v3538_v10  ;;  %1291 = vmatprep.subr.bf16.mxu1 %v3540_v11  ;;  %v244_v10 = vld [vmem:[%s5346_s1 + $0x168] sm:$0xff]  ;;  %v3589_v11 = vcombine.low %v231_v0, %v235_v2  ;;  %v3598_v13 = vcombine.high %v239_v56, %v243_v8 }
  0x7d   : > { %v3600_v14 = vcombine.high %v240_v9, %v244_v10  ;;  %v3599_v21 = vcombine.low %v240_v9, %v244_v10  ;;  %v303_v10 = vld [vmem:[%s5346_s1 + $0x340] sm:$0xff] }
  0x7f   : > { %1249 = vmatpush1.bf16.msra.mxu0 %v3537_v16  ;;  %1292 = vmatpush1.bf16.msra.mxu1 %v3539_v18  ;;  %v251_v16 = vld [vmem:[%s5346_s1 + $0x1a0] sm:$0xff]  ;;  %v248_v18 = vld [vmem:[%s5346_s1 + $0x188] sm:$0xff] }
  0x80   : > { %1250 = vmatprep.subr.bf16.mxu0 %v3546_v19  ;;  %1293 = vmatprep.subr.bf16.mxu1 %v3548_v20  ;;  %v252_v19 = vld [vmem:[%s5346_s1 + $0x1a8] sm:$0xff]  ;;  %v3597_v20 = vcombine.low %v239_v56, %v243_v8  ;;  %v3606_v22 = vcombine.high %v247_v15, %v251_v16 }
  0x81   : > { %v3608_v23 = vcombine.high %v248_v18, %v252_v19  ;;  %v3607_v29 = vcombine.low %v248_v18, %v252_v19  ;;  %v311_v19 = vld [vmem:[%s5346_s1 + $0x380] sm:$0xff] }
  0x83   : > { %1251 = vmatpush1.bf16.msra.mxu0 %v3545_v25  ;;  %1294 = vmatpush1.bf16.msra.mxu1 %v3547_v26  ;;  %v259_v25 = vld [vmem:[%s5346_s1 + $0x1e0] sm:$0xff]  ;;  %v256_v26 = vld [vmem:[%s5346_s1 + $0x1c8] sm:$0xff] }
  0x84   : > { %1252 = vmatprep.subr.bf16.mxu0 %v3554_v27  ;;  %1295 = vmatprep.subr.bf16.mxu1 %v3556_v28  ;;  %v260_v27 = vld [vmem:[%s5346_s1 + $0x1e8] sm:$0xff]  ;;  %v3605_v28 = vcombine.low %v247_v15, %v251_v16  ;;  %v3614_v30 = vcombine.high %v255_v24, %v259_v25 }
  0x85   : > { %v3616_v31 = vcombine.high %v256_v26, %v260_v27  ;;  %v3615_v38 = vcombine.low %v256_v26, %v260_v27  ;;  %v319_v27 = vld [vmem:[%s5346_s1 + $0x3c0] sm:$0xff] }
  0x87   : > { %1253 = vmatpush1.bf16.msra.mxu0 %v3553_v34  ;;  %1296 = vmatpush1.bf16.msra.mxu1 %v3555_v35  ;;  %v267_v34 = vld [vmem:[%s5346_s1 + $0x220] sm:$0xff]  ;;  %v264_v35 = vld [vmem:[%s5346_s1 + $0x208] sm:$0xff] }
  0x88   : > { %1950 = vmatprep.subr.bf16.mxu0 %v3558_v36  ;;  %1993 = vmatprep.subr.bf16.mxu1 %v3560_v37  ;;  %v268_v36 = vld [vmem:[%s5346_s1 + $0x228] sm:$0xff]  ;;  %v3613_v37 = vcombine.low %v255_v24, %v259_v25  ;;  %v3622_v39 = vcombine.high %v263_v33, %v267_v34 }
  0x89   : > { %v3624_v40 = vcombine.high %v264_v35, %v268_v36  ;;  %v3623_v46 = vcombine.low %v264_v35, %v268_v36  ;;  %v201_v36 = vld [vmem:[%s5346_s1 + $0x10] sm:$0xff] }
  0x8a   : > { %1255 = vmatmul.mubr.bf16.vlgmr.msra.gmra.mrb[4].mxu0 %v4343_v32  ;;  %1298 = vmatmul.mubr.bf16.vlgmr.msra.gmra.mrb[4].mxu1 %v4343_v32  ;;  %v224_v32 = vld [vmem:[%s5346_s1 + $0xc8] sm:$0xff] }
  0x8b   : > { %1951 = vmatpush1.bf16.msra.mxu0 %v3557_v42  ;;  %1994 = vmatpush1.bf16.msra.mxu1 %v3559_v43  ;;  %v3584_v63 = vcombine.high %v224_v32, %v228_v58  ;;  %v3583_v5 = vcombine.low %v224_v32, %v228_v58  ;;  %v275_v42 = vld [vmem:[%s5346_s1 + $0x260] sm:$0xff]  ;;  %v272_v43 = vld [vmem:[%s5346_s1 + $0x248] sm:$0xff] }
  0x8c   : > { %1952 = vmatprep.subr.bf16.mxu0 %v3566_v44  ;;  %1995 = vmatprep.subr.bf16.mxu1 %v3568_v45  ;;  %v276_v44 = vld [vmem:[%s5346_s1 + $0x268] sm:$0xff]  ;;  %v3621_v45 = vcombine.low %v263_v33, %v267_v34  ;;  %v3630_v47 = vcombine.high %v271_v41, %v275_v42  ;;  %v287_v58 = vld [vmem:[%s5346_s1 + $0x2c0] sm:$0xff] }
  0x8d   : > { %1982 = vmatprep.mubr.bf16.mxu0 %v4192_v57  ;;  %2025 = vmatprep.mubr.bf16.mxu1 %v4192_v57  ;;  %v232_v57 = vld [vmem:[%s5346_s1 + $0x108] sm:$0xff]  ;;  %v3632_v48 = vcombine.high %v272_v43, %v276_v44  ;;  %v3631_v17 = vcombine.low %v272_v43, %v276_v44  ;;  %v209_v44 = vld [vmem:[%s5346_s1 + $0x50] sm:$0xff] }
  0x8e   : > { %v3592_v7 = vcombine.high %v232_v57, %v236_v3  ;;  %v3591_v12 = vcombine.low %v232_v57, %v236_v3  ;;  %v295_v3 = vld [vmem:[%s5346_s1 + $0x300] sm:$0xff] }
  0x8f   : > { %1953 = vmatpush1.bf16.msra.mxu0 %v3565_v50  ;;  %1996 = vmatpush1.bf16.msra.mxu1 %v3567_v51  ;;  %v283_v50 = vld [vmem:[%s5346_s1 + $0x2a0] sm:$0xff]  ;;  %v280_v51 = vld [vmem:[%s5346_s1 + $0x288] sm:$0xff] }
  0x90   : > { %1954 = vmatprep.subr.bf16.mxu0 %v3574_v52  ;;  %1997 = vmatprep.subr.bf16.mxu1 %v3576_v54  ;;  %v284_v52 = vld [vmem:[%s5346_s1 + $0x2a8] sm:$0xff]  ;;  %v3629_v54 = vcombine.low %v271_v41, %v275_v42  ;;  %v3638_v55 = vcombine.high %v279_v49, %v283_v50 }
  0x91   : > { %v3640_v32 = vcombine.high %v280_v51, %v284_v52  ;;  %v3639_v0 = vcombine.low %v280_v51, %v284_v52  ;;  %v217_v52 = vld [vmem:[%s5346_s1 + $0x90] sm:$0xff] }
  0x93   : > { %1955 = vmatpush1.bf16.msra.mxu0 %v3573_v59  ;;  %1998 = vmatpush1.bf16.msra.mxu1 %v3575_v61  ;;  %v291_v59 = vld [vmem:[%s5346_s1 + $0x2e0] sm:$0xff]  ;;  %v288_v61 = vld [vmem:[%s5346_s1 + $0x2c8] sm:$0xff] }
  0x94   : > { %1956 = vmatprep.subr.bf16.mxu0 %v3582_v62  ;;  %1999 = vmatprep.subr.bf16.mxu1 %v3584_v63  ;;  %v292_v62 = vld [vmem:[%s5346_s1 + $0x2e8] sm:$0xff]  ;;  %v3637_v63 = vcombine.low %v279_v49, %v283_v50  ;;  %v3646_v2 = vcombine.high %v287_v58, %v291_v59 }
  0x95   : > { %v3648_v57 = vcombine.high %v288_v61, %v292_v62  ;;  %v3647_v56 = vcombine.low %v288_v61, %v292_v62  ;;  %v225_v62 = vld [vmem:[%s5346_s1 + $0xd0] sm:$0xff] }
  0x97   : > { %1957 = vmatpush1.bf16.msra.mxu0 %v3581_v4  ;;  %2000 = vmatpush1.bf16.msra.mxu1 %v3583_v5  ;;  %v299_v4 = vld [vmem:[%s5346_s1 + $0x320] sm:$0xff]  ;;  %v296_v5 = vld [vmem:[%s5346_s1 + $0x308] sm:$0xff] }
  0x98   : > { %1958 = vmatprep.subr.bf16.mxu0 %v3590_v6  ;;  %2001 = vmatprep.subr.bf16.mxu1 %v3592_v7  ;;  %v300_v6 = vld [vmem:[%s5346_s1 + $0x328] sm:$0xff]  ;;  %v3645_v7 = vcombine.low %v287_v58, %v291_v59  ;;  %v3654_v8 = vcombine.high %v295_v3, %v299_v4 }
  0x99   : > { %v3656_v9 = vcombine.high %v296_v5, %v300_v6  ;;  %v3655_v15 = vcombine.low %v296_v5, %v300_v6  ;;  %v233_v6 = vld [vmem:[%s5346_s1 + $0x110] sm:$0xff] }
  0x9b   : > { %1959 = vmatpush1.bf16.msra.mxu0 %v3589_v11  ;;  %2002 = vmatpush1.bf16.msra.mxu1 %v3591_v12  ;;  %v307_v11 = vld [vmem:[%s5346_s1 + $0x360] sm:$0xff]  ;;  %v304_v12 = vld [vmem:[%s5346_s1 + $0x348] sm:$0xff] }
  0x9c   : > { %1960 = vmatprep.subr.bf16.mxu0 %v3598_v13  ;;  %2003 = vmatprep.subr.bf16.mxu1 %v3600_v14  ;;  %v308_v13 = vld [vmem:[%s5346_s1 + $0x368] sm:$0xff]  ;;  %v3653_v14 = vcombine.low %v295_v3, %v299_v4  ;;  %v3662_v16 = vcombine.high %v303_v10, %v307_v11 }
  0x9d   : > { %v3664_v18 = vcombine.high %v304_v12, %v308_v13  ;;  %v3663_v24 = vcombine.low %v304_v12, %v308_v13  ;;  %v241_v13 = vld [vmem:[%s5346_s1 + $0x150] sm:$0xff] }
  0x9f   : > { %1961 = vmatpush1.bf16.msra.mxu0 %v3597_v20  ;;  %2004 = vmatpush1.bf16.msra.mxu1 %v3599_v21  ;;  %v315_v20 = vld [vmem:[%s5346_s1 + $0x3a0] sm:$0xff]  ;;  %v312_v21 = vld [vmem:[%s5346_s1 + $0x388] sm:$0xff] }
  0xa0   : > { %1962 = vmatprep.subr.bf16.mxu0 %v3606_v22  ;;  %2005 = vmatprep.subr.bf16.mxu1 %v3608_v23  ;;  %v316_v22 = vld [vmem:[%s5346_s1 + $0x3a8] sm:$0xff]  ;;  %v3661_v23 = vcombine.low %v303_v10, %v307_v11  ;;  %v3670_v25 = vcombine.high %v311_v19, %v315_v20 }
  0xa1   : > { %v3672_v26 = vcombine.high %v312_v21, %v316_v22  ;;  %v3671_v33 = vcombine.low %v312_v21, %v316_v22  ;;  %v249_v22 = vld [vmem:[%s5346_s1 + $0x190] sm:$0xff] }
  0xa3   : > { %1963 = vmatpush1.bf16.msra.mxu0 %v3605_v28  ;;  %2006 = vmatpush1.bf16.msra.mxu1 %v3607_v29  ;;  %v323_v28 = vld [vmem:[%s5346_s1 + $0x3e0] sm:$0xff]  ;;  %v320_v29 = vld [vmem:[%s5346_s1 + $0x3c8] sm:$0xff] }
  0xa4   : > { %1964 = vmatprep.subr.bf16.mxu0 %v3614_v30  ;;  %2007 = vmatprep.subr.bf16.mxu1 %v3616_v31  ;;  %v324_v30 = vld [vmem:[%s5346_s1 + $0x3e8] sm:$0xff]  ;;  %v3669_v31 = vcombine.low %v311_v19, %v315_v20  ;;  %v3678_v34 = vcombine.high %v319_v27, %v323_v28 }
  0xa5   : > { %v3680_v35 = vcombine.high %v320_v29, %v324_v30  ;;  %v3679_v41 = vcombine.low %v320_v29, %v324_v30  ;;  %v257_v30 = vld [vmem:[%s5346_s1 + $0x1d0] sm:$0xff] }
  0xa7   : > { %1965 = vmatpush1.bf16.msra.mxu0 %v3613_v37  ;;  %2008 = vmatpush1.bf16.msra.mxu1 %v3615_v38  ;;  %v205_v37 = vld [vmem:[%s5346_s1 + $0x30] sm:$0xff]  ;;  %v202_v38 = vld [vmem:[%s5346_s1 + $0x18] sm:$0xff] }
  0xa8   : > { %1966 = vmatprep.subr.bf16.mxu0 %v3622_v39  ;;  %2009 = vmatprep.subr.bf16.mxu1 %v3624_v40  ;;  %v206_v39 = vld [vmem:[%s5346_s1 + $0x38] sm:$0xff]  ;;  %v3677_v40 = vcombine.low %v319_v27, %v323_v28  ;;  %v3562_v42 = vcombine.high %v201_v36, %v205_v37 }
  0xa9   : > { %v3564_v43 = vcombine.high %v202_v38, %v206_v39  ;;  %v3563_v49 = vcombine.low %v202_v38, %v206_v39  ;;  %v265_v39 = vld [vmem:[%s5346_s1 + $0x210] sm:$0xff] }
  0xab   : > { %1967 = vmatpush1.bf16.msra.mxu0 %v3621_v45  ;;  %2010 = vmatpush1.bf16.msra.mxu1 %v3623_v46  ;;  %v213_v45 = vld [vmem:[%s5346_s1 + $0x70] sm:$0xff]  ;;  %v210_v46 = vld [vmem:[%s5346_s1 + $0x58] sm:$0xff] }
  0xac   : > { %1968 = vmatprep.subr.bf16.mxu0 %v3630_v47  ;;  %2011 = vmatprep.subr.bf16.mxu1 %v3632_v48  ;;  %v214_v47 = vld [vmem:[%s5346_s1 + $0x78] sm:$0xff]  ;;  %v3561_v48 = vcombine.low %v201_v36, %v205_v37  ;;  %v3570_v50 = vcombine.high %v209_v44, %v213_v45 }
  0xad   : > { %v3572_v51 = vcombine.high %v210_v46, %v214_v47  ;;  %v3571_v58 = vcombine.low %v210_v46, %v214_v47  ;;  %v273_v47 = vld [vmem:[%s5346_s1 + $0x250] sm:$0xff] }
  0xaf   : > { %1969 = vmatpush1.bf16.msra.mxu0 %v3629_v54  ;;  %2012 = vmatpush1.bf16.msra.mxu1 %v3631_v17  ;;  %v221_v54 = vld [vmem:[%s5346_s1 + $0xb0] sm:$0xff]  ;;  %v218_v17 = vld [vmem:[%s5346_s1 + $0x98] sm:$0xff] }
  0xb0   : > { %1970 = vmatprep.subr.bf16.mxu0 %v3638_v55  ;;  %2013 = vmatprep.subr.bf16.mxu1 %v3640_v32  ;;  %v222_v55 = vld [vmem:[%s5346_s1 + $0xb8] sm:$0xff]  ;;  %v3569_v32 = vcombine.low %v209_v44, %v213_v45  ;;  %v3578_v59 = vcombine.high %v217_v52, %v221_v54 }
  0xb1   : > { %v3580_v61 = vcombine.high %v218_v17, %v222_v55  ;;  %v3579_v3 = vcombine.low %v218_v17, %v222_v55  ;;  %v281_v55 = vld [vmem:[%s5346_s1 + $0x290] sm:$0xff] }
  0xb3   : > { %1971 = vmatpush1.bf16.msra.mxu0 %v3637_v63  ;;  %2014 = vmatpush1.bf16.msra.mxu1 %v3639_v0  ;;  %v229_v63 = vld [vmem:[%s5346_s1 + $0xf0] sm:$0xff]  ;;  %v4758_v0 = vld [vmem:[%s4180_s29 + $0x4] ss:$8 sps:$4 sm:$0xff]  }
  0xb4   : > { %1972 = vmatprep.subr.bf16.mxu0 %v3646_v2  ;;  %2015 = vmatprep.subr.bf16.mxu1 %v3648_v57  ;;  %v230_v2 = vld [vmem:[%s5346_s1 + $0xf8] sm:$0xff]  ;;  %v3577_v57 = vcombine.low %v217_v52, %v221_v54  ;;  %v3586_v4 = vcombine.high %v225_v62, %v229_v63 }
  0xb7   : > { %1973 = vmatpush1.bf16.msra.mxu0 %v3645_v7  ;;  %2016 = vmatpush1.bf16.msra.mxu1 %v3647_v56  ;;  %v237_v7 = vld [vmem:[%s5346_s1 + $0x130] sm:$0xff]  ;;  %v234_v56 = vld [vmem:[%s5346_s1 + $0x118] sm:$0xff] }
  0xb8   : > { %1974 = vmatprep.subr.bf16.mxu0 %v3654_v8  ;;  %2017 = vmatprep.subr.bf16.mxu1 %v3656_v9  ;;  %v238_v8 = vld [vmem:[%s5346_s1 + $0x138] sm:$0xff]  ;;  %v3585_v9 = vcombine.low %v225_v62, %v229_v63  ;;  %v3594_v11 = vcombine.high %v233_v6, %v237_v7 }
  0xb9   : > { %v3596_v12 = vcombine.high %v234_v56, %v238_v8  ;;  %v3595_v19 = vcombine.low %v234_v56, %v238_v8  ;;  %v297_v8 = vld [vmem:[%s5346_s1 + $0x310] sm:$0xff] }
  0xbb   : > { %1975 = vmatpush1.bf16.msra.mxu0 %v3653_v14  ;;  %2018 = vmatpush1.bf16.msra.mxu1 %v3655_v15  ;;  %v245_v14 = vld [vmem:[%s5346_s1 + $0x170] sm:$0xff]  ;;  %v242_v15 = vld [vmem:[%s5346_s1 + $0x158] sm:$0xff] }
  0xbc   : > { %1976 = vmatprep.subr.bf16.mxu0 %v3662_v16  ;;  %2019 = vmatprep.subr.bf16.mxu1 %v3664_v18  ;;  %v246_v16 = vld [vmem:[%s5346_s1 + $0x178] sm:$0xff]  ;;  %v3593_v18 = vcombine.low %v233_v6, %v237_v7  ;;  %v3602_v20 = vcombine.high %v241_v13, %v245_v14 }
  0xbd   : > { %v3604_v21 = vcombine.high %v242_v15, %v246_v16  ;;  %v3603_v27 = vcombine.low %v242_v15, %v246_v16  ;;  %v305_v16 = vld [vmem:[%s5346_s1 + $0x350] sm:$0xff] }
  0xbf   : > { %1977 = vmatpush1.bf16.msra.mxu0 %v3661_v23  ;;  %2020 = vmatpush1.bf16.msra.mxu1 %v3663_v24  ;;  %v253_v23 = vld [vmem:[%s5346_s1 + $0x1b0] sm:$0xff]  ;;  %v250_v24 = vld [vmem:[%s5346_s1 + $0x198] sm:$0xff] }
  0xc0   : > { %1978 = vmatprep.subr.bf16.mxu0 %v3670_v25  ;;  %2021 = vmatprep.subr.bf16.mxu1 %v3672_v26  ;;  %v254_v25 = vld [vmem:[%s5346_s1 + $0x1b8] sm:$0xff]  ;;  %v3601_v26 = vcombine.low %v241_v13, %v245_v14  ;;  %v3610_v28 = vcombine.high %v249_v22, %v253_v23 }
  0xc1   : > { %v3612_v29 = vcombine.high %v250_v24, %v254_v25  ;;  %v3611_v36 = vcombine.low %v250_v24, %v254_v25  ;;  %v313_v25 = vld [vmem:[%s5346_s1 + $0x390] sm:$0xff] }
  0xc3   : > { %1979 = vmatpush1.bf16.msra.mxu0 %v3669_v31  ;;  %2022 = vmatpush1.bf16.msra.mxu1 %v3671_v33  ;;  %v261_v31 = vld [vmem:[%s5346_s1 + $0x1f0] sm:$0xff]  ;;  %v258_v33 = vld [vmem:[%s5346_s1 + $0x1d8] sm:$0xff] }
  0xc4   : > { %1980 = vmatprep.subr.bf16.mxu0 %v3678_v34  ;;  %2023 = vmatprep.subr.bf16.mxu1 %v3680_v35  ;;  %v262_v34 = vld [vmem:[%s5346_s1 + $0x1f8] sm:$0xff]  ;;  %v3609_v35 = vcombine.low %v249_v22, %v253_v23  ;;  %v3618_v37 = vcombine.high %v257_v30, %v261_v31 }
  0xc5   : > { %v3620_v38 = vcombine.high %v258_v33, %v262_v34  ;;  %v3619_v44 = vcombine.low %v258_v33, %v262_v34  ;;  %v321_v34 = vld [vmem:[%s5346_s1 + $0x3d0] sm:$0xff] }
  0xc7   : > { %1981 = vmatpush1.bf16.msra.mxu0 %v3677_v40  ;;  %2024 = vmatpush1.bf16.msra.mxu1 %v3679_v41  ;;  %v269_v40 = vld [vmem:[%s5346_s1 + $0x230] sm:$0xff]  ;;  %v266_v41 = vld [vmem:[%s5346_s1 + $0x218] sm:$0xff] }
  0xc8   : > { %2036 = vmatprep.subr.bf16.mxu0 %v3562_v42  ;;  %2079 = vmatprep.subr.bf16.mxu1 %v3564_v43  ;;  %v270_v42 = vld [vmem:[%s5346_s1 + $0x238] sm:$0xff]  ;;  %v3617_v43 = vcombine.low %v257_v30, %v261_v31  ;;  %v3626_v45 = vcombine.high %v265_v39, %v269_v40 }
  0xc9   : > { %v3628_v46 = vcombine.high %v266_v41, %v270_v42  ;;  %v3627_v52 = vcombine.low %v266_v41, %v270_v42  ;;  %v3685_v42 = vld [vmem:[%s5346_s1 + $0x800] sm:$0xff] }
  0xca   : > { %1983 = vmatmul.mubr.bf16.vlgmr.msra.gmra.mrb[0].mxu0 %v4285_v53  ;;  %2026 = vmatmul.mubr.bf16.vlgmr.msra.gmra.mrb[0].mxu1 %v4285_v53  ;;  %v226_v53 = vld [vmem:[%s5346_s1 + $0xd8] sm:$0xff] }
  0xcb   : > { %2037 = vmatpush1.bf16.msra.mxu0 %v3561_v48  ;;  %2080 = vmatpush1.bf16.msra.mxu1 %v3563_v49  ;;  %v3588_v5 = vcombine.high %v226_v53, %v230_v2  ;;  %v3587_v10 = vcombine.low %v226_v53, %v230_v2  ;;  %v277_v48 = vld [vmem:[%s5346_s1 + $0x270] sm:$0xff]  ;;  %v274_v49 = vld [vmem:[%s5346_s1 + $0x258] sm:$0xff] }
  0xcc   : > { %2038 = vmatprep.subr.bf16.mxu0 %v3570_v50  ;;  %2081 = vmatprep.subr.bf16.mxu1 %v3572_v51  ;;  %v278_v50 = vld [vmem:[%s5346_s1 + $0x278] sm:$0xff]  ;;  %v3625_v51 = vcombine.low %v265_v39, %v269_v40  ;;  %v3634_v54 = vcombine.high %v273_v47, %v277_v48  ;;  %v289_v2 = vld [vmem:[%s5346_s1 + $0x2d0] sm:$0xff] }
  0xcd   : > { %2068 = vmatprep.mubr.bf16.mxu0 %v4758_v0  ;;  %2111 = vmatprep.mubr.bf16.mxu1 %v4758_v0  ;;  %v3636_v17 = vcombine.high %v274_v49, %v278_v50  ;;  %v3635_v62 = vcombine.low %v274_v49, %v278_v50  ;;  %v3693_v50 = vld [vmem:[%s5346_s1 + $0x840] sm:$0xff] }
  0xcf   : > { %2039 = vmatpush1.bf16.msra.mxu0 %v3569_v32  ;;  %2082 = vmatpush1.bf16.msra.mxu1 %v3571_v58  ;;  %v285_v32 = vld [vmem:[%s5346_s1 + $0x2b0] sm:$0xff]  ;;  %v282_v58 = vld [vmem:[%s5346_s1 + $0x298] sm:$0xff] }
  0xd0   : > { %2040 = vmatprep.subr.bf16.mxu0 %v3578_v59  ;;  %2083 = vmatprep.subr.bf16.mxu1 %v3580_v61  ;;  %v286_v59 = vld [vmem:[%s5346_s1 + $0x2b8] sm:$0xff]  ;;  %v3633_v61 = vcombine.low %v273_v47, %v277_v48  ;;  %v3642_v63 = vcombine.high %v281_v55, %v285_v32 }
  0xd1   : > { %v3644_v53 = vcombine.high %v282_v58, %v286_v59  ;;  %v3643_v6 = vcombine.low %v282_v58, %v286_v59 }
  0xd3   : > { %2041 = vmatpush1.bf16.msra.mxu0 %v3577_v57  ;;  %2084 = vmatpush1.bf16.msra.mxu1 %v3579_v3  ;;  %v293_v57 = vld [vmem:[%s5346_s1 + $0x2f0] sm:$0xff]  ;;  %v290_v3 = vld [vmem:[%s5346_s1 + $0x2d8] sm:$0xff] }
  0xd4   : > { %2042 = vmatprep.subr.bf16.mxu0 %v3586_v4  ;;  %2085 = vmatprep.subr.bf16.mxu1 %v3588_v5  ;;  %v294_v4 = vld [vmem:[%s5346_s1 + $0x2f8] sm:$0xff]  ;;  %v3641_v5 = vcombine.low %v281_v55, %v285_v32  ;;  %v3650_v7 = vcombine.high %v289_v2, %v293_v57  ;;  %v2256_v55 = vrot.slane %v4202_v60, 1  ;;  %v3702_v60 = vld [vmem:[%s5346_s1 + $0x888] sm:$0xff] }
  0xd5   : > { %v3652_v56 = vcombine.high %v290_v3, %v294_v4  ;;  %v3651_v13 = vcombine.low %v290_v3, %v294_v4 }
  0xd7   : > { %2043 = vmatpush1.bf16.msra.mxu0 %v3585_v9  ;;  %2086 = vmatpush1.bf16.msra.mxu1 %v3587_v10  ;;  %v301_v9 = vld [vmem:[%s5346_s1 + $0x330] sm:$0xff]  ;;  %v298_v10 = vld [vmem:[%s5346_s1 + $0x318] sm:$0xff] }
  0xd8   : > { %2044 = vmatprep.subr.bf16.mxu0 %v3594_v11  ;;  %2087 = vmatprep.subr.bf16.mxu1 %v3596_v12  ;;  %v302_v11 = vld [vmem:[%s5346_s1 + $0x338] sm:$0xff]  ;;  %v3649_v12 = vcombine.low %v289_v2, %v293_v57  ;;  %v3658_v14 = vcombine.high %v297_v8, %v301_v9 }
  0xd9   : > { %v3660_v15 = vcombine.high %v298_v10, %v302_v11  ;;  %v3659_v22 = vcombine.low %v298_v10, %v302_v11 }
  0xdb   : > { %2045 = vmatpush1.bf16.msra.mxu0 %v3593_v18  ;;  %2088 = vmatpush1.bf16.msra.mxu1 %v3595_v19  ;;  %v309_v18 = vld [vmem:[%s5346_s1 + $0x370] sm:$0xff]  ;;  %v306_v19 = vld [vmem:[%s5346_s1 + $0x358] sm:$0xff] }
  0xdc   : > { %2046 = vmatprep.subr.bf16.mxu0 %v3602_v20  ;;  %2089 = vmatprep.subr.bf16.mxu1 %v3604_v21  ;;  %v310_v20 = vld [vmem:[%s5346_s1 + $0x378] sm:$0xff]  ;;  %v3657_v21 = vcombine.low %v297_v8, %v301_v9  ;;  %v3666_v23 = vcombine.high %v305_v16, %v309_v18  ;;  %v3714_v8 = vld [vmem:[%s5346_s1 + $0x8e8] sm:$0xff] }
  0xdd   : > { %v3668_v24 = vcombine.high %v306_v19, %v310_v20  ;;  %v3667_v30 = vcombine.low %v306_v19, %v310_v20 }
  0xdf   : > { %2047 = vmatpush1.bf16.msra.mxu0 %v3601_v26  ;;  %2090 = vmatpush1.bf16.msra.mxu1 %v3603_v27  ;;  %v317_v26 = vld [vmem:[%s5346_s1 + $0x3b0] sm:$0xff]  ;;  %v314_v27 = vld [vmem:[%s5346_s1 + $0x398] sm:$0xff] }
  0xe0   : > { %2048 = vmatprep.subr.bf16.mxu0 %v3610_v28  ;;  %2091 = vmatprep.subr.bf16.mxu1 %v3612_v29  ;;  %v318_v28 = vld [vmem:[%s5346_s1 + $0x3b8] sm:$0xff]  ;;  %v3665_v29 = vcombine.low %v305_v16, %v309_v18  ;;  %v3674_v31 = vcombine.high %v313_v25, %v317_v26  ;;  %v3722_v16 = vld [vmem:[%s5346_s1 + $0x928] sm:$0xff] }
  0xe1   : > { %v3676_v33 = vcombine.high %v314_v27, %v318_v28  ;;  %v3675_v39 = vcombine.low %v314_v27, %v318_v28 }
  0xe3   : > { %2049 = vmatpush1.bf16.msra.mxu0 %v3609_v35  ;;  %2092 = vmatpush1.bf16.msra.mxu1 %v3611_v36  ;;  %v325_v35 = vld [vmem:[%s5346_s1 + $0x3f0] sm:$0xff]  ;;  %v322_v36 = vld [vmem:[%s5346_s1 + $0x3d8] sm:$0xff] }
  0xe4   : > { %2050 = vmatprep.subr.bf16.mxu0 %v3618_v37  ;;  %2093 = vmatprep.subr.bf16.mxu1 %v3620_v38  ;;  %v326_v37 = vld [vmem:[%s5346_s1 + $0x3f8] sm:$0xff]  ;;  %v3673_v38 = vcombine.low %v313_v25, %v317_v26  ;;  %v3682_v40 = vcombine.high %v321_v34, %v325_v35  ;;  %v3730_v25 = vld [vmem:[%s5346_s1 + $0x968] sm:$0xff] }
  0xe5   : > { %v3684_v41 = vcombine.high %v322_v36, %v326_v37  ;;  %v3683_v47 = vcombine.low %v322_v36, %v326_v37 }
  0xe7   : > { %2051 = vmatpush1.bf16.msra.mxu0 %v3617_v43  ;;  %2094 = vmatpush1.bf16.msra.mxu1 %v3619_v44  ;;  %v3689_v43 = vld [vmem:[%s5346_s1 + $0x820] sm:$0xff]  ;;  %v3686_v44 = vld [vmem:[%s5346_s1 + $0x808] sm:$0xff] }
  0xe8   : > { %2052 = vmatprep.subr.bf16.mxu0 %v3626_v45  ;;  %2095 = vmatprep.subr.bf16.mxu1 %v3628_v46  ;;  %v3690_v45 = vld [vmem:[%s5346_s1 + $0x828] sm:$0xff]  ;;  %v3681_v46 = vcombine.low %v321_v34, %v325_v35  ;;  %v3814_v48 = vcombine.high %v3685_v42, %v3689_v43  ;;  %v3813_v32 = vcombine.low %v3685_v42, %v3689_v43 }
  0xe9   : > { %v3816_v49 = vcombine.high %v3686_v44, %v3690_v45  ;;  %v3815_v58 = vcombine.low %v3686_v44, %v3690_v45  ;;  %v3738_v34 = vld [vmem:[%s5346_s1 + $0x9a8] sm:$0xff] }
  0xea   : > { %v3746_v42 = vld [vmem:[%s5346_s1 + $0x9e8] sm:$0xff] }
  0xeb   : > { %2053 = vmatpush1.bf16.msra.mxu0 %v3625_v51  ;;  %2096 = vmatpush1.bf16.msra.mxu1 %v3627_v52  ;;  %v3697_v51 = vld [vmem:[%s5346_s1 + $0x860] sm:$0xff]  ;;  %v3694_v52 = vld [vmem:[%s5346_s1 + $0x848] sm:$0xff] }
  0xec   : > { %2054 = vmatprep.subr.bf16.mxu0 %v3634_v54  ;;  %2097 = vmatprep.subr.bf16.mxu1 %v3636_v17  ;;  %v3698_v54 = vld [vmem:[%s5346_s1 + $0x868] sm:$0xff]  ;;  %v2255_v17 = vrot.slane %v4758_v0, 1  ;;  %v3822_v59 = vcombine.high %v3693_v50, %v3697_v51  ;;  %v3821_v57 = vcombine.low %v3693_v50, %v3697_v51 }
  0xed   : > { %v4945_v0 = vld [vmem:[%s4180_s29] ss:$8 sps:$4 sm:$0xff]   ;;  %v3823_v3 = vcombine.low %v3694_v52, %v3698_v54 }
  0xee   : > { %v4955_v2 = vsel %vm2251_vm1, %v2255_v17, %v2256_v55  ;;  %v3754_v50 = vld [vmem:[%s5346_s1 + $0xa28] sm:$0xff]  ;;  %v3757_v55 = vld [vmem:[%s5346_s1 + $0xa40] sm:$0xff] }
  0xef   : > { %2055 = vmatpush1.bf16.msra.mxu0 %v3633_v61  ;;  %2098 = vmatpush1.bf16.msra.mxu1 %v3635_v62  ;;  %v3824_v61 = vcombine.high %v3694_v52, %v3698_v54  ;;  %v3701_v62 = vld [vmem:[%s5346_s1 + $0x880] sm:$0xff] }
  0xf0   : > { %2056 = vmatprep.subr.bf16.mxu0 %v3642_v63  ;;  %2099 = vmatprep.subr.bf16.mxu1 %v3644_v53  ;;  %v3705_v63 = vld [vmem:[%s5346_s1 + $0x8a0] sm:$0xff]  ;;  %v3706_v53 = vld [vmem:[%s5346_s1 + $0x8a8] sm:$0xff] }
  0xf1   : > { %v3830_v4 = vcombine.high %v3701_v62, %v3705_v63  ;;  %v3829_v9 = vcombine.low %v3701_v62, %v3705_v63  ;;  %v3831_v10 = vcombine.low %v3702_v60, %v3706_v53 }
  0xf3   : > { %2057 = vmatpush1.bf16.msra.mxu0 %v3641_v5  ;;  %2100 = vmatpush1.bf16.msra.mxu1 %v3643_v6  ;;  %v3832_v5 = vcombine.high %v3702_v60, %v3706_v53  ;;  %v3709_v6 = vld [vmem:[%s5346_s1 + $0x8c0] sm:$0xff] }
  0xf4   : > { %2058 = vmatprep.subr.bf16.mxu0 %v3650_v7  ;;  %2101 = vmatprep.subr.bf16.mxu1 %v3652_v56  ;;  %v3713_v7 = vld [vmem:[%s5346_s1 + $0x8e0] sm:$0xff]  ;;  %v3710_v56 = vld [vmem:[%s5346_s1 + $0x8c8] sm:$0xff] }
  0xf5   : > { %v3838_v11 = vcombine.high %v3709_v6, %v3713_v7  ;;  %v3837_v18 = vcombine.low %v3709_v6, %v3713_v7  ;;  %v3839_v19 = vcombine.low %v3710_v56, %v3714_v8  ;;  %v3765_v53 = vld [vmem:[%s5346_s1 + $0xa80] sm:$0xff] }
  0xf7   : > { %2059 = vmatpush1.bf16.msra.mxu0 %v3649_v12  ;;  %2102 = vmatpush1.bf16.msra.mxu1 %v3651_v13  ;;  %v3840_v12 = vcombine.high %v3710_v56, %v3714_v8  ;;  %v3717_v13 = vld [vmem:[%s5346_s1 + $0x900] sm:$0xff] }
  0xf8   : > { %2060 = vmatprep.subr.bf16.mxu0 %v3658_v14  ;;  %2103 = vmatprep.subr.bf16.mxu1 %v3660_v15  ;;  %v3721_v14 = vld [vmem:[%s5346_s1 + $0x920] sm:$0xff]  ;;  %v3718_v15 = vld [vmem:[%s5346_s1 + $0x908] sm:$0xff] }
  0xf9   : > { %v3846_v20 = vcombine.high %v3717_v13, %v3721_v14  ;;  %v3845_v26 = vcombine.low %v3717_v13, %v3721_v14  ;;  %v3847_v27 = vcombine.low %v3718_v15, %v3722_v16  ;;  %v3773_v8 = vld [vmem:[%s5346_s1 + $0xac0] sm:$0xff] }
  0xfb   : > { %2061 = vmatpush1.bf16.msra.mxu0 %v3657_v21  ;;  %2104 = vmatpush1.bf16.msra.mxu1 %v3659_v22  ;;  %v3848_v21 = vcombine.high %v3718_v15, %v3722_v16  ;;  %v3725_v22 = vld [vmem:[%s5346_s1 + $0x940] sm:$0xff] }
  0xfc   : > { %2062 = vmatprep.subr.bf16.mxu0 %v3666_v23  ;;  %2105 = vmatprep.subr.bf16.mxu1 %v3668_v24  ;;  %v3729_v23 = vld [vmem:[%s5346_s1 + $0x960] sm:$0xff]  ;;  %v3726_v24 = vld [vmem:[%s5346_s1 + $0x948] sm:$0xff] }
  0xfd   : > { %v3854_v28 = vcombine.high %v3725_v22, %v3729_v23  ;;  %v3853_v35 = vcombine.low %v3725_v22, %v3729_v23  ;;  %v3855_v36 = vcombine.low %v3726_v24, %v3730_v25  ;;  %v3781_v16 = vld [vmem:[%s5346_s1 + $0xb00] sm:$0xff] }
  0xff   : > { %2063 = vmatpush1.bf16.msra.mxu0 %v3665_v29  ;;  %2106 = vmatpush1.bf16.msra.mxu1 %v3667_v30  ;;  %v3856_v29 = vcombine.high %v3726_v24, %v3730_v25  ;;  %v3733_v30 = vld [vmem:[%s5346_s1 + $0x980] sm:$0xff] }
 0x100   : > { %2064 = vmatprep.subr.bf16.mxu0 %v3674_v31  ;;  %2107 = vmatprep.subr.bf16.mxu1 %v3676_v33  ;;  %v3737_v31 = vld [vmem:[%s5346_s1 + $0x9a0] sm:$0xff]  ;;  %v3734_v33 = vld [vmem:[%s5346_s1 + $0x988] sm:$0xff] }
 0x101   : > { %v3862_v37 = vcombine.high %v3733_v30, %v3737_v31  ;;  %v3861_v43 = vcombine.low %v3733_v30, %v3737_v31  ;;  %v3863_v44 = vcombine.low %v3734_v33, %v3738_v34  ;;  %v3789_v25 = vld [vmem:[%s5346_s1 + $0xb40] sm:$0xff] }
 0x103   : > { %2065 = vmatpush1.bf16.msra.mxu0 %v3673_v38  ;;  %2108 = vmatpush1.bf16.msra.mxu1 %v3675_v39  ;;  %v3864_v38 = vcombine.high %v3734_v33, %v3738_v34  ;;  %v3741_v39 = vld [vmem:[%s5346_s1 + $0x9c0] sm:$0xff] }
 0x104   : > { %2066 = vmatprep.subr.bf16.mxu0 %v3682_v40  ;;  %2109 = vmatprep.subr.bf16.mxu1 %v3684_v41  ;;  %v3745_v40 = vld [vmem:[%s5346_s1 + $0x9e0] sm:$0xff]  ;;  %v3742_v41 = vld [vmem:[%s5346_s1 + $0x9c8] sm:$0xff] }
 0x105   : > { %v3870_v45 = vcombine.high %v3741_v39, %v3745_v40  ;;  %v3869_v51 = vcombine.low %v3741_v39, %v3745_v40  ;;  %v3871_v52 = vcombine.low %v3742_v41, %v3746_v42  ;;  %v3797_v34 = vld [vmem:[%s5346_s1 + $0xb80] sm:$0xff] }
 0x107   : > { %2067 = vmatpush1.bf16.msra.mxu0 %v3681_v46  ;;  %2110 = vmatpush1.bf16.msra.mxu1 %v3683_v47  ;;  %v3872_v46 = vcombine.high %v3742_v41, %v3746_v42  ;;  %v3749_v47 = vld [vmem:[%s5346_s1 + $0xa00] sm:$0xff] }
 0x108   : > { %2900 = vmatprep.subr.bf16.mxu0 %v3814_v48  ;;  %2943 = vmatprep.subr.bf16.mxu1 %v3816_v49  ;;  %v3753_v48 = vld [vmem:[%s5346_s1 + $0xa20] sm:$0xff]  ;;  %v3750_v49 = vld [vmem:[%s5346_s1 + $0xa08] sm:$0xff] }
 0x109   : > { %v3878_v54 = vcombine.high %v3749_v47, %v3753_v48  ;;  %v3880_v17 = vcombine.high %v3750_v49, %v3754_v50  ;;  %v3879_v62 = vcombine.low %v3750_v49, %v3754_v50  ;;  %v3805_v42 = vld [vmem:[%s5346_s1 + $0xbc0] sm:$0xff]  ;;  %v3687_v50 = vld [vmem:[%s5346_s1 + $0x810] sm:$0xff] }
 0x10a   : > { %2069 = vmatmul.mubr.bf16.vlgmr.msra.gmra.mrb[4].mxu0 %v4945_v0  ;;  %2112 = vmatmul.mubr.bf16.vlgmr.msra.gmra.mrb[4].mxu1 %v4945_v0 }
 0x10b   : > { %2901 = vmatpush1.bf16.msra.mxu0 %v3813_v32  ;;  %2944 = vmatpush1.bf16.msra.mxu1 %v3815_v58  ;;  %v3761_v32 = vld [vmem:[%s5346_s1 + $0xa60] sm:$0xff]  ;;  %v3758_v58 = vld [vmem:[%s5346_s1 + $0xa48] sm:$0xff] }
 0x10c   : > { %2902 = vmatprep.subr.bf16.mxu0 %v3822_v59  ;;  %2945 = vmatprep.subr.bf16.mxu1 %v3824_v61  ;;  %v3762_v59 = vld [vmem:[%s5346_s1 + $0xa68] sm:$0xff]  ;;  %v3877_v61 = vcombine.low %v3749_v47, %v3753_v48  ;;  %v3886_v63 = vcombine.high %v3757_v55, %v3761_v32 }
 0x10d   : > { %2932 = vmatprep.mubr.bf16.mxu0 %v4955_v2  ;;  %2975 = vmatprep.mubr.bf16.mxu1 %v4955_v2  ;;  %v3888_v60 = vcombine.high %v3758_v58, %v3762_v59  ;;  %v3887_v6 = vcombine.low %v3758_v58, %v3762_v59 }
 0x10f   : > { %2903 = vmatpush1.bf16.msra.mxu0 %v3821_v57  ;;  %2946 = vmatpush1.bf16.msra.mxu1 %v3823_v3  ;;  %v3769_v57 = vld [vmem:[%s5346_s1 + $0xaa0] sm:$0xff]  ;;  %v3766_v3 = vld [vmem:[%s5346_s1 + $0xa88] sm:$0xff] }
 0x110   : > { %2904 = vmatprep.subr.bf16.mxu0 %v3830_v4  ;;  %2947 = vmatprep.subr.bf16.mxu1 %v3832_v5  ;;  %v3770_v4 = vld [vmem:[%s5346_s1 + $0xaa8] sm:$0xff]  ;;  %v3885_v5 = vcombine.low %v3757_v55, %v3761_v32  ;;  %v3894_v7 = vcombine.high %v3765_v53, %v3769_v57  ;;  %v2252_v55 = vrot.slane %v4945_v0, 1  ;;  %v2253_v32 = vrot.slane %v4301_v1, 1  ;;  %v3696_v0 = vld [vmem:[%s5346_s1 + $0x858] sm:$0xff] }
 0x111   : > { %v3896_v56 = vcombine.high %v3766_v3, %v3770_v4  ;;  %v3895_v13 = vcombine.low %v3766_v3, %v3770_v4  ;;  %v3700_v1 = vld [vmem:[%s5346_s1 + $0x878] sm:$0xff] }
 0x112   : > { %v3828_v4 = vcombine.high %v3696_v0, %v3700_v1 }
 0x113   : > { %2905 = vmatpush1.bf16.msra.mxu0 %v3829_v9  ;;  %2948 = vmatpush1.bf16.msra.mxu1 %v3831_v10  ;;  %v3777_v9 = vld [vmem:[%s5346_s1 + $0xae0] sm:$0xff]  ;;  %v3774_v10 = vld [vmem:[%s5346_s1 + $0xac8] sm:$0xff] }
 0x114   : > { %2906 = vmatprep.subr.bf16.mxu0 %v3838_v11  ;;  %2949 = vmatprep.subr.bf16.mxu1 %v3840_v12  ;;  %v3778_v11 = vld [vmem:[%s5346_s1 + $0xae8] sm:$0xff]  ;;  %v3893_v12 = vcombine.low %v3765_v53, %v3769_v57  ;;  %v3902_v14 = vcombine.high %v3773_v8, %v3777_v9 }
 0x115   : > { %v3904_v15 = vcombine.high %v3774_v10, %v3778_v11  ;;  %v3903_v22 = vcombine.low %v3774_v10, %v3778_v11 }
 0x117   : > { %2907 = vmatpush1.bf16.msra.mxu0 %v3837_v18  ;;  %2950 = vmatpush1.bf16.msra.mxu1 %v3839_v19  ;;  %v3785_v18 = vld [vmem:[%s5346_s1 + $0xb20] sm:$0xff]  ;;  %v3782_v19 = vld [vmem:[%s5346_s1 + $0xb08] sm:$0xff] }
 0x118   : > { %2908 = vmatprep.subr.bf16.mxu0 %v3846_v20  ;;  %2951 = vmatprep.subr.bf16.mxu1 %v3848_v21  ;;  %v3786_v20 = vld [vmem:[%s5346_s1 + $0xb28] sm:$0xff]  ;;  %v3901_v21 = vcombine.low %v3773_v8, %v3777_v9  ;;  %v3910_v23 = vcombine.high %v3781_v16, %v3785_v18  ;;  %v3827_v9 = vcombine.low %v3696_v0, %v3700_v1  ;;  %v3763_v0 = vld [vmem:[%s5346_s1 + $0xa70] sm:$0xff]  ;;  %v3760_v1 = vld [vmem:[%s5346_s1 + $0xa58] sm:$0xff] }
 0x119   : > { %v3912_v24 = vcombine.high %v3782_v19, %v3786_v20  ;;  %v3911_v30 = vcombine.low %v3782_v19, %v3786_v20 }
 0x11b   : > { %2909 = vmatpush1.bf16.msra.mxu0 %v3845_v26  ;;  %2952 = vmatpush1.bf16.msra.mxu1 %v3847_v27  ;;  %v3793_v26 = vld [vmem:[%s5346_s1 + $0xb60] sm:$0xff]  ;;  %v3790_v27 = vld [vmem:[%s5346_s1 + $0xb48] sm:$0xff] }
 0x11c   : > { %2910 = vmatprep.subr.bf16.mxu0 %v3854_v28  ;;  %2953 = vmatprep.subr.bf16.mxu1 %v3856_v29  ;;  %v3794_v28 = vld [vmem:[%s5346_s1 + $0xb68] sm:$0xff]  ;;  %v3909_v29 = vcombine.low %v3781_v16, %v3785_v18  ;;  %v3918_v31 = vcombine.high %v3789_v25, %v3793_v26 }
 0x11d   : > { %v3920_v33 = vcombine.high %v3790_v27, %v3794_v28  ;;  %v3919_v39 = vcombine.low %v3790_v27, %v3794_v28  ;;  %v3727_v28 = vld [vmem:[%s5346_s1 + $0x950] sm:$0xff] }
 0x11f   : > { %2911 = vmatpush1.bf16.msra.mxu0 %v3853_v35  ;;  %2954 = vmatpush1.bf16.msra.mxu1 %v3855_v36  ;;  %v3801_v35 = vld [vmem:[%s5346_s1 + $0xba0] sm:$0xff]  ;;  %v3798_v36 = vld [vmem:[%s5346_s1 + $0xb88] sm:$0xff] }
 0x120   : > { %2912 = vmatprep.subr.bf16.mxu0 %v3862_v37  ;;  %2955 = vmatprep.subr.bf16.mxu1 %v3864_v38  ;;  %v3802_v37 = vld [vmem:[%s5346_s1 + $0xba8] sm:$0xff]  ;;  %v3917_v38 = vcombine.low %v3789_v25, %v3793_v26  ;;  %v3926_v40 = vcombine.high %v3797_v34, %v3801_v35 }
 0x121   : > { %v3928_v41 = vcombine.high %v3798_v36, %v3802_v37  ;;  %v3927_v47 = vcombine.low %v3798_v36, %v3802_v37  ;;  %v3735_v37 = vld [vmem:[%s5346_s1 + $0x990] sm:$0xff] }
 0x123   : > { %2913 = vmatpush1.bf16.msra.mxu0 %v3861_v43  ;;  %2956 = vmatpush1.bf16.msra.mxu1 %v3863_v44  ;;  %v3809_v43 = vld [vmem:[%s5346_s1 + $0xbe0] sm:$0xff]  ;;  %v3806_v44 = vld [vmem:[%s5346_s1 + $0xbc8] sm:$0xff] }
 0x124   : > { %2914 = vmatprep.subr.bf16.mxu0 %v3870_v45  ;;  %2957 = vmatprep.subr.bf16.mxu1 %v3872_v46  ;;  %v3810_v45 = vld [vmem:[%s5346_s1 + $0xbe8] sm:$0xff]  ;;  %v3925_v46 = vcombine.low %v3797_v34, %v3801_v35  ;;  %v3934_v48 = vcombine.high %v3805_v42, %v3809_v43 }
 0x125   : > { %v3936_v49 = vcombine.high %v3806_v44, %v3810_v45  ;;  %v3935_v58 = vcombine.low %v3806_v44, %v3810_v45  ;;  %v3743_v45 = vld [vmem:[%s5346_s1 + $0x9d0] sm:$0xff] }
 0x127   : > { %2915 = vmatpush1.bf16.msra.mxu0 %v3869_v51  ;;  %2958 = vmatpush1.bf16.msra.mxu1 %v3871_v52  ;;  %v3691_v51 = vld [vmem:[%s5346_s1 + $0x830] sm:$0xff]  ;;  %v3688_v52 = vld [vmem:[%s5346_s1 + $0x818] sm:$0xff] }
 0x128   : > { %2916 = vmatprep.subr.bf16.mxu0 %v3878_v54  ;;  %2959 = vmatprep.subr.bf16.mxu1 %v3880_v17  ;;  %v3692_v54 = vld [vmem:[%s5346_s1 + $0x838] sm:$0xff]  ;;  %v3933_v17 = vcombine.low %v3805_v42, %v3809_v43  ;;  %v3818_v59 = vcombine.high %v3687_v50, %v3691_v51  ;;  %v3817_v53 = vcombine.low %v3687_v50, %v3691_v51 }
 0x129   : > { %v3819_v57 = vcombine.low %v3688_v52, %v3692_v54 }
 0x12b   : > { %2917 = vmatpush1.bf16.msra.mxu0 %v3877_v61  ;;  %2960 = vmatpush1.bf16.msra.mxu1 %v3879_v62  ;;  %v3820_v61 = vcombine.high %v3688_v52, %v3692_v54  ;;  %v3695_v62 = vld [vmem:[%s5346_s1 + $0x850] sm:$0xff] }
 0x12c   : > { %2918 = vmatprep.subr.bf16.mxu0 %v3886_v63  ;;  %2961 = vmatprep.subr.bf16.mxu1 %v3888_v60  ;;  %v3699_v63 = vld [vmem:[%s5346_s1 + $0x870] sm:$0xff]  ;;  %v5143_v60 = vsel %vm2251_vm1, %v2252_v55, %v2253_v32  ;;  %v3752_v55 = vld [vmem:[%s5346_s1 + $0xa18] sm:$0xff] }
 0x12d   : > { %v3826_v3 = vcombine.high %v3695_v62, %v3699_v63  ;;  %v3825_v8 = vcombine.low %v3695_v62, %v3699_v63  ;;  %v3751_v54 = vld [vmem:[%s5346_s1 + $0xa10] sm:$0xff]  ;;  %v3756_v32 = vld [vmem:[%s5346_s1 + $0xa38] sm:$0xff] }
 0x12e   : > { %v3884_v62 = vcombine.high %v3752_v55, %v3756_v32  ;;  %v3759_v63 = vld [vmem:[%s5346_s1 + $0xa50] sm:$0xff] }
 0x12f   : > { %2919 = vmatpush1.bf16.msra.mxu0 %v3885_v5  ;;  %2962 = vmatpush1.bf16.msra.mxu1 %v3887_v6  ;;  %v3703_v5 = vld [vmem:[%s5346_s1 + $0x890] sm:$0xff] }
 0x130   : > { %2920 = vmatprep.subr.bf16.mxu0 %v3894_v7  ;;  %2963 = vmatprep.subr.bf16.mxu1 %v3896_v56  ;;  %v3707_v6 = vld [vmem:[%s5346_s1 + $0x8b0] sm:$0xff]  ;;  %v3704_v7 = vld [vmem:[%s5346_s1 + $0x898] sm:$0xff] }
 0x131   : > { %v3708_v56 = vld [vmem:[%s5346_s1 + $0x8b8] sm:$0xff]  ;;  %v3834_v10 = vcombine.high %v3703_v5, %v3707_v6  ;;  %v3833_v16 = vcombine.low %v3703_v5, %v3707_v6  ;;  %v3767_v6 = vld [vmem:[%s5346_s1 + $0xa90] sm:$0xff] }
 0x132   : > { %v3836_v11 = vcombine.high %v3704_v7, %v3708_v56  ;;  %v3835_v18 = vcombine.low %v3704_v7, %v3708_v56  ;;  %v3771_v7 = vld [vmem:[%s5346_s1 + $0xab0] sm:$0xff]  ;;  %v3768_v56 = vld [vmem:[%s5346_s1 + $0xa98] sm:$0xff] }
 0x133   : > { %2921 = vmatpush1.bf16.msra.mxu0 %v3893_v12  ;;  %2964 = vmatpush1.bf16.msra.mxu1 %v3895_v13  ;;  %v3711_v12 = vld [vmem:[%s5346_s1 + $0x8d0] sm:$0xff] }
 0x134   : > { %2922 = vmatprep.subr.bf16.mxu0 %v3902_v14  ;;  %2965 = vmatprep.subr.bf16.mxu1 %v3904_v15  ;;  %v3715_v13 = vld [vmem:[%s5346_s1 + $0x8f0] sm:$0xff]  ;;  %v3712_v14 = vld [vmem:[%s5346_s1 + $0x8d8] sm:$0xff] }
 0x135   : > { %v3716_v15 = vld [vmem:[%s5346_s1 + $0x8f8] sm:$0xff]  ;;  %v3842_v19 = vcombine.high %v3711_v12, %v3715_v13 }
 0x136   : > { %v3844_v20 = vcombine.high %v3712_v14, %v3716_v15  ;;  %v3843_v25 = vcombine.low %v3712_v14, %v3716_v15  ;;  %v3779_v14 = vld [vmem:[%s5346_s1 + $0xaf0] sm:$0xff]  ;;  %v3776_v15 = vld [vmem:[%s5346_s1 + $0xad8] sm:$0xff] }
 0x137   : > { %2923 = vmatpush1.bf16.msra.mxu0 %v3901_v21  ;;  %2966 = vmatpush1.bf16.msra.mxu1 %v3903_v22  ;;  %v3719_v21 = vld [vmem:[%s5346_s1 + $0x910] sm:$0xff] }
 0x138   : > { %2924 = vmatprep.subr.bf16.mxu0 %v3910_v23  ;;  %2967 = vmatprep.subr.bf16.mxu1 %v3912_v24  ;;  %v3723_v22 = vld [vmem:[%s5346_s1 + $0x930] sm:$0xff]  ;;  %v3724_v23 = vld [vmem:[%s5346_s1 + $0x938] sm:$0xff]  ;;  %v3841_v24 = vcombine.low %v3711_v12, %v3715_v13 }
 0x139   : > { %v3850_v26 = vcombine.high %v3719_v21, %v3723_v22  ;;  %v3775_v13 = vld [vmem:[%s5346_s1 + $0xad0] sm:$0xff] }
 0x13b   : > { %2925 = vmatpush1.bf16.msra.mxu0 %v3909_v29  ;;  %2968 = vmatpush1.bf16.msra.mxu1 %v3911_v30  ;;  %v3731_v29 = vld [vmem:[%s5346_s1 + $0x970] sm:$0xff]  ;;  %v3728_v30 = vld [vmem:[%s5346_s1 + $0x958] sm:$0xff] }
 0x13c   : > { %2926 = vmatprep.subr.bf16.mxu0 %v3918_v31  ;;  %2969 = vmatprep.subr.bf16.mxu1 %v3920_v33  ;;  %v3732_v31 = vld [vmem:[%s5346_s1 + $0x978] sm:$0xff]  ;;  %v3849_v33 = vcombine.low %v3719_v21, %v3723_v22  ;;  %v3858_v35 = vcombine.high %v3727_v28, %v3731_v29  ;;  %v3783_v22 = vld [vmem:[%s5346_s1 + $0xb10] sm:$0xff] }
 0x13d   : > { %v3860_v36 = vcombine.high %v3728_v30, %v3732_v31  ;;  %v3859_v42 = vcombine.low %v3728_v30, %v3732_v31  ;;  %v3795_v30 = vld [vmem:[%s5346_s1 + $0xb70] sm:$0xff]  ;;  %v3792_v31 = vld [vmem:[%s5346_s1 + $0xb58] sm:$0xff] }
 0x13f   : > { %2927 = vmatpush1.bf16.msra.mxu0 %v3917_v38  ;;  %2970 = vmatpush1.bf16.msra.mxu1 %v3919_v39  ;;  %v3739_v38 = vld [vmem:[%s5346_s1 + $0x9b0] sm:$0xff]  ;;  %v3736_v39 = vld [vmem:[%s5346_s1 + $0x998] sm:$0xff] }
 0x140   : > { %2928 = vmatprep.subr.bf16.mxu0 %v3926_v40  ;;  %2971 = vmatprep.subr.bf16.mxu1 %v3928_v41  ;;  %v3740_v40 = vld [vmem:[%s5346_s1 + $0x9b8] sm:$0xff]  ;;  %v3857_v41 = vcombine.low %v3727_v28, %v3731_v29  ;;  %v3866_v43 = vcombine.high %v3735_v37, %v3739_v38  ;;  %v3791_v29 = vld [vmem:[%s5346_s1 + $0xb50] sm:$0xff] }
 0x141   : > { %v3868_v44 = vcombine.high %v3736_v39, %v3740_v40  ;;  %v3867_v50 = vcombine.low %v3736_v39, %v3740_v40  ;;  %v3803_v39 = vld [vmem:[%s5346_s1 + $0xbb0] sm:$0xff]  ;;  %v3800_v40 = vld [vmem:[%s5346_s1 + $0xb98] sm:$0xff] }
 0x143   : > { %2929 = vmatpush1.bf16.msra.mxu0 %v3925_v46  ;;  %2972 = vmatpush1.bf16.msra.mxu1 %v3927_v47  ;;  %v3747_v46 = vld [vmem:[%s5346_s1 + $0x9f0] sm:$0xff]  ;;  %v3744_v47 = vld [vmem:[%s5346_s1 + $0x9d8] sm:$0xff] }
 0x144   : > { %2930 = vmatprep.subr.bf16.mxu0 %v3934_v48  ;;  %2973 = vmatprep.subr.bf16.mxu1 %v3936_v49  ;;  %v3748_v48 = vld [vmem:[%s5346_s1 + $0x9f8] sm:$0xff]  ;;  %v3865_v49 = vcombine.low %v3735_v37, %v3739_v38  ;;  %v3874_v51 = vcombine.high %v3743_v45, %v3747_v46  ;;  %v3799_v38 = vld [vmem:[%s5346_s1 + $0xb90] sm:$0xff] }
 0x145   : > { %v3876_v52 = vcombine.high %v3744_v47, %v3748_v48 }
 0x147   : > { %2931 = vmatpush1.bf16.msra.mxu0 %v3933_v17  ;;  %2974 = vmatpush1.bf16.msra.mxu1 %v3935_v58  ;;  %v3755_v17 = vld [vmem:[%s5346_s1 + $0xa30] sm:$0xff]  ;;  %v3873_v58 = vcombine.low %v3743_v45, %v3747_v46 }
 0x148   : > { %2986 = vmatprep.subr.bf16.mxu0 %v3818_v59  ;;  %3029 = vmatprep.subr.bf16.mxu1 %v3820_v61  ;;  %v3875_v59 = vcombine.low %v3744_v47, %v3748_v48  ;;  %v3882_v61 = vcombine.high %v3751_v54, %v3755_v17  ;;  %v3807_v46 = vld [vmem:[%s5346_s1 + $0xbd0] sm:$0xff]  ;;  %v3808_v48 = vld [vmem:[%s5346_s1 + $0xbd8] sm:$0xff] }
 0x149   : > { %v3811_v47 = vld [vmem:[%s5346_s1 + $0xbf0] sm:$0xff] }
 0x14a   : > { %2933 = vmatmul.mubr.bf16.vlgmr.msra.gmra.mrb[0].mxu0 %v5143_v60  ;;  %2976 = vmatmul.mubr.bf16.vlgmr.msra.gmra.mrb[0].mxu1 %v5143_v60 }
 0x14b   : > { %2987 = vmatpush1.bf16.msra.mxu0 %v3817_v53  ;;  %3030 = vmatpush1.bf16.msra.mxu1 %v3819_v57  ;;  %v3764_v53 = vld [vmem:[%s5346_s1 + $0xa78] sm:$0xff]  ;;  %v3881_v57 = vcombine.low %v3751_v54, %v3755_v17  ;;  %v3937_v17 = vcombine.low %v3807_v46, %v3811_v47 }
 0x14c   : > { %2988 = vmatprep.subr.bf16.mxu0 %v3826_v3  ;;  %3031 = vmatprep.subr.bf16.mxu1 %v3828_v4  ;;  %v3883_v3 = vcombine.low %v3752_v55, %v3756_v32  ;;  %v3890_v4 = vcombine.high %v3759_v63, %v3763_v0  ;;  %v3892_v5 = vcombine.high %v3760_v1, %v3764_v53  ;;  %v3090_v32 = vlaneseq }
 0x14d   : > { %3018 = vmatprep.mubr.bf16.mxu0 %v4955_v2  ;;  %3061 = vmatprep.mubr.bf16.mxu1 %v4955_v2  ;;  %v3720_v2 = vld [vmem:[%s5346_s1 + $0x918] sm:$0xff] }
 0x14e   : > { %v3852_v27 = vcombine.high %v3720_v2, %v3724_v23  ;;  %v3851_v34 = vcombine.low %v3720_v2, %v3724_v23  ;;  %v3787_v2 = vld [vmem:[%s5346_s1 + $0xb30] sm:$0xff]  ;;  %v3784_v23 = vld [vmem:[%s5346_s1 + $0xb18] sm:$0xff] }
 0x14f   : > { %2989 = vmatpush1.bf16.msra.mxu0 %v3825_v8  ;;  %3032 = vmatpush1.bf16.msra.mxu1 %v3827_v9  ;;  %v3772_v8 = vld [vmem:[%s5346_s1 + $0xab8] sm:$0xff]  ;;  %v3889_v9 = vcombine.low %v3759_v63, %v3763_v0 }
 0x150   : > { %2990 = vmatprep.subr.bf16.mxu0 %v3834_v10  ;;  %3033 = vmatprep.subr.bf16.mxu1 %v3836_v11  ;;  %v3891_v10 = vcombine.low %v3760_v1, %v3764_v53  ;;  %v3898_v11 = vcombine.high %v3767_v6, %v3771_v7  ;;  %v3900_v12 = vcombine.high %v3768_v56, %v3772_v8 }
 0x153   : > { %2991 = vmatpush1.bf16.msra.mxu0 %v3833_v16  ;;  %3034 = vmatpush1.bf16.msra.mxu1 %v3835_v18  ;;  %v3780_v16 = vld [vmem:[%s5346_s1 + $0xaf8] sm:$0xff]  ;;  %v3897_v18 = vcombine.low %v3767_v6, %v3771_v7 }
 0x154   : > { %2992 = vmatprep.subr.bf16.mxu0 %v3842_v19  ;;  %3035 = vmatprep.subr.bf16.mxu1 %v3844_v20  ;;  %v3899_v19 = vcombine.low %v3768_v56, %v3772_v8  ;;  %v3906_v20 = vcombine.high %v3775_v13, %v3779_v14  ;;  %v3908_v21 = vcombine.high %v3776_v15, %v3780_v16 }
 0x157   : > { %2993 = vmatpush1.bf16.msra.mxu0 %v3841_v24  ;;  %3036 = vmatpush1.bf16.msra.mxu1 %v3843_v25  ;;  %v3788_v24 = vld [vmem:[%s5346_s1 + $0xb38] sm:$0xff]  ;;  %v3905_v25 = vcombine.low %v3775_v13, %v3779_v14 }
 0x158   : > { %2994 = vmatprep.subr.bf16.mxu0 %v3850_v26  ;;  %3037 = vmatprep.subr.bf16.mxu1 %v3852_v27  ;;  %v3907_v26 = vcombine.low %v3776_v15, %v3780_v16  ;;  %v3914_v27 = vcombine.high %v3783_v22, %v3787_v2  ;;  %v3916_v28 = vcombine.high %v3784_v23, %v3788_v24 }
 0x15b   : > { %2995 = vmatpush1.bf16.msra.mxu0 %v3849_v33  ;;  %3038 = vmatpush1.bf16.msra.mxu1 %v3851_v34  ;;  %v3796_v33 = vld [vmem:[%s5346_s1 + $0xb78] sm:$0xff]  ;;  %v3913_v34 = vcombine.low %v3783_v22, %v3787_v2 }
 0x15c   : > { %2996 = vmatprep.subr.bf16.mxu0 %v3858_v35  ;;  %3039 = vmatprep.subr.bf16.mxu1 %v3860_v36  ;;  %v3915_v35 = vcombine.low %v3784_v23, %v3788_v24  ;;  %v3922_v36 = vcombine.high %v3791_v29, %v3795_v30  ;;  %v3924_v37 = vcombine.high %v3792_v31, %v3796_v33 }
 0x15f   : > { %2997 = vmatpush1.bf16.msra.mxu0 %v3857_v41  ;;  %3040 = vmatpush1.bf16.msra.mxu1 %v3859_v42  ;;  %v3804_v41 = vld [vmem:[%s5346_s1 + $0xbb8] sm:$0xff]  ;;  %v3921_v42 = vcombine.low %v3791_v29, %v3795_v30 }
 0x160   : > { %2998 = vmatprep.subr.bf16.mxu0 %v3866_v43  ;;  %3041 = vmatprep.subr.bf16.mxu1 %v3868_v44  ;;  %v3923_v43 = vcombine.low %v3792_v31, %v3796_v33  ;;  %v3930_v44 = vcombine.high %v3799_v38, %v3803_v39  ;;  %v3932_v45 = vcombine.high %v3800_v40, %v3804_v41 }
 0x163   : > { %2999 = vmatpush1.bf16.msra.mxu0 %v3865_v49  ;;  %3042 = vmatpush1.bf16.msra.mxu1 %v3867_v50  ;;  %v3812_v49 = vld [vmem:[%s5346_s1 + $0xbf8] sm:$0xff]  ;;  %v3929_v50 = vcombine.low %v3799_v38, %v3803_v39 }
 0x164   : > { %3000 = vmatprep.subr.bf16.mxu0 %v3874_v51  ;;  %3043 = vmatprep.subr.bf16.mxu1 %v3876_v52  ;;  %v3931_v51 = vcombine.low %v3800_v40, %v3804_v41  ;;  %v3938_v52 = vcombine.high %v3807_v46, %v3811_v47  ;;  %v3940_v54 = vcombine.high %v3808_v48, %v3812_v49 }
 0x165   : > { %v3939_v55 = vcombine.low %v3808_v48, %v3812_v49 }
 0x167   : > { %3001 = vmatpush1.bf16.msra.mxu0 %v3873_v58  ;;  %3044 = vmatpush1.bf16.msra.mxu1 %v3875_v59  ;;  %v3091_v58 = vshrl.u32 %v3090_v32, 7 }
 0x168   : > { %3002 = vmatprep.subr.bf16.mxu0 %v3882_v61  ;;  %3045 = vmatprep.subr.bf16.mxu1 %v3884_v62  ;;  %v3088_v61 = vld [vmem:[%s5347_s2] sm:$0xff] }
 0x169   : > { %v3092_v59 = vsub.s32 0, %v3091_v58  ;;  %v3100_v62 = vsub.s32 2, %v3091_v58  ;;  %v3096_v63 = vsub.s32 1, %v3091_v58  ;;  %v3104_v0 = vsub.s32 3, %v3091_v58 }
 0x16a   : > { %v3108_v2 = vsub.s32 4, %v3091_v58  ;;  %v3116_v23 = vsub.s32 6, %v3091_v58  ;;  %v3112_v24 = vsub.s32 5, %v3091_v58 }
 0x16b   : > { %3003 = vmatpush1.bf16.msra.mxu0 %v3881_v57  ;;  %3046 = vmatpush1.bf16.msra.mxu1 %v3883_v3  ;;  %v3093_v1 = vrot.slane %v3088_v61, %v3092_v59  ;;  %v3101_v53 = vrot.slane %v3088_v61, %v3100_v62  ;;  %v3097_v57 = vrot.slane %v3088_v61, %v3096_v63 }
 0x16c   : > { %3004 = vmatprep.subr.bf16.mxu0 %v3890_v4  ;;  %3047 = vmatprep.subr.bf16.mxu1 %v3892_v5  ;;  %v3105_v3 = vrot.slane %v3088_v61, %v3104_v0 }
 0x16f   : > { %3005 = vmatpush1.bf16.msra.mxu0 %v3889_v9  ;;  %3048 = vmatpush1.bf16.msra.mxu1 %v3891_v10 }
 0x170   : > { %3006 = vmatprep.subr.bf16.mxu0 %v3898_v11  ;;  %3049 = vmatprep.subr.bf16.mxu1 %v3900_v12 }
 0x173   : > { %3007 = vmatpush1.bf16.msra.mxu0 %v3897_v18  ;;  %3050 = vmatpush1.bf16.msra.mxu1 %v3899_v19 }
 0x174   : > { %3008 = vmatprep.subr.bf16.mxu0 %v3906_v20  ;;  %3051 = vmatprep.subr.bf16.mxu1 %v3908_v21 }
 0x177   : > { %3009 = vmatpush1.bf16.msra.mxu0 %v3905_v25  ;;  %3052 = vmatpush1.bf16.msra.mxu1 %v3907_v26  ;;  %v3120_v25 = vsub.s32 7, %v3091_v58  ;;  %v3109_v26 = vrot.slane %v3088_v61, %v3108_v2 }
 0x178   : > { %3010 = vmatprep.subr.bf16.mxu0 %v3914_v27  ;;  %3053 = vmatprep.subr.bf16.mxu1 %v3916_v28  ;;  %v3117_v27 = vrot.slane %v3088_v61, %v3116_v23  ;;  %v3113_v28 = vrot.slane %v3088_v61, %v3112_v24 }
 0x179   : > { %v3121_v29 = vrot.slane %v3088_v61, %v3120_v25 }
 0x17b   : > { %3011 = vmatpush1.bf16.msra.mxu0 %v3913_v34  ;;  %3054 = vmatpush1.bf16.msra.mxu1 %v3915_v35 }
 0x17c   : > { %3012 = vmatprep.subr.bf16.mxu0 %v3922_v36  ;;  %3055 = vmatprep.subr.bf16.mxu1 %v3924_v37 }
 0x17f   : > { %3013 = vmatpush1.bf16.msra.mxu0 %v3921_v42  ;;  %3056 = vmatpush1.bf16.msra.mxu1 %v3923_v43 }
 0x180   : > { %3014 = vmatprep.subr.bf16.mxu0 %v3930_v44  ;;  %3057 = vmatprep.subr.bf16.mxu1 %v3932_v45 }
 0x183   : > { %3015 = vmatpush1.bf16.msra.mxu0 %v3929_v50  ;;  %3058 = vmatpush1.bf16.msra.mxu1 %v3931_v51 }
 0x184   : > { %3016 = vmatprep.subr.bf16.mxu0 %v3938_v52  ;;  %3059 = vmatprep.subr.bf16.mxu1 %v3940_v54 }
 0x187   : > { %3017 = vmatpush1.bf16.msra.mxu0 %v3937_v17  ;;  %3060 = vmatpush1.bf16.msra.mxu1 %v3939_v55 }
 0x18a   : > { %3019 = vmatmul.mubr.bf16.vlgmr.msra.gmra.mrb[4].mxu0 %v5143_v60  ;;  %3062 = vmatmul.mubr.bf16.vlgmr.msra.gmra.mrb[4].mxu1 %v5143_v60 }
 0x21d   : > { %v2934_v4 = vpop.f32.mrb[0].mxu0  ;;  %v2977_v6 = vpop.f32.mrb[0].mxu1 }
 0x21e   : > { %v3130_v5 = vadd.f32 %v3093_v1, %v2934_v4  ;;  %v2936_v7 = vpop.f32.mrb[1].mxu0  ;;  %v3132_v60 = vadd.f32 %v3101_v53, %v2977_v6  ;;  %v2979_v8 = vpop.f32.mrb[1].mxu1 }
 0x21f   : > { %v3131_v56 = vadd.f32 %v3097_v57, %v2936_v7  ;;  %v2938_v9 = vpop.f32.mrb[2].mxu0  ;;  %v3133_v10 = vadd.f32 %v3105_v3, %v2979_v8  ;;  %v2981_v12 = vpop.f32.mrb[2].mxu1 }
 0x220   : > { %v3138_v11 = vadd.f32 %v3093_v1, %v2938_v9  ;;  %v2940_v13 = vpop.f32.mrb[3].mxu0  ;;  %v3140_v15 = vadd.f32 %v3101_v53, %v2981_v12  ;;  %v2983_v18 = vpop.f32.mrb[3].mxu1 }
 0x221   : > { %v3952_v14 = vpack.c.bf16 %v3131_v56, %v3130_v5  ;;  %v3139_v16 = vadd.f32 %v3097_v57, %v2940_v13  ;;  %v3953_v19 = vpack.c.bf16 %v3133_v10, %v3132_v60  ;;  %v3141_v20 = vadd.f32 %v3105_v3, %v2983_v18 }
 0x223   : > { %3194 = vst [vmem:[%s5326_s5] sm:$0xff] %v3952_v14  ;;  %v3956_v21 = vpack.c.bf16 %v3139_v16, %v3138_v11  ;;  %3195 = vst [vmem:[%s5326_s5 + $0x8] sm:$0xff] %v3953_v19  ;;  %v3957_v22 = vpack.c.bf16 %v3141_v20, %v3140_v15 }
 0x225   : > { %3198 = vst [vmem:[%s5326_s5 + $0x20] sm:$0xff] %v3956_v21  ;;  %3199 = vst [vmem:[%s5326_s5 + $0x28] sm:$0xff] %v3957_v22 }
 0x25d   : > { %v3020_v30 = vpop.f32.mrb[4].mxu0  ;;  %v3063_v33 = vpop.f32.mrb[4].mxu1 }
 0x25e   : > { %v3134_v31 = vadd.f32 %v3109_v26, %v3020_v30  ;;  %v3022_v34 = vpop.f32.mrb[5].mxu0  ;;  %v3136_v35 = vadd.f32 %v3117_v27, %v3063_v33  ;;  %v3065_v37 = vpop.f32.mrb[5].mxu1 }
 0x25f   : > { %v3135_v36 = vadd.f32 %v3113_v28, %v3022_v34  ;;  %v3024_v38 = vpop.f32.mrb[6].mxu0  ;;  %v3137_v39 = vadd.f32 %v3121_v29, %v3065_v37  ;;  %v3067_v41 = vpop.f32.mrb[6].mxu1 }
 0x260   : > { %v3142_v40 = vadd.f32 %v3109_v26, %v3024_v38  ;;  %v3026_v42 = vpop.f32.mrb[7].mxu0  ;;  %v3144_v44 = vadd.f32 %v3117_v27, %v3067_v41  ;;  %v3069_v46 = vpop.f32.mrb[7].mxu1 }
 0x261   : > { %v3954_v43 = vpack.c.bf16 %v3135_v36, %v3134_v31  ;;  %v3143_v45 = vadd.f32 %v3113_v28, %v3026_v42  ;;  %v3955_v47 = vpack.c.bf16 %v3137_v39, %v3136_v35  ;;  %v3145_v48 = vadd.f32 %v3121_v29, %v3069_v46 }
 0x263   : > { %3196 = vst [vmem:[%s5326_s5 + $0x10] sm:$0xff] %v3954_v43  ;;  %v3958_v49 = vpack.c.bf16 %v3143_v45, %v3142_v40  ;;  %3197 = vst [vmem:[%s5326_s5 + $0x18] sm:$0xff] %v3955_v47  ;;  %v3959_v50 = vpack.c.bf16 %v3145_v48, %v3144_v44 }
 0x265   : > { %3200 = vst [vmem:[%s5326_s5 + $0x30] sm:$0xff] %v3958_v49  ;;  %3201 = vst [vmem:[%s5326_s5 + $0x38] sm:$0xff] %v3959_v50 }
 0x266 PF: > { %s13_s14 = sadd.s32 1, %s4046_s14   ;;  %s5349_s12 = smov %s4042_s13 }
 0x267   : > { %p10_p5 = scmp.ge.s32.totalorder %s13_s14, 4   ;;  %s5350_s13 = smov %s5352_s15 }
 0x269   :  { %12 = sbr.rel (!%p10_p5) target bundleno = 2 (0x2), region = 64 }

// kernel: tile.98
= control target key start
LH: loop header
LB: loop body
LE: loop exit
PB: predicated region body
PF: predicated region fallthrough
CT: control target
= control target key end

     0   :  { %s40_s0 = inlined_call_operand.vmem [shape: f32[4], index: 0, kind: input, shape index: {}]   ;;  %s41_s1 = inlined_call_operand.vmem [shape: f32[32,4], index: 1, kind: output, shape index: {}]  }
   0x1   :  { %v4_v0 = vld [vmem:[%s40_s0] ss:$0 sm:$0xff] }
   0x2   :  { %5 = vst [vmem:[%s41_s1] sm:$0xff] %v4_v0  ;;  %12 = vst [vmem:[%s41_s1 + $0x8] sm:$0xff] %v4_v0 }
   0x3   :  { %13 = vst [vmem:[%s41_s1 + $0x10] sm:$0xff] %v4_v0  ;;  %14 = vst [vmem:[%s41_s1 + $0x18] sm:$0xff] %v4_v0 }

// kernel: tile.99
= control target key start
LH: loop header
LB: loop body
LE: loop exit
PB: predicated region body
PF: predicated region fallthrough
CT: control target
= control target key end

     0   :  { %s259_s10 = smov 124   ;;  %s260_s11 = smov 116   ;;  %vm3_vm0 = vcmask 31744   ;;  %vm9_vm1 = vcmask 1048544   ;;  %vm15_vm2 = vcmask 1015744   ;;  %vm21_vm3 = vcmask 982944   ;;  %s399_s0 = inlined_call_operand.vmem [shape: f32[32,4], index: 0, kind: input, shape index: {}]   ;;  %s400_s1 = inlined_call_operand.vmem [shape: f32[1,128], index: 1, kind: output, shape index: {}]  }
   0x1   :  { %v197_v0 = vld [vmem:[%s399_s0 + $0x1f] sm:$0x1]   ;;  %v199_v1 = vld [vmem:[%s399_s0 + $0x1d] sm:$0x1]   ;;  %v198_v2 = vld [vmem:[%s399_s0 + $0x1e] sm:$0x1]  }
   0x2   :  { %7 = vrot.lane.b32.xlu0 %v197_v0, %s259_s10  ;;  %19 = vrot.lane.b32.xlu1 %v199_v1, %s260_s11  ;;  %v200_v3 = vld [vmem:[%s399_s0 + $0x1c] sm:$0x1]   ;;  %s261_s16 = smov 120   ;;  %s262_s17 = smov 112   ;;  %v201_v4 = vld [vmem:[%s399_s0 + $0x1b] sm:$0x1]  }
   0x3   :  { %v202_v5 = vld [vmem:[%s399_s0 + $0x1a] sm:$0x1]   ;;  %s263_s22 = smov 108   ;;  %s264_s23 = smov 104   ;;  %v203_v6 = vld [vmem:[%s399_s0 + $0x19] sm:$0x1]  }
   0x4   :  { %v204_v7 = vld [vmem:[%s399_s0 + $0x18] sm:$0x1]   ;;  %s265_s28 = smov 100   ;;  %s266_s29 = smov 96   ;;  %v205_v8 = vld [vmem:[%s399_s0 + $0x17] sm:$0x1]  }
   0x5   :  { %v206_v9 = vld [vmem:[%s399_s0 + $0x16] sm:$0x1]   ;;  %v2_v10 = vld [vmem:[%s399_s0] sm:$0x1]   ;;  %s267_s7 = smov 92   ;;  %s268_s8 = smov 88  }
   0x6   :  { %13 = vrot.lane.b32.xlu0 %v198_v2, %s261_s16  ;;  %25 = vrot.lane.b32.xlu1 %v200_v3, %s262_s17  ;;  %4 = vst.msk [vmem:[#allocation0] sm:$0x1] %vm3_vm0, %v2_v10   ;;  %v207_v11 = vld [vmem:[%s399_s0 + $0x15] sm:$0x1]   ;;  %v208_v12 = vld [vmem:[%s399_s0 + $0x14] sm:$0x1]  }
   0x7   :  { %s269_s13 = smov 84   ;;  %s270_s14 = smov 80   ;;  %v209_v13 = vld [vmem:[%s399_s0 + $0x13] sm:$0x1]   ;;  %v210_v14 = vld [vmem:[%s399_s0 + $0x12] sm:$0x1]  }
   0x8   :  { %s271_s19 = smov 76   ;;  %s272_s20 = smov 72   ;;  %v211_v15 = vld [vmem:[%s399_s0 + $0x11] sm:$0x1]   ;;  %v212_v16 = vld [vmem:[%s399_s0 + $0x10] sm:$0x1]  }
   0x9   :  { %s273_s25 = smov 68   ;;  %s274_s26 = smov 64   ;;  %v213_v17 = vld [vmem:[%s399_s0 + $0xf] sm:$0x1]   ;;  %v214_v18 = vld [vmem:[%s399_s0 + $0xe] sm:$0x1]  }
   0xa   :  { %31 = vrot.lane.b32.xlu0 %v201_v4, %s263_s22  ;;  %37 = vrot.lane.b32.xlu1 %v202_v5, %s264_s23  ;;  %s275_s2 = smov 60   ;;  %s276_s3 = smov 56   ;;  %v215_v19 = vld [vmem:[%s399_s0 + $0xd] sm:$0x1]   ;;  %v216_v20 = vld [vmem:[%s399_s0 + $0xc] sm:$0x1]  }
   0xb   :  { %s278_s9 = smov 48   ;;  %v217_v21 = vld [vmem:[%s399_s0 + $0xb] sm:$0x1]   ;;  %v218_v22 = vld [vmem:[%s399_s0 + $0xa] sm:$0x1]   ;;  %s280_s15 = smov 40  }
   0xc   :  { %v219_v23 = vld [vmem:[%s399_s0 + $0x9] sm:$0x1]   ;;  %v220_v24 = vld [vmem:[%s399_s0 + $0x8] sm:$0x1]   ;;  %s282_s21 = smov 32   ;;  %s284_s27 = smov 24  }
   0xd   :  { %v221_v25 = vld [vmem:[%s399_s0 + $0x7] sm:$0x1]   ;;  %v222_v26 = vld [vmem:[%s399_s0 + $0x6] sm:$0x1]   ;;  %v223_v27 = vld [vmem:[%s399_s0 + $0x5] sm:$0x1]  }
   0xe   :  { %43 = vrot.lane.b32.xlu0 %v203_v6, %s265_s28  ;;  %49 = vrot.lane.b32.xlu1 %v204_v7, %s266_s29  ;;  %v224_v28 = vld [vmem:[%s399_s0 + $0x4] sm:$0x1]   ;;  %s286_s4 = smov 16   ;;  %v225_v29 = vld [vmem:[%s399_s0 + $0x3] sm:$0x1]   ;;  %s288_s10 = smov 8  }
   0xf   :  { %v226_v30 = vld [vmem:[%s399_s0 + $0x2] sm:$0x1]   ;;  %v227_v31 = vld [vmem:[%s399_s0 + $0x1] sm:$0x1]   ;;  %s289_s0 = smov 4   ;;  %vm27_vm4 = vcmask 950144  }
  0x10   :  { %vm33_vm5 = vcmask 917344   ;;  %vm39_vm6 = vcmask 884544   ;;  %vm45_vm7 = vcmask 851744   ;;  %vm51_vm8 = vcmask 818944  }
  0x11   :  { %vm57_vm9 = vcmask 786144   ;;  %vm63_vm10 = vcmask 753344   ;;  %vm69_vm11 = vcmask 720544   ;;  %vm75_vm12 = vcmask 687744  }
  0x12   :  { %55 = vrot.lane.b32.xlu0 %v205_v8, %s267_s7  ;;  %61 = vrot.lane.b32.xlu1 %v206_v9, %s268_s8  ;;  %s277_s8 = smov 52   ;;  %vm81_vm13 = vcmask 654944   ;;  %vm87_vm14 = vcmask 622144   ;;  %vm93_vm15 = vcmask 589344   ;;  %vm99_vm0 = vcmask 556544  }
  0x16   :  { %67 = vrot.lane.b32.xlu0 %v207_v11, %s269_s13  ;;  %73 = vrot.lane.b32.xlu1 %v208_v12, %s270_s14  ;;  %s279_s14 = smov 44  }
  0x1a   :  { %79 = vrot.lane.b32.xlu0 %v209_v13, %s271_s19  ;;  %85 = vrot.lane.b32.xlu1 %v210_v14, %s272_s20  ;;  %s281_s20 = smov 36  }
  0x1e   :  { %91 = vrot.lane.b32.xlu0 %v211_v15, %s273_s25  ;;  %97 = vrot.lane.b32.xlu1 %v212_v16, %s274_s26  ;;  %s283_s26 = smov 28  }
  0x22   :  { %103 = vrot.lane.b32.xlu0 %v213_v17, %s275_s2  ;;  %109 = vrot.lane.b32.xlu1 %v214_v18, %s276_s3  ;;  %s285_s3 = smov 20  }
  0x26   :  { %115 = vrot.lane.b32.xlu0 %v215_v19, %s277_s8  ;;  %121 = vrot.lane.b32.xlu1 %v216_v20, %s278_s9  ;;  %s287_s9 = smov 12  }
  0x2a   :  { %127 = vrot.lane.b32.xlu0 %v217_v21, %s279_s14  ;;  %133 = vrot.lane.b32.xlu1 %v218_v22, %s280_s15 }
  0x2e   :  { %139 = vrot.lane.b32.xlu0 %v219_v23, %s281_s20  ;;  %145 = vrot.lane.b32.xlu1 %v220_v24, %s282_s21 }
  0x32   :  { %151 = vrot.lane.b32.xlu0 %v221_v25, %s283_s26  ;;  %157 = vrot.lane.b32.xlu1 %v222_v26, %s284_s27 }
  0x36   :  { %163 = vrot.lane.b32.xlu0 %v223_v27, %s285_s3  ;;  %169 = vrot.lane.b32.xlu1 %v224_v28, %s286_s4 }
  0x3a   :  { %175 = vrot.lane.b32.xlu0 %v225_v29, %s287_s9  ;;  %181 = vrot.lane.b32.xlu1 %v226_v30, %s288_s10 }
  0x3e   :  { %187 = vrot.lane.b32.xlu0 %v227_v31, %s289_s0 }
  0x74   :  { %v8_v32 = vpop.permute.xlu0 %7   ;;  %v20_v33 = vpop.permute.xlu1 %19  }
  0x75   :  { %10 = vst.msk [vmem:[#allocation0] sm:$0x1] %vm9_vm1, %v8_v32   ;;  %vm105_vm1 = vcmask 523744  }
  0x78   :  { %v14_v34 = vpop.permute.xlu0 %13   ;;  %v26_v35 = vpop.permute.xlu1 %25  }
  0x79   :  { %16 = vst.msk [vmem:[#allocation0] sm:$0x1] %vm15_vm2, %v14_v34   ;;  %vm111_vm2 = vcmask 490944  }
  0x7a   :  { %22 = vst.msk [vmem:[#allocation0] sm:$0x1] %vm21_vm3, %v20_v33   ;;  %vm117_vm3 = vcmask 458144  }
  0x7b   :  { %28 = vst.msk [vmem:[#allocation0] sm:$0x1] %vm27_vm4, %v26_v35   ;;  %vm123_vm4 = vcmask 425344  }
  0x7c   :  { %v32_v36 = vpop.permute.xlu0 %31   ;;  %v38_v37 = vpop.permute.xlu1 %37  }
  0x7d   :  { %34 = vst.msk [vmem:[#allocation0] sm:$0x1] %vm33_vm5, %v32_v36   ;;  %vm129_vm5 = vcmask 392544  }
  0x7e   :  { %40 = vst.msk [vmem:[#allocation0] sm:$0x1] %vm39_vm6, %v38_v37   ;;  %vm135_vm6 = vcmask 359744  }
  0x80   :  { %v44_v38 = vpop.permute.xlu0 %43   ;;  %v50_v39 = vpop.permute.xlu1 %49  }
  0x81   :  { %46 = vst.msk [vmem:[#allocation0] sm:$0x1] %vm45_vm7, %v44_v38   ;;  %vm141_vm7 = vcmask 326944  }
  0x82   :  { %52 = vst.msk [vmem:[#allocation0] sm:$0x1] %vm51_vm8, %v50_v39   ;;  %vm147_vm8 = vcmask 294144  }
  0x84   :  { %v56_v40 = vpop.permute.xlu0 %55   ;;  %v62_v41 = vpop.permute.xlu1 %61  }
  0x85   :  { %58 = vst.msk [vmem:[#allocation0] sm:$0x1] %vm57_vm9, %v56_v40   ;;  %vm153_vm9 = vcmask 261344  }
  0x86   :  { %64 = vst.msk [vmem:[#allocation0] sm:$0x1] %vm63_vm10, %v62_v41   ;;  %vm159_vm10 = vcmask 228544  }
  0x88   :  { %v68_v42 = vpop.permute.xlu0 %67   ;;  %v74_v43 = vpop.permute.xlu1 %73  }
  0x89   :  { %70 = vst.msk [vmem:[#allocation0] sm:$0x1] %vm69_vm11, %v68_v42   ;;  %vm165_vm11 = vcmask 195744  }
  0x8a   :  { %76 = vst.msk [vmem:[#allocation0] sm:$0x1] %vm75_vm12, %v74_v43   ;;  %vm171_vm12 = vcmask 162944  }
  0x8c   :  { %v80_v44 = vpop.permute.xlu0 %79   ;;  %v86_v45 = vpop.permute.xlu1 %85  }
  0x8d   :  { %82 = vst.msk [vmem:[#allocation0] sm:$0x1] %vm81_vm13, %v80_v44   ;;  %vm177_vm13 = vcmask 130144  }
  0x8e   :  { %88 = vst.msk [vmem:[#allocation0] sm:$0x1] %vm87_vm14, %v86_v45   ;;  %vm183_vm14 = vcmask 97344  }
  0x90   :  { %v92_v46 = vpop.permute.xlu0 %91   ;;  %v98_v47 = vpop.permute.xlu1 %97  }
  0x91   :  { %94 = vst.msk [vmem:[#allocation0] sm:$0x1] %vm93_vm15, %v92_v46   ;;  %vm189_vm15 = vcmask 64544  }
  0x92   :  { %100 = vst.msk [vmem:[#allocation0] sm:$0x1] %vm99_vm0, %v98_v47  }
  0x94   :  { %v104_v48 = vpop.permute.xlu0 %103   ;;  %v110_v49 = vpop.permute.xlu1 %109  }
  0x95   :  { %106 = vst.msk [vmem:[#allocation0] sm:$0x1] %vm105_vm1, %v104_v48  }
  0x96   :  { %112 = vst.msk [vmem:[#allocation0] sm:$0x1] %vm111_vm2, %v110_v49  }
  0x98   :  { %v116_v50 = vpop.permute.xlu0 %115   ;;  %v122_v51 = vpop.permute.xlu1 %121  }
  0x99   :  { %118 = vst.msk [vmem:[#allocation0] sm:$0x1] %vm117_vm3, %v116_v50  }
  0x9a   :  { %124 = vst.msk [vmem:[#allocation0] sm:$0x1] %vm123_vm4, %v122_v51  }
  0x9c   :  { %v128_v52 = vpop.permute.xlu0 %127   ;;  %v134_v53 = vpop.permute.xlu1 %133  }
  0x9d   :  { %130 = vst.msk [vmem:[#allocation0] sm:$0x1] %vm129_vm5, %v128_v52  }
  0x9e   :  { %136 = vst.msk [vmem:[#allocation0] sm:$0x1] %vm135_vm6, %v134_v53  }
  0xa0   :  { %v140_v54 = vpop.permute.xlu0 %139   ;;  %v146_v55 = vpop.permute.xlu1 %145  }
  0xa1   :  { %142 = vst.msk [vmem:[#allocation0] sm:$0x1] %vm141_vm7, %v140_v54  }
  0xa2   :  { %148 = vst.msk [vmem:[#allocation0] sm:$0x1] %vm147_vm8, %v146_v55  }
  0xa4   :  { %v152_v56 = vpop.permute.xlu0 %151   ;;  %v158_v57 = vpop.permute.xlu1 %157  }
  0xa5   :  { %154 = vst.msk [vmem:[#allocation0] sm:$0x1] %vm153_vm9, %v152_v56  }
  0xa6   :  { %160 = vst.msk [vmem:[#allocation0] sm:$0x1] %vm159_vm10, %v158_v57  }
  0xa8   :  { %v164_v58 = vpop.permute.xlu0 %163   ;;  %v170_v59 = vpop.permute.xlu1 %169  }
  0xa9   :  { %166 = vst.msk [vmem:[#allocation0] sm:$0x1] %vm165_vm11, %v164_v58  }
  0xaa   :  { %172 = vst.msk [vmem:[#allocation0] sm:$0x1] %vm171_vm12, %v170_v59  }
  0xac   :  { %v176_v60 = vpop.permute.xlu0 %175   ;;  %v182_v61 = vpop.permute.xlu1 %181  }
  0xad   :  { %178 = vst.msk [vmem:[#allocation0] sm:$0x1] %vm177_vm13, %v176_v60  }
  0xae   :  { %184 = vst.msk [vmem:[#allocation0] sm:$0x1] %vm183_vm14, %v182_v61  }
  0xb0   :  { %v188_v62 = vpop.permute.xlu0 %187  }
  0xb1   :  { %190 = vst.msk [vmem:[#allocation0] sm:$0x1] %vm189_vm15, %v188_v62  }
  0xb8   :  { %v194_v63 = vld [vmem:[#allocation0] sm:$0x1] }
  0xb9   :  { %196 = vst [vmem:[%s400_s1] sm:$0x1] %v194_v63 }

// kernel: g_forward.11
= control target key start
LH: loop header
LB: loop body
LE: loop exit
PB: predicated region body
PF: predicated region fallthrough
CT: control target
= control target key end

     0   :  { %s2134_s12 = smov 0   ;;  %s2136_s13 = smov 0   ;;  %s2592_s0 = inlined_call_operand.vmem [shape: bf16[2,34,512], index: 0, kind: input, shape index: {}]   ;;  %s2593_s1 = inlined_call_operand.vmem [shape: bf16[3,512,128], index: 1, kind: input, shape index: {}]   ;;  %s2594_s2 = inlined_call_operand.vmem [shape: f32[1,128], index: 2, kind: input, shape index: {}]   ;;  %s2595_s3 = inlined_call_operand.vmem [shape: f32[2,32,128], index: 3, kind: output, shape index: {}]  }
   0x1   :  { %s2138_s14 = smov 0  }
   0x2 LB: > { %s25_s15 = sadd.s32 1, %s2108_s13  ;;  %p1541_p0 = scmp.ge.s32.totalorder %s2112_s14, 1  ;;  %s2112_s14 = sphi %s2138_s14, %s13_s14   ;;  %s2108_s13 = sphi %s2136_s13, %s2597_s13   ;;  %s2104_s12 = sphi %s2134_s12, %s2596_s12  }
   0x3   : > { %p27_p1 = scmp.ge.s32.totalorder %s25_s15, 2  ;;  %p151_p2 = scmp.lt.s32.totalorder %s2112_s14, 3 }
   0x5   : > { %s2599_s15 = smov (%p27_p1, %s25_s15), 0  ;;  %p152_p3 = pnand %p1541_p0, %p151_p2 }
   0x6   : > { %v1978_v0 = vld [vmem:[%s2593_s1 + $0x140] sm:$0xff] (!%p152_p3)   ;;  %v1982_v4 = vld [vmem:[%s2593_s1 + $0x148] sm:$0xff] (!%p152_p3)   ;;  %v1986_v8 = vld [vmem:[%s2593_s1 + $0x150] sm:$0xff] (!%p152_p3)   ;;  %p179_p4 = scmp.lt.s32.totalorder (!%p152_p3), %s2104_s12, 1  ;;  %vm376_vm0 = vsmask.f32 (!%p152_p3), 7424 }
   0x7   : > { %155 = sbr.rel (%p152_p3) target bundleno = 337 (0x151), region = 32  ;;  %v1979_v1 = vld [vmem:[%s2593_s1 + $0x1c0] sm:$0xff] (!%p152_p3)   ;;  %1785 = vmatprep.subr.bf16.mxu0 (!%p152_p3), %v1978_v0  ;;  %v1983_v5 = vld [vmem:[%s2593_s1 + $0x1c8] sm:$0xff] (!%p152_p3)   ;;  %v1987_v9 = vld [vmem:[%s2593_s1 + $0x1d0] sm:$0xff] (!%p152_p3)   ;;  %vm1118_vm1 = vcmask (!%p152_p3), 1046528  }
   0x8   : > { %v1980_v2 = vld [vmem:[%s2593_s1 + $0x100] sm:$0xff] (!%p152_p3)   ;;  %1813 = vmatprep.subr.bf16.mxu1 (!%p152_p3), %v1979_v1  ;;  %v1984_v6 = vld [vmem:[%s2593_s1 + $0x108] sm:$0xff] (!%p152_p3)   ;;  %v1988_v10 = vld [vmem:[%s2593_s1 + $0x110] sm:$0xff] (!%p152_p3)  }
   0x9   : > { %v1981_v3 = vld [vmem:[%s2593_s1 + $0x180] sm:$0xff] (!%p152_p3)   ;;  %1786 = vmatpush3.bf16.msra.mxu0 (!%p152_p3), %v1980_v2  ;;  %v1985_v7 = vld [vmem:[%s2593_s1 + $0x188] sm:$0xff] (!%p152_p3)   ;;  %v1989_v11 = vld [vmem:[%s2593_s1 + $0x190] sm:$0xff] (!%p152_p3)  }
   0xa   : > { %1814 = vmatpush3.bf16.msra.mxu1 (!%p152_p3), %v1981_v3  ;;  %1787 = vmatprep.subr.bf16.mxu0 (!%p152_p3), %v1982_v4  ;;  %v1990_v12 = vld [vmem:[%s2593_s1 + $0x158] sm:$0xff] (!%p152_p3)   ;;  %v1994_v16 = vld [vmem:[%s2593_s1 + $0x160] sm:$0xff] (!%p152_p3)   ;;  %v1998_v20 = vld [vmem:[%s2593_s1 + $0x168] sm:$0xff] (!%p152_p3)  }
   0xb   : > { %1815 = vmatprep.subr.bf16.mxu1 (!%p152_p3), %v1983_v5  ;;  %v1991_v13 = vld [vmem:[%s2593_s1 + $0x1d8] sm:$0xff] (!%p152_p3)   ;;  %v1995_v17 = vld [vmem:[%s2593_s1 + $0x1e0] sm:$0xff] (!%p152_p3)   ;;  %v1999_v21 = vld [vmem:[%s2593_s1 + $0x1e8] sm:$0xff] (!%p152_p3)  }
   0xc   : > { %v1992_v14 = vld [vmem:[%s2593_s1 + $0x118] sm:$0xff] (!%p152_p3)   ;;  %v1996_v18 = vld [vmem:[%s2593_s1 + $0x120] sm:$0xff] (!%p152_p3)   ;;  %v2000_v22 = vld [vmem:[%s2593_s1 + $0x128] sm:$0xff] (!%p152_p3)  }
   0xd   : > { %1788 = vmatpush3.bf16.msra.mxu0 (!%p152_p3), %v1984_v6  ;;  %v1993_v15 = vld [vmem:[%s2593_s1 + $0x198] sm:$0xff] (!%p152_p3)   ;;  %v1997_v19 = vld [vmem:[%s2593_s1 + $0x1a0] sm:$0xff] (!%p152_p3)   ;;  %v2001_v23 = vld [vmem:[%s2593_s1 + $0x1a8] sm:$0xff] (!%p152_p3)  }
   0xe   : > { %1816 = vmatpush3.bf16.msra.mxu1 %v1985_v7  ;;  %1789 = vmatprep.subr.bf16.mxu0 %v1986_v8  ;;  %s2601_s12 = smov (!%p179_p4, %s2104_s12), 1  ;;  %v2002_v24 = vld [vmem:[%s2593_s1 + $0x170] sm:$0xff]   ;;  %v2006_v28 = vld [vmem:[%s2593_s1 + $0x178] sm:$0xff]   ;;  %v2022_v55 = vld [vmem:[%s2593_s1 + $0x40] sm:$0xff]  }
   0xf   : > { %1817 = vmatprep.subr.bf16.mxu1 %v1987_v9  ;;  %v2003_v25 = vld [vmem:[%s2593_s1 + $0x1f0] sm:$0xff]   ;;  %s1953_s24 = smul.u32 80, %s2601_s12  ;;  %v2007_v29 = vld [vmem:[%s2593_s1 + $0x1f8] sm:$0xff]   ;;  %v2023_v63 = vld [vmem:[%s2593_s1 + $0xc0] sm:$0xff]   ;;  %s1784_s29 = sshll.u32 %s2601_s12, 5 }
  0x10   : > { %v2004_v26 = vld [vmem:[%s2593_s1 + $0x130] sm:$0xff]   ;;  %v2008_v30 = vld [vmem:[%s2593_s1 + $0x138] sm:$0xff]   ;;  %v2024_v2 = vld [vmem:[%s2593_s1] sm:$0xff]   ;;  %s192_s7 = scalar_lea.vmem %s2595_s3, %s1784_s29 }
  0x11   : > { %1790 = vmatpush3.bf16.msra.mxu0 %v1988_v10  ;;  %v2005_v27 = vld [vmem:[%s2593_s1 + $0x1b0] sm:$0xff]   ;;  %s2255_s8 = scalar_lea.vmem %s2592_s0, %s1953_s24  ;;  %v2009_v31 = vld [vmem:[%s2593_s1 + $0x1b8] sm:$0xff]   ;;  %v2025_v5 = vld [vmem:[%s2593_s1 + $0x80] sm:$0xff]  }
  0x12   : > { %1818 = vmatpush3.bf16.msra.mxu1 %v1989_v11  ;;  %1791 = vmatprep.subr.bf16.mxu0 %v1990_v12  ;;  %v2261_v32 = vld [vmem:[%s2255_s8 + $0x4] ss:$16 sps:$4 sm:$0xff]   ;;  %v2270_v37 = vld [vmem:[%s2255_s8 + $0xc] ss:$16 sps:$4 sm:$0xff]   ;;  %v2276_v39 = vld [vmem:[%s2255_s8] ss:$16 sps:$4 sm:$0xff]  }
  0x13   : > { %1819 = vmatprep.subr.bf16.mxu1 %v1991_v13  ;;  %v2264_v33 = vld [vmem:[%s2255_s8 + $0x24] ss:$16 sps:$4 sm:$0xff]   ;;  %v390_v34 = vshrl.u32 %v2261_v32, 16  ;;  %v392_v35 = vshll.u32 %v2261_v32, 16  ;;  %v2273_v38 = vld [vmem:[%s2255_s8 + $0x2c] ss:$16 sps:$4 sm:$0xff]  }
  0x14   : > { %v397_v36 = vshll.u32 %v2264_v33, 16  ;;  %v2279_v40 = vld [vmem:[%s2255_s8 + $0x20] ss:$16 sps:$4 sm:$0xff]   ;;  %v414_v43 = vshrl.u32 %v2270_v37, 16  ;;  %v416_v44 = vshll.u32 %v2270_v37, 16  ;;  %v421_v46 = vshll.u32 %v2273_v38, 16 }
  0x15   : > { %1792 = vmatpush3.bf16.msra.mxu0 %v1992_v14  ;;  %v394_v41 = vrot.slane %v392_v35, 1  ;;  %v2286_v45 = vld [vmem:[%s2255_s8 + $0x8] ss:$16 sps:$4 sm:$0xff]   ;;  %v378_v47 = vshrl.u32 %v2276_v39, 16  ;;  %v380_v48 = vshll.u32 %v2276_v39, 16  ;;  %v385_v49 = vshll.u32 %v2279_v40, 16 }
  0x16   : > { %1820 = vmatpush3.bf16.msra.mxu1 %v1993_v15  ;;  %1793 = vmatprep.subr.bf16.mxu0 %v1994_v16  ;;  %v2281_v42 = vrot.slane %v397_v36, 1  ;;  %v2293_v50 = vld [vmem:[%s2255_s8 + $0x28] ss:$16 sps:$4 sm:$0xff]   ;;  %v418_v52 = vrot.slane %v416_v44, 1  ;;  %v402_v53 = vshrl.u32 %v2286_v45, 16  ;;  %v404_v54 = vshll.u32 %v2286_v45, 16 }
  0x17   : > { %1821 = vmatprep.subr.bf16.mxu1 %v1995_v17  ;;  %v395_v51 = vor.u32 %v394_v41, %v390_v34  ;;  %v2300_v56 = vrot.slane %v421_v46, 1  ;;  %v382_v57 = vrot.slane %v380_v48, 1  ;;  %v2302_v58 = vrot.slane %v385_v49, 1  ;;  %v2026_v7 = vld [vmem:[%s2593_s1 + $0x48] sm:$0xff]   ;;  %v2030_v12 = vld [vmem:[%s2593_s1 + $0x50] sm:$0xff]   ;;  %v2034_v17 = vld [vmem:[%s2593_s1 + $0x58] sm:$0xff]  }
  0x18   : > { %v409_v59 = vshll.u32 %v2293_v50, 16  ;;  %v419_v61 = vor.u32 %v418_v52, %v414_v43  ;;  %v406_v62 = vrot.slane %v404_v54, 1  ;;  %v2027_v9 = vld [vmem:[%s2593_s1 + $0xc8] sm:$0xff]   ;;  %v2031_v13 = vld [vmem:[%s2593_s1 + $0xd0] sm:$0xff]   ;;  %v1119_v16 = vrot.slane %v2276_v39, 1 }
  0x19   : > { %1794 = vmatpush3.bf16.msra.mxu0 %v1996_v18  ;;  %v400_v60 = vsel %vm376_vm0, %v395_v51, %v2281_v42  ;;  %v383_v0 = vor.u32 %v382_v57, %v378_v47  ;;  %v2028_v10 = vld [vmem:[%s2593_s1 + $0x8] sm:$0xff]   ;;  %v2032_v14 = vld [vmem:[%s2593_s1 + $0x10] sm:$0xff]   ;;  %v1120_v18 = vrot.slane %v2279_v40, 1  ;;  %v425_v35 = vshrl.u32 %v2279_v40, 16  ;;  %v203_v43 = vld [vmem:[%s2255_s8 + $0x40] sm:$0x11] }
  0x1a   : > { %1822 = vmatpush3.bf16.msra.mxu1 %v1997_v19  ;;  %1795 = vmatprep.subr.bf16.mxu0 %v1998_v20  ;;  %v2310_v1 = vrot.slane %v409_v59, 1  ;;  %v424_v3 = vsel %vm376_vm0, %v419_v61, %v2300_v56  ;;  %v407_v4 = vor.u32 %v406_v62, %v402_v53  ;;  %v2029_v11 = vld [vmem:[%s2593_s1 + $0x88] sm:$0xff]   ;;  %v2033_v15 = vld [vmem:[%s2593_s1 + $0x90] sm:$0xff]   ;;  %v2035_v19 = vld [vmem:[%s2593_s1 + $0xd8] sm:$0xff]   ;;  %v1125_v20 = vrot.slane %v2286_v45, 1 }
  0x1b   : > { %1823 = vmatprep.subr.bf16.mxu1 %v1999_v21  ;;  %689 = vmatprep.mubr.bf16.mxu0 %v400_v60  ;;  %v388_v6 = vsel %vm376_vm0, %v383_v0, %v2302_v58  ;;  %v2036_v21 = vld [vmem:[%s2593_s1 + $0x18] sm:$0xff]   ;;  %v2042_v34 = vld [vmem:[%s2593_s1 + $0x68] sm:$0xff]   ;;  %v441_v41 = vshrl.u32 %v2293_v50, 16  ;;  %v2398_v46 = vcombine.high %v203_v43, %v203_v43  ;;  %v2405_v49 = vcombine.low %v203_v43, %v203_v43  ;;  %v2051_v62 = vld [vmem:[%s2593_s1 + $0xf0] sm:$0xff]  }
  0x1c   : > { %738 = vmatprep.mubr.bf16.mxu1 %v424_v3  ;;  %v412_v8 = vsel %vm376_vm0, %v407_v4, %v2310_v1  ;;  %v2043_v36 = vld [vmem:[%s2593_s1 + $0xe8] sm:$0xff]   ;;  %v427_v59 = vor.u32 %v425_v35, %v2302_v58  ;;  %v2052_v58 = vld [vmem:[%s2593_s1 + $0x30] sm:$0xff]   ;;  %v2074_v35 = vld [vmem:[%s2593_s1 + $0x260] sm:$0xff]  }
  0x1d   : > { %1796 = vmatpush3.bf16.msra.mxu0 %v2000_v22  ;;  %v2363_v22 = vsel %vm1118_vm1, %v1119_v16, %v1120_v18  ;;  %v204_v44 = vld [vmem:[%s2255_s8 + $0x48] sm:$0x11]  ;;  %v429_v60 = vshll.u32 %v2405_v49, 16  ;;  %v2077_v43 = vld [vmem:[%s2593_s1 + $0x2a0] sm:$0xff]  }
  0x1e   : > { %1824 = vmatpush3.bf16.msra.mxu1 %v2001_v23  ;;  %1797 = vmatprep.subr.bf16.mxu0 %v2002_v24  ;;  %v1126_v23 = vrot.slane %v2293_v50, 1  ;;  %v2037_v24 = vld [vmem:[%s2593_s1 + $0x98] sm:$0xff]   ;;  %v2400_v47 = vcombine.high %v204_v44, %v204_v44  ;;  %v2046_v48 = vld [vmem:[%s2593_s1 + $0x28] sm:$0xff]   ;;  %v2412_v54 = vcombine.low %v204_v44, %v204_v44 }
  0x1f   : > { %1825 = vmatprep.subr.bf16.mxu1 %v2003_v25  ;;  %v2038_v25 = vld [vmem:[%s2593_s1 + $0x60] sm:$0xff]   ;;  %v2047_v53 = vld [vmem:[%s2593_s1 + $0xa8] sm:$0xff]  }
  0x20   : > { %v453_v57 = vshll.u32 %v2400_v47, 16  ;;  %v445_v61 = vshll.u32 %v2412_v54, 16  ;;  %v2062_v16 = vld [vmem:[%s2593_s1 + $0x248] sm:$0xff]  }
  0x21   : > { %1798 = vmatpush3.bf16.msra.mxu0 %v2004_v26  ;;  %v2375_v26 = vsel %vm1118_vm1, %v1125_v20, %v1126_v23  ;;  %v1122_v20 = vrot.slane %v2261_v32, 1  ;;  %v2078_v44 = vld [vmem:[%s2593_s1 + $0x268] sm:$0xff]  }
  0x22   : > { %1826 = vmatpush3.bf16.msra.mxu1 %v2005_v27  ;;  %1799 = vmatprep.subr.bf16.mxu0 %v2006_v28  ;;  %v2039_v27 = vld [vmem:[%s2593_s1 + $0xe0] sm:$0xff]   ;;  %v455_v0 = vrot.slane %v453_v57, 1  ;;  %v447_v3 = vrot.slane %v445_v61, 1  ;;  %v2084_v57 = vld [vmem:[%s2593_s1 + $0x230] sm:$0xff]   ;;  %v2089_v61 = vld [vmem:[%s2593_s1 + $0x2b8] sm:$0xff]  }
  0x23   : > { %1827 = vmatprep.subr.bf16.mxu1 %v2007_v29  ;;  %v2040_v28 = vld [vmem:[%s2593_s1 + $0x20] sm:$0xff]   ;;  %v433_v29 = vshrl.u32 %v2264_v33, 16 }
  0x25   : > { %1800 = vmatpush3.bf16.msra.mxu0 %v2008_v30  ;;  %v2041_v30 = vld [vmem:[%s2593_s1 + $0xa0] sm:$0xff]   ;;  %v435_v51 = vor.u32 %v433_v29, %v2281_v42  ;;  %v2050_v42 = vld [vmem:[%s2593_s1 + $0x70] sm:$0xff]  }
  0x26   : > { %1828 = vmatpush3.bf16.msra.mxu1 %v2009_v31  ;;  %1841 = vmatprep.subr.bf16.mxu0 %v2022_v55  ;;  %v449_v31 = vshrl.u32 %v2273_v38, 16  ;;  %v437_v55 = vshll.u32 %v2398_v46, 16 }
  0x27   : > { %1869 = vmatprep.subr.bf16.mxu1 %v2023_v63 }
  0x28   : > { %690 = vmatmul.mubr.bf16.vlgmr.msra.gmra.mrb[0].mxu0 %v388_v6  ;;  %v451_v52 = vor.u32 %v449_v31, %v2300_v56  ;;  %v443_v56 = vor.u32 %v441_v41, %v2310_v1  ;;  %v439_v63 = vrot.slane %v437_v55, 1  ;;  %v2053_v1 = vld [vmem:[%s2593_s1 + $0xb0] sm:$0xff]   ;;  %v2072_v31 = vld [vmem:[%s2593_s1 + $0x218] sm:$0xff]   ;;  %v2076_v41 = vld [vmem:[%s2593_s1 + $0x220] sm:$0xff]  }
  0x29   : > { %739 = vmatmul.mubr.bf16.vlgmr.msra.gmra.mrb[0].mxu1 %v412_v8  ;;  %1842 = vmatpush3.bf16.msra.mxu0 %v2024_v2  ;;  %v431_v2 = vrot.slane %v429_v60, 1  ;;  %v2054_v8 = vld [vmem:[%s2593_s1 + $0x78] sm:$0xff]   ;;  %v2083_v55 = vld [vmem:[%s2593_s1 + $0x2f0] sm:$0xff]  }
  0x2a   : > { %1870 = vmatpush3.bf16.msra.mxu1 %v2025_v5  ;;  %1843 = vmatprep.subr.bf16.mxu0 %v2026_v7  ;;  %v440_v4 = vsel %vm376_vm0, %v435_v51, %v439_v63  ;;  %v456_v5 = vsel %vm376_vm0, %v451_v52, %v455_v0  ;;  %v448_v7 = vsel %vm376_vm0, %v443_v56, %v447_v3  ;;  %v2080_v51 = vld [vmem:[%s2593_s1 + $0x228] sm:$0xff]   ;;  %v2086_v60 = vld [vmem:[%s2593_s1 + $0x278] sm:$0xff]   ;;  %v1137_v63 = vrot.slane %v2400_v47, 1 }
  0x2b   : > { %1871 = vmatprep.subr.bf16.mxu1 %v2027_v9  ;;  %v432_v6 = vsel %vm376_vm0, %v427_v59, %v431_v2  ;;  %697 = vmatprep.mubr.bf16.mxu0 %v440_v4  ;;  %v2055_v9 = vld [vmem:[%s2593_s1 + $0xf8] sm:$0xff]   ;;  %v2081_v52 = vld [vmem:[%s2593_s1 + $0x2a8] sm:$0xff]   ;;  %v2085_v59 = vld [vmem:[%s2593_s1 + $0x2b0] sm:$0xff]  }
  0x2c   : > { %746 = vmatprep.mubr.bf16.mxu1 %v456_v5  ;;  %v2088_v56 = vld [vmem:[%s2593_s1 + $0x238] sm:$0xff]  }
  0x2d   : > { %1844 = vmatpush3.bf16.msra.mxu0 %v2028_v10  ;;  %v2056_v10 = vld [vmem:[%s2593_s1 + $0x38] sm:$0xff]  }
  0x2e   : > { %1872 = vmatpush3.bf16.msra.mxu1 %v2029_v11  ;;  %1845 = vmatprep.subr.bf16.mxu0 %v2030_v12  ;;  %v2057_v11 = vld [vmem:[%s2593_s1 + $0xb8] sm:$0xff]   ;;  %v2058_v12 = vld [vmem:[%s2593_s1 + $0x240] sm:$0xff]  }
  0x2f   : > { %1873 = vmatprep.subr.bf16.mxu1 %v2031_v13  ;;  %v2059_v13 = vld [vmem:[%s2593_s1 + $0x2c0] sm:$0xff]  }
  0x30   : > { %698 = vmatmul.mubr.bf16.gmra.mrb[4].mxu0 %v432_v6 }
  0x31   : > { %1846 = vmatpush3.bf16.msra.mxu0 %v2032_v14  ;;  %747 = vmatmul.mubr.bf16.gmra.mrb[4].mxu1 %v448_v7  ;;  %v2060_v14 = vld [vmem:[%s2593_s1 + $0x200] sm:$0xff]  }
  0x32   : > { %1874 = vmatpush3.bf16.msra.mxu1 %v2033_v15  ;;  %1847 = vmatprep.subr.bf16.mxu0 %v2034_v17  ;;  %v2061_v15 = vld [vmem:[%s2593_s1 + $0x280] sm:$0xff]   ;;  %v2063_v17 = vld [vmem:[%s2593_s1 + $0x2c8] sm:$0xff]  }
  0x33   : > { %1875 = vmatprep.subr.bf16.mxu1 %v2035_v19  ;;  %987 = vmatprep.mubr.bf16.mxu0 %v2261_v32  ;;  %v2064_v19 = vld [vmem:[%s2593_s1 + $0x208] sm:$0xff]   ;;  %v2067_v32 = vld [vmem:[%s2593_s1 + $0x2d0] sm:$0xff]  }
  0x34   : > { %1036 = vmatprep.mubr.bf16.mxu1 %v2270_v37 }
  0x35   : > { %1848 = vmatpush3.bf16.msra.mxu0 %v2036_v21  ;;  %v2066_v21 = vld [vmem:[%s2593_s1 + $0x250] sm:$0xff]  }
  0x36   : > { %1876 = vmatpush3.bf16.msra.mxu1 %v2037_v24  ;;  %1849 = vmatprep.subr.bf16.mxu0 %v2038_v25  ;;  %v1128_v24 = vrot.slane %v2270_v37, 1  ;;  %v1129_v25 = vrot.slane %v2273_v38, 1  ;;  %v2070_v37 = vld [vmem:[%s2593_s1 + $0x258] sm:$0xff]  }
  0x37   : > { %1877 = vmatprep.subr.bf16.mxu1 %v2039_v27  ;;  %v2068_v27 = vld [vmem:[%s2593_s1 + $0x210] sm:$0xff]  }
  0x38   : > { %v1138_v2 = vsel %vm1118_vm1, %v1129_v25, %v1137_v63 }
  0x39   : > { %1850 = vmatpush3.bf16.msra.mxu0 %v2040_v28  ;;  %v2069_v28 = vld [vmem:[%s2593_s1 + $0x290] sm:$0xff]  }
  0x3a   : > { %1878 = vmatpush3.bf16.msra.mxu1 %v2041_v30  ;;  %1851 = vmatprep.subr.bf16.mxu0 %v2042_v34  ;;  %v1130_v30 = vsel %vm1118_vm1, %v1128_v24, %v1129_v25  ;;  %v2073_v34 = vld [vmem:[%s2593_s1 + $0x298] sm:$0xff]  }
  0x3b   : > { %1879 = vmatprep.subr.bf16.mxu1 %v2043_v36  ;;  %v2075_v36 = vld [vmem:[%s2593_s1 + $0x2e0] sm:$0xff]  }
  0x3d   : > { %1852 = vmatpush3.bf16.msra.mxu0 %v2046_v48  ;;  %v2079_v48 = vld [vmem:[%s2593_s1 + $0x2e8] sm:$0xff]  }
  0x3e   : > { %1880 = vmatpush3.bf16.msra.mxu1 %v2047_v53  ;;  %1853 = vmatprep.subr.bf16.mxu0 %v2050_v42  ;;  %v2082_v53 = vld [vmem:[%s2593_s1 + $0x270] sm:$0xff]   ;;  %v2087_v42 = vld [vmem:[%s2593_s1 + $0x2f8] sm:$0xff]  }
  0x3f   : > { %1881 = vmatprep.subr.bf16.mxu1 %v2051_v62  ;;  %v1133_v62 = vrot.slane %v2398_v46, 1  ;;  %v1135_v46 = vrot.slane %v2412_v54, 1 }
  0x41   : > { %1854 = vmatpush3.bf16.msra.mxu0 %v2052_v58  ;;  %v1131_v58 = vrot.slane %v2405_v49, 1 }
  0x42   : > { %1882 = vmatpush3.bf16.msra.mxu1 %v2053_v1  ;;  %1855 = vmatprep.subr.bf16.mxu0 %v2054_v8 }
  0x43   : > { %1883 = vmatprep.subr.bf16.mxu1 %v2055_v9  ;;  %v1132_v47 = vsel %vm1118_vm1, %v1120_v18, %v1131_v58 }
  0x45   : > { %1856 = vmatpush3.bf16.msra.mxu0 %v2056_v10 }
  0x46   : > { %1884 = vmatpush3.bf16.msra.mxu1 %v2057_v11  ;;  %1897 = vmatprep.subr.bf16.mxu0 %v2058_v12 }
  0x47   : > { %1925 = vmatprep.subr.bf16.mxu1 %v2059_v13 }
  0x48   : > { %988 = vmatmul.mubr.bf16.vlgmr.msra.gmra.mrb[8].mxu0 %v2276_v39  ;;  %v2065_v39 = vld [vmem:[%s2593_s1 + $0x288] sm:$0xff]  }
  0x49   : > { %1037 = vmatmul.mubr.bf16.vlgmr.msra.gmra.mrb[8].mxu1 %v2286_v45  ;;  %1898 = vmatpush3.bf16.msra.mxu0 %v2060_v14  ;;  %v1123_v45 = vrot.slane %v2264_v33, 1 }
  0x4a   : > { %1926 = vmatpush3.bf16.msra.mxu1 %v2061_v15  ;;  %1899 = vmatprep.subr.bf16.mxu0 %v2062_v16 }
  0x4b   : > { %1927 = vmatprep.subr.bf16.mxu1 %v2063_v17  ;;  %995 = vmatprep.mubr.bf16.mxu0 %v2264_v33  ;;  %v1124_v29 = vsel %vm1118_vm1, %v1122_v20, %v1123_v45  ;;  %v1134_v0 = vsel %vm1118_vm1, %v1123_v45, %v1133_v62  ;;  %v1136_v33 = vsel %vm1118_vm1, %v1126_v23, %v1135_v46 }
  0x4c   : > { %1044 = vmatprep.mubr.bf16.mxu1 %v2273_v38  ;;  %v2071_v38 = vld [vmem:[%s2593_s1 + $0x2d8] sm:$0xff]  }
  0x4d   : > { %1900 = vmatpush3.bf16.msra.mxu0 %v2064_v19 }
  0x4e   : > { %1928 = vmatpush3.bf16.msra.mxu1 %v2065_v39  ;;  %1901 = vmatprep.subr.bf16.mxu0 %v2066_v21 }
  0x4f   : > { %1929 = vmatprep.subr.bf16.mxu1 %v2067_v32 }
  0x50   : > { %996 = vmatmul.mubr.bf16.gmra.mrb[12].mxu0 %v2279_v40 }
  0x51   : > { %1045 = vmatmul.mubr.bf16.gmra.mrb[12].mxu1 %v2293_v50  ;;  %1902 = vmatpush3.bf16.msra.mxu0 %v2068_v27 }
  0x52   : > { %1930 = vmatpush3.bf16.msra.mxu1 %v2069_v28  ;;  %1903 = vmatprep.subr.bf16.mxu0 %v2070_v37 }
  0x53   : > { %1931 = vmatprep.subr.bf16.mxu1 %v2071_v38  ;;  %1371 = vmatprep.mubr.bf16.mxu0 %v1124_v29 }
  0x54   : > { %1420 = vmatprep.mubr.bf16.mxu1 %v1130_v30 }
  0x55   : > { %1904 = vmatpush3.bf16.msra.mxu0 %v2072_v31 }
  0x56   : > { %1932 = vmatpush3.bf16.msra.mxu1 %v2073_v34  ;;  %1905 = vmatprep.subr.bf16.mxu0 %v2074_v35 }
  0x57   : > { %1933 = vmatprep.subr.bf16.mxu1 %v2075_v36 }
  0x59   : > { %1906 = vmatpush3.bf16.msra.mxu0 %v2076_v41 }
  0x5a   : > { %1934 = vmatpush3.bf16.msra.mxu1 %v2077_v43  ;;  %1907 = vmatprep.subr.bf16.mxu0 %v2078_v44 }
  0x5b   : > { %1935 = vmatprep.subr.bf16.mxu1 %v2079_v48 }
  0x5d   : > { %1908 = vmatpush3.bf16.msra.mxu0 %v2080_v51 }
  0x5e   : > { %1936 = vmatpush3.bf16.msra.mxu1 %v2081_v52  ;;  %1909 = vmatprep.subr.bf16.mxu0 %v2082_v53 }
  0x5f   : > { %1937 = vmatprep.subr.bf16.mxu1 %v2083_v55 }
  0x61   : > { %1910 = vmatpush3.bf16.msra.mxu0 %v2084_v57 }
  0x62   : > { %1938 = vmatpush3.bf16.msra.mxu1 %v2085_v59  ;;  %1911 = vmatprep.subr.bf16.mxu0 %v2086_v60 }
  0x63   : > { %1939 = vmatprep.subr.bf16.mxu1 %v2087_v42 }
  0x65   : > { %1912 = vmatpush3.bf16.msra.mxu0 %v2088_v56 }
  0x66   : > { %1940 = vmatpush3.bf16.msra.mxu1 %v2089_v61 }
  0x68   : > { %1372 = vmatmul.mubr.bf16.vlgmr.msra.gmra.mrb[16].mxu0 %v2363_v22 }
  0x69   : > { %1421 = vmatmul.mubr.bf16.vlgmr.msra.gmra.mrb[16].mxu1 %v2375_v26  ;;  %1379 = vmatprep.mubr.bf16.mxu0 %v1134_v0 }
  0x6a   : > { %1428 = vmatprep.mubr.bf16.mxu1 %v1138_v2 }
  0x70   : > { %1380 = vmatmul.mubr.bf16.gmra.mrb[20].mxu0 %v1132_v47 }
  0x71   : > { %1429 = vmatmul.mubr.bf16.gmra.mrb[20].mxu1 %v1136_v33 }
  0xfb   : > { %v1801_v3 = vpop.f32.mrb[0].mxu0 }
  0xfc   : > { %v1829_v22 = vpop.f32.mrb[0].mxu1  ;;  %v1802_v1 = vpop.f32.mrb[1].mxu0 }
  0xfd   : > { %v1803_v26 = vadd.f32 %v1802_v1, %v1801_v3  ;;  %v1830_v4 = vpop.f32.mrb[1].mxu1  ;;  %v1804_v5 = vpop.f32.mrb[2].mxu0 }
  0xfe   : > { %v1831_v6 = vadd.f32 %v1830_v4, %v1829_v22  ;;  %v1832_v49 = vpop.f32.mrb[2].mxu1  ;;  %v1805_v7 = vpop.f32.mrb[3].mxu0 }
  0xff   : > { %v1806_v54 = vadd.f32 %v1805_v7, %v1804_v5  ;;  %v1833_v8 = vpop.f32.mrb[3].mxu1 }
 0x100   : > { %v741_v40 = vadd.f32 %v1831_v6, %v1803_v26  ;;  %v1834_v9 = vadd.f32 %v1833_v8, %v1832_v49 }
 0x102   : > { %v744_v18 = vadd.f32 %v1834_v9, %v1806_v54  ;;  %v1781_v54 = vld [vmem:[%s2594_s2] ss:$0 sm:$0xff] }
 0x103   : > { %v1807_v10 = vpop.f32.mrb[4].mxu0 }
 0x104   : > { %v1835_v50 = vpop.f32.mrb[4].mxu1  ;;  %v1808_v11 = vpop.f32.mrb[5].mxu0 }
 0x105   : > { %v1836_v23 = vpop.f32.mrb[5].mxu1  ;;  %v1809_v12 = vadd.f32 %v1808_v11, %v1807_v10  ;;  %v1810_v14 = vpop.f32.mrb[6].mxu0 }
 0x106   : > { %v1837_v13 = vadd.f32 %v1836_v23, %v1835_v50  ;;  %v1838_v15 = vpop.f32.mrb[6].mxu1  ;;  %v1811_v16 = vpop.f32.mrb[7].mxu0 }
 0x107   : > { %v1839_v17 = vpop.f32.mrb[7].mxu1  ;;  %v1812_v20 = vadd.f32 %v1811_v16, %v1810_v14 }
 0x108   : > { %v749_v19 = vadd.f32 %v1837_v13, %v1809_v12  ;;  %v1840_v39 = vadd.f32 %v1839_v17, %v1838_v15 }
 0x10a   : > { %v752_v45 = vadd.f32 %v1840_v39, %v1812_v20 }
 0x11b   : > { %v1857_v21 = vpop.f32.mrb[8].mxu0 }
 0x11c   : > { %v1885_v24 = vpop.f32.mrb[8].mxu1  ;;  %v1858_v32 = vpop.f32.mrb[9].mxu0 }
 0x11d   : > { %v1886_v25 = vpop.f32.mrb[9].mxu1  ;;  %v1859_v27 = vadd.f32 %v1858_v32, %v1857_v21  ;;  %v1860_v37 = vpop.f32.mrb[10].mxu0 }
 0x11e   : > { %v1887_v28 = vadd.f32 %v1886_v25, %v1885_v24  ;;  %v1888_v38 = vpop.f32.mrb[10].mxu1  ;;  %v1861_v29 = vpop.f32.mrb[11].mxu0 }
 0x11f   : > { %v1889_v30 = vpop.f32.mrb[11].mxu1  ;;  %v990_v31 = vadd.f32 %v1859_v27, %v741_v40  ;;  %v1862_v34 = vadd.f32 %v1861_v29, %v1860_v37 }
 0x120   : > { %v1890_v35 = vadd.f32 %v1889_v30, %v1888_v38 }
 0x121   : > { %v1039_v36 = vadd.f32 %v1887_v28, %v990_v31  ;;  %v993_v41 = vadd.f32 %v1862_v34, %v744_v18 }
 0x123   : > { %v1042_v43 = vadd.f32 %v1890_v35, %v993_v41  ;;  %v1863_v44 = vpop.f32.mrb[12].mxu0 }
 0x124   : > { %v1891_v48 = vpop.f32.mrb[12].mxu1  ;;  %v1864_v51 = vpop.f32.mrb[13].mxu0 }
 0x125   : > { %v1892_v52 = vpop.f32.mrb[13].mxu1  ;;  %v1865_v53 = vadd.f32 %v1864_v51, %v1863_v44  ;;  %v1866_v55 = vpop.f32.mrb[14].mxu0 }
 0x126   : > { %v1893_v57 = vadd.f32 %v1892_v52, %v1891_v48  ;;  %v1894_v59 = vpop.f32.mrb[14].mxu1  ;;  %v1867_v60 = vpop.f32.mrb[15].mxu0 }
 0x127   : > { %v1895_v42 = vpop.f32.mrb[15].mxu1  ;;  %v998_v56 = vadd.f32 %v1865_v53, %v749_v19  ;;  %v1868_v61 = vadd.f32 %v1867_v60, %v1866_v55 }
 0x128   : > { %v1896_v62 = vadd.f32 %v1895_v42, %v1894_v59 }
 0x129   : > { %v1001_v63 = vadd.f32 %v1868_v61, %v752_v45  ;;  %v1047_v0 = vadd.f32 %v1893_v57, %v998_v56 }
 0x12b   : > { %v1050_v2 = vadd.f32 %v1896_v62, %v1001_v63 }
 0x13b   : > { %v1913_v58 = vpop.f32.mrb[16].mxu0 }
 0x13c   : > { %v1941_v46 = vpop.f32.mrb[16].mxu1  ;;  %v1914_v47 = vpop.f32.mrb[17].mxu0 }
 0x13d   : > { %v1942_v33 = vpop.f32.mrb[17].mxu1  ;;  %v1915_v3 = vadd.f32 %v1914_v47, %v1913_v58  ;;  %v1916_v1 = vpop.f32.mrb[18].mxu0 }
 0x13e   : > { %v1943_v22 = vadd.f32 %v1942_v33, %v1941_v46  ;;  %v1944_v26 = vpop.f32.mrb[18].mxu1  ;;  %v1917_v4 = vpop.f32.mrb[19].mxu0 }
 0x13f   : > { %v1945_v5 = vpop.f32.mrb[19].mxu1  ;;  %v1918_v49 = vadd.f32 %v1917_v4, %v1916_v1 }
 0x140   : > { %v1423_v6 = vadd.f32 %v1943_v22, %v1915_v3  ;;  %v1946_v7 = vadd.f32 %v1945_v5, %v1944_v26 }
 0x142   : > { %v1437_v8 = vadd.f32 %v1423_v6, %v1039_v36  ;;  %v1426_v40 = vadd.f32 %v1946_v7, %v1918_v49 }
 0x143   : > { %v1919_v10 = vpop.f32.mrb[20].mxu0 }
 0x144   : > { %v1448_v9 = vadd.f32 %v1781_v54, %v1437_v8  ;;  %v1438_v18 = vadd.f32 %v1426_v40, %v1042_v43  ;;  %v1947_v50 = vpop.f32.mrb[20].mxu1  ;;  %v1920_v11 = vpop.f32.mrb[21].mxu0 }
 0x145   : > { %v1948_v23 = vpop.f32.mrb[21].mxu1  ;;  %v1921_v13 = vadd.f32 %v1920_v11, %v1919_v10  ;;  %v1922_v15 = vpop.f32.mrb[22].mxu0 }
 0x146   : > { %1452 = vst [vmem:[%s192_s7] sm:$0xff] %v1448_v9  ;;  %v1449_v12 = vadd.f32 %v1781_v54, %v1438_v18  ;;  %v1949_v14 = vadd.f32 %v1948_v23, %v1947_v50  ;;  %v1950_v16 = vpop.f32.mrb[22].mxu1  ;;  %v1923_v17 = vpop.f32.mrb[23].mxu0 }
 0x147   : > { %v1951_v19 = vpop.f32.mrb[23].mxu1  ;;  %v1924_v39 = vadd.f32 %v1923_v17, %v1922_v15 }
 0x148   : > { %1453 = vst [vmem:[%s192_s7 + $0x8] sm:$0xff] %v1449_v12  ;;  %v1431_v20 = vadd.f32 %v1949_v14, %v1921_v13  ;;  %v1952_v45 = vadd.f32 %v1951_v19, %v1950_v16 }
 0x14a   : > { %v1439_v21 = vadd.f32 %v1431_v20, %v1047_v0  ;;  %v1434_v24 = vadd.f32 %v1952_v45, %v1924_v39 }
 0x14c   : > { %v1450_v32 = vadd.f32 %v1781_v54, %v1439_v21  ;;  %v1440_v25 = vadd.f32 %v1434_v24, %v1050_v2 }
 0x14e   : > { %1454 = vst [vmem:[%s192_s7 + $0x10] sm:$0xff] %v1450_v32  ;;  %v1451_v27 = vadd.f32 %v1781_v54, %v1440_v25 }
 0x150   : > { %1455 = vst [vmem:[%s192_s7 + $0x18] sm:$0xff] %v1451_v27 }
 0x151 PF: > { %s13_s14 = sadd.s32 1, %s2112_s14   ;;  %s2596_s12 = smov %s2108_s13 }
 0x152   : > { %p10_p5 = scmp.ge.s32.totalorder %s13_s14, 4   ;;  %s2597_s13 = smov %s2599_s15 }
 0x154   :  { %12 = sbr.rel (!%p10_p5) target bundleno = 2 (0x2), region = 64 }

</bundles_post_ra>
